<compile_context>
chip_gen: v6e
topology: v6e:2x2x1
jax: 0.10.0
libtpu: 0.0.40
codegen_flags: <defaults>
</compile_context>

<pallas_src>
import functools

import jax
import jax.numpy as jnp
from jax import lax
from jax.experimental import pallas as pl
from jax.experimental.pallas import tpu as pltpu

_COMPUTE_DTYPE = jnp.bfloat16


def _round_up(x, m):
    return ((x + m - 1) // m) * m


def _pick_tile_m(M):
    """Largest row tile (multiple of 8, <= M) whose padding waste is <= ~M/8."""
    if M < 8:
        return M
    limit = max(M // 8, 8)
    for t in (512, 256, 128, 64, 32, 16, 8):
        if t <= M and (pl.cdiv(M, t) * t - M) <= limit:
            return t
    return 8


# ----------------------------------------------------------------------------
# Tiled linear kernel:  (tile_m, K) @ (K, tile_n) + b  ->  (tile_m, tile_n)
# Weights arrive pre-transposed and pre-padded (lane-dense N).
# ----------------------------------------------------------------------------
def _linear_kernel(x_ref, wt_ref, b_ref, o_ref):
    acc = jnp.dot(x_ref[...], wt_ref[...], preferred_element_type=jnp.float32)
    o_ref[...] = (acc + b_ref[...]).astype(o_ref.dtype)


def linear(x2d, w_t, b_row, n_out, *, out_dtype):
    """x2d: (M, K); w_t: (K, n_pad) pre-transposed/padded; b_row: (1, n_pad)."""
    M, K = x2d.shape
    n_pad = w_t.shape[1]
    tile_m = _pick_tile_m(M)
    tile_n = n_pad if n_pad <= 1024 else 512
    grid = (pl.cdiv(M, tile_m), pl.cdiv(n_pad, tile_n))

    out = pl.pallas_call(
        _linear_kernel,
        out_shape=jax.ShapeDtypeStruct((M, n_pad), out_dtype),
        grid=grid,
        in_specs=[
            pl.BlockSpec((tile_m, K), lambda i, j: (i, 0)),
            pl.BlockSpec((K, tile_n), lambda i, j: (0, j)),
            pl.BlockSpec((1, tile_n), lambda i, j: (0, j)),
        ],
        out_specs=pl.BlockSpec((tile_m, tile_n), lambda i, j: (i, j)),
        compiler_params=pltpu.CompilerParams(
            dimension_semantics=("parallel", "parallel")),
    )(x2d.astype(w_t.dtype), w_t, b_row)

    if n_pad != n_out:
        out = out[:, :n_out]
    return out


# ----------------------------------------------------------------------------
# Flash-style self-attention. Inputs are views of the fused QKV tensor
# (B, S, 3, H, Dh); output is (B, S, H, Dh) (view-reshapeable to (B*S, E)).
# All heads are processed per grid step (static unroll); online softmax with
# running (m, l, acc) scratch; key-padding mask only on boundary KV tiles;
# fully-padded KV tiles are skipped and their DMAs suppressed via index-map
# clamping on the prefetched lengths.
# ----------------------------------------------------------------------------
def _flash_kernel(lens_ref, q_ref, k_ref, v_ref, o_ref, m_sc, l_sc, acc_sc):
    b = pl.program_id(0)
    kv_i = pl.program_id(2)
    tk = k_ref.shape[0]
    n_heads = q_ref.shape[1]
    length = lens_ref[b]
    kv_start = kv_i * tk

    @pl.when(kv_i == 0)
    def _init():
        m_sc[...] = jnp.full_like(m_sc, -jnp.inf)
        l_sc[...] = jnp.zeros_like(l_sc)
        acc_sc[...] = jnp.zeros_like(acc_sc)

    def _process(masked):
        if masked:
            kv_ids = kv_start + lax.broadcasted_iota(jnp.int32, (1, tk), 1)
            kmask = kv_ids >= length                       # (1, tk) key padding
        for h in range(n_heads):                           # static head unroll
            q_h = q_ref[:, h, :]                           # (tq, Dh); scale folded in Wq
            k_h = k_ref[:, h, :]                           # (tk, Dh)
            # scores = q @ k^T without an explicit in-kernel transpose
            s = lax.dot_general(q_h, k_h, (((1,), (1,)), ((), ())),
                                preferred_element_type=jnp.float32)  # (tq, tk)
            if masked:
                s = jnp.where(kmask, jnp.float32(-1e30), s)
            m_prev = m_sc[h]
            m_new = jnp.maximum(m_prev, jnp.max(s, axis=-1, keepdims=True))
            alpha = jnp.exp(m_prev - m_new)
            p = jnp.exp(s - m_new)
            l_sc[h] = alpha * l_sc[h] + jnp.sum(p, axis=-1, keepdims=True)
            acc_sc[h] = alpha * acc_sc[h] + jnp.dot(
                p.astype(v_ref.dtype), v_ref[:, h, :],
                preferred_element_type=jnp.float32)
            m_sc[h] = m_new

    any_valid = kv_start < length                 # at least one un-padded key
    full_tile = kv_start + tk <= length           # no masking needed (fast path)

    @pl.when(jnp.logical_and(any_valid, full_tile))
    def _fast():
        _process(masked=False)

    @pl.when(jnp.logical_and(any_valid, jnp.logical_not(full_tile)))
    def _boundary():
        _process(masked=True)

    @pl.when(kv_i == pl.num_programs(2) - 1)
    def _finalize():
        for h in range(n_heads):
            l_h = l_sc[h]
            # zero-length rows: l == 0 -> output 0 (no inf/NaN)
            inv_l = jnp.where(
                l_h > 0.0,
                pl.reciprocal(jnp.maximum(l_h, jnp.float32(1e-30)), approx=True),
                jnp.float32(0.0))
            o_ref[:, h, :] = (acc_sc[h] * inv_l).astype(o_ref.dtype)


def flash_attention(qkv, lens, *, block_q=128, block_k=256):
    """qkv: (B, S, 3, H, Dh); lens: (B,) int32. Returns (B, S, H, Dh)."""
    B, S, three, H, Dh = qkv.shape
    assert three == 3
    tq = min(block_q, S)
    tk = min(block_k, S)
    nq = pl.cdiv(S, tq)
    nk = pl.cdiv(S, tk)

    def q_map(b, qi, ki, lens_ref):
        return (b, qi, 0, 0, 0)

    def kv_map_for(sel):
        def kv_map(b, qi, ki, lens_ref):
            # Clamp fully-padded KV tiles onto the last valid tile so the
            # pipeline re-uses the resident block instead of issuing new DMAs.
            last = jnp.maximum(pl.cdiv(lens_ref[b], tk) - 1, 0)
            return (b, jnp.minimum(ki, last), sel, 0, 0)
        return kv_map

    def o_map(b, qi, ki, lens_ref):
        return (b, qi, 0, 0)

    return pl.pallas_call(
        _flash_kernel,
        out_shape=jax.ShapeDtypeStruct((B, S, H, Dh), qkv.dtype),
        grid_spec=pltpu.PrefetchScalarGridSpec(
            num_scalar_prefetch=1,
            grid=(B, nq, nk),
            in_specs=[
                pl.BlockSpec((None, tq, None, H, Dh), q_map),         # Q view
                pl.BlockSpec((None, tk, None, H, Dh), kv_map_for(1)),  # K view
                pl.BlockSpec((None, tk, None, H, Dh), kv_map_for(2)),  # V view
            ],
            out_specs=pl.BlockSpec((None, tq, H, Dh), o_map),
            scratch_shapes=[
                pltpu.VMEM((H, tq, 1), jnp.float32),    # running max
                pltpu.VMEM((H, tq, 1), jnp.float32),    # running denom
                pltpu.VMEM((H, tq, Dh), jnp.float32),   # running numerator
            ],
        ),
        compiler_params=pltpu.CompilerParams(
            dimension_semantics=("parallel", "parallel", "arbitrary")),
    )(lens, qkv, qkv, qkv)


# ----------------------------------------------------------------------------
# One-time parameter preparation: transpose, fold Q scale, pad lane dims to a
# multiple of 128, cast to bf16. Nothing here runs per forward call.
# ----------------------------------------------------------------------------
def _prep_linear(w, b, compute_dtype):
    """w: (N, K) torch layout -> (K, n_pad) transposed/padded; b -> (1, n_pad)."""
    N, K = w.shape
    n_pad = _round_up(N, 128)
    w_t = jnp.asarray(w).T.astype(compute_dtype)
    b_f = jnp.asarray(b).astype(jnp.float32)
    if n_pad != N:
        w_t = jnp.pad(w_t, ((0, 0), (0, n_pad - N)))
        b_f = jnp.pad(b_f, (0, n_pad - N))
    return w_t, b_f.reshape(1, n_pad)


def prepare_params(params, num_heads, compute_dtype=_COMPUTE_DTYPE):
    E = params["w_lin"].shape[1]
    Dh = E // num_heads
    scale = float(Dh) ** -0.5
    q_scale = jnp.concatenate(
        [jnp.full((E,), scale, jnp.float32), jnp.ones((2 * E,), jnp.float32)])

    layers = []
    for (w_in, b_in, w_out, b_out) in params["layers"]:
        w_in_s = w_in * q_scale[:, None]          # fold 1/sqrt(Dh) into Wq rows
        b_in_s = b_in * q_scale
        w_in_t, b_in_p = _prep_linear(w_in_s, b_in_s, compute_dtype)
        w_out_t, b_out_p = _prep_linear(w_out, b_out, compute_dtype)
        layers.append(dict(w_in_t=w_in_t, b_in=b_in_p,
                           w_out_t=w_out_t, b_out=b_out_p))
    w_lin_t, b_lin_p = _prep_linear(params["w_lin"], params["b_lin"],
                                    compute_dtype)
    return dict(
        wpe=params["wpe"].astype(jnp.float32),
        layers=layers,
        w_lin_t=w_lin_t,
        b_lin=b_lin_p,
    )


# ----------------------------------------------------------------------------
# Full forward pass (glue in JAX, hot paths in Pallas kernels), jit end-to-end.
# ----------------------------------------------------------------------------
@functools.partial(jax.jit, static_argnames=("num_heads", "output_dim"))
def attentions_forward(x, x_len, kparams, *, num_heads, output_dim):
    B, S, E = x.shape
    H = num_heads
    Dh = E // H

    # positional_embedding_type == 'embed': add learned positional embeddings
    h = (x + kparams["wpe"][:S][None]).astype(_COMPUTE_DTYPE)
    lens = x_len.astype(jnp.int32)

    for lyr in kparams["layers"]:
        # QKV in-projection (tiled Pallas linear, 1/sqrt(Dh) pre-folded)
        qkv = linear(h.reshape(B * S, E), lyr["w_in_t"], lyr["b_in"], 3 * E,
                     out_dtype=_COMPUTE_DTYPE)            # (B*S, 3E)
        qkv = qkv.reshape(B, S, 3, H, Dh)                 # free view, no copy

        ctx = flash_attention(qkv, lens)                  # (B, S, H, Dh)

        # output projection; dropout is identity at inference
        h = linear(ctx.reshape(B * S, E), lyr["w_out_t"], lyr["b_out"], E,
                   out_dtype=_COMPUTE_DTYPE).reshape(B, S, E)

    out = linear(h.reshape(B * S, E), kparams["w_lin_t"], kparams["b_lin"],
                 output_dim, out_dtype=jnp.float32)
    return out.reshape(B, S, output_dim), x_len


# ----------------------------------------------------------------------------
# Pure-JAX f32 reference for a numerical sanity check.
# ----------------------------------------------------------------------------
def reference_forward(x, x_len, params, num_heads):
    B, S, E = x.shape
    Dh = E // num_heads
    h = x + params["wpe"][:S][None]
    key_mask = jnp.arange(S)[None, :] >= x_len[:, None]      # (B, S), True=pad
    for (w_in, b_in, w_out, b_out) in params["layers"]:
        qkv = h @ w_in.T + b_in
        q, k, v = jnp.split(qkv, 3, axis=-1)
        q = q.reshape(B, S, num_heads, Dh).transpose(0, 2, 1, 3)
        k = k.reshape(B, S, num_heads, Dh).transpose(0, 2, 1, 3)
        v = v.reshape(B, S, num_heads, Dh).transpose(0, 2, 1, 3)
        s = jnp.einsum("bhqd,bhkd->bhqk", q, k) / jnp.sqrt(jnp.float32(Dh))
        s = jnp.where(key_mask[:, None, None, :], -1e30, s)
        p = jax.nn.softmax(s, axis=-1)
        ctx = jnp.einsum("bhqk,bhkd->bhqd", p, v)
        ctx = ctx.transpose(0, 2, 1, 3).reshape(B, S, E)
        h = ctx @ w_out.T + b_out
    out = h @ params["w_lin"].T + params["b_lin"]
    return out, x_len


if __name__ == "__main__":
    # Small, forward-consistent shapes
    B, S, E = 2, 8, 32           # batch, seq_len, embed_dim (= input_dim)
    num_heads = 4
    num_layers = 2
    output_dim = 16
    max_seq_len = 16

    key = jax.random.PRNGKey(0)
    keys = jax.random.split(key, 4 + 4 * num_layers)

    x = jax.random.normal(keys[0], (B, S, E), dtype=jnp.float32)
    x_len = jnp.array([S, 5], dtype=jnp.int32)

    # deterministic parameter init (synthetic; shapes follow __init__)
    params = {
        "wpe": 0.02 * jax.random.normal(keys[1], (max_seq_len, E), jnp.float32),
        "layers": [],
        "w_lin": 0.1 * jax.random.normal(keys[2], (output_dim, E), jnp.float32),
        "b_lin": 0.1 * jax.random.normal(keys[3], (output_dim,), jnp.float32),
    }
    for i in range(num_layers):
        kq = keys[4 + 4 * i: 4 + 4 * (i + 1)]
        w_in = 0.1 * jax.random.normal(kq[0], (3 * E, E), jnp.float32)
        b_in = 0.05 * jax.random.normal(kq[1], (3 * E,), jnp.float32)
        w_out = 0.1 * jax.random.normal(kq[2], (E, E), jnp.float32)
        b_out = 0.05 * jax.random.normal(kq[3], (E,), jnp.float32)
        params["layers"].append((w_in, b_in, w_out, b_out))

    kparams = prepare_params(params, num_heads)      # one-time layout/scale prep
    out, out_len = attentions_forward(x, x_len, kparams,
                                      num_heads=num_heads,
                                      output_dim=output_dim)
    out = jax.block_until_ready(out)

    ref, _ = reference_forward(x, x_len, params, num_heads)
    assert out.shape == (B, S, output_dim)
    # bf16 MXU inputs (f32 accumulation / f32 softmax) => loosened tolerance
    assert jnp.allclose(out, ref, rtol=3e-2, atol=3e-2), "mismatch vs reference"

    print("KERNEL_OK")
</pallas_src>

<mosaic_0001>
module attributes {stable_mosaic.version = 11 : i64} {
  func.func @_linear_kernel(%arg0: i32, %arg1: i32, %arg2: memref<16x32xbf16, #tpu.memory_space<vmem>>, %arg3: memref<32x128xbf16, #tpu.memory_space<vmem>>, %arg4: memref<1x128xf32, #tpu.memory_space<vmem>>, %arg5: memref<16x128xbf16, #tpu.memory_space<vmem>>) attributes {dimension_semantics = [#tpu.dimension_semantics<parallel>, #tpu.dimension_semantics<parallel>], iteration_bounds = array<i64: 1, 1>, scalar_prefetch = 0 : i64, scratch_operands = 0 : i64, tpu.core_type = #tpu.core_type<tc>, window_params = [{transform_indices = @transform_0, window_bounds = array<i64: 16, 32>}, {transform_indices = @transform_1, window_bounds = array<i64: 32, 128>}, {transform_indices = @transform_2, window_bounds = array<i64: 1, 128>}, {transform_indices = @transform_3, window_bounds = array<i64: 16, 128>}]} {
    %c0 = arith.constant 0 : index
    %c0_0 = arith.constant 0 : index
    %0 = vector.load %arg2[%c0, %c0_0] : memref<16x32xbf16, #tpu.memory_space<vmem>>, vector<16x32xbf16>
    %c0_1 = arith.constant 0 : index
    %c0_2 = arith.constant 0 : index
    %1 = vector.load %arg3[%c0_1, %c0_2] : memref<32x128xbf16, #tpu.memory_space<vmem>>, vector<32x128xbf16>
    %cst = arith.constant dense<0.000000e+00> : vector<16x128xf32>
    %2 = tpu.matmul %0, %1, %cst {dimension_numbers = #tpu.dot_dimension_numbers<[1], [0], [0], [1], [0, 0, 1, 1], [], []>} : vector<16x32xbf16>, vector<32x128xbf16>, vector<16x128xf32> -> vector<16x128xf32>
    %c0_3 = arith.constant 0 : index
    %c0_4 = arith.constant 0 : index
    %3 = vector.load %arg4[%c0_3, %c0_4] : memref<1x128xf32, #tpu.memory_space<vmem>>, vector<1x128xf32>
    %4 = vector.broadcast %3 : vector<1x128xf32> to vector<16x128xf32>
    %5 = arith.addf %2, %4 : vector<16x128xf32>
    %6 = arith.truncf %5 : vector<16x128xf32> to vector<16x128xbf16>
    %c0_5 = arith.constant 0 : index
    %c0_6 = arith.constant 0 : index
    %7 = vector.load %arg5[%c0_5, %c0_6] : memref<16x128xbf16, #tpu.memory_space<vmem>>, vector<16x128xbf16>
    tpu.vector_store %arg5[%c0_5, %c0_6], %6 {strides = array<i32>} : memref<16x128xbf16, #tpu.memory_space<vmem>>, vector<16x128xbf16>,
    return
  }
  func.func @transform_0(%arg0: i32, %arg1: i32) -> (i32, i32) {
    %c0_i32 = arith.constant 0 : i32
    %c0_i32_0 = arith.constant 0 : i32
    return %arg0, %c0_i32 : i32, i32
  }
  func.func @transform_1(%arg0: i32, %arg1: i32) -> (i32, i32) {
    %c0_i32 = arith.constant 0 : i32
    %c0_i32_0 = arith.constant 0 : i32
    return %c0_i32, %arg1 : i32, i32
  }
  func.func @transform_2(%arg0: i32, %arg1: i32) -> (i32, i32) {
    %c0_i32 = arith.constant 0 : i32
    %c0_i32_0 = arith.constant 0 : i32
    return %c0_i32, %arg1 : i32, i32
  }
  func.func @transform_3(%arg0: i32, %arg1: i32) -> (i32, i32) {
    %c0_i32 = arith.constant 0 : i32
    return %arg0, %arg1 : i32, i32
  }
}

module attributes {stable_mosaic.version = 11 : i64} {
  func.func @_flash_kernel(%arg0: i32, %arg1: i32, %arg2: i32, %arg3: memref<2xi32, #tpu.memory_space<smem>>, %arg4: memref<1x8x1x4x8xbf16, #tpu.memory_space<vmem>>, %arg5: memref<1x8x1x4x8xbf16, #tpu.memory_space<vmem>>, %arg6: memref<1x8x1x4x8xbf16, #tpu.memory_space<vmem>>, %arg7: memref<1x8x4x8xbf16, #tpu.memory_space<vmem>>, %arg8: memref<4x8x1xf32, #tpu.memory_space<vmem>>, %arg9: memref<4x8x1xf32, #tpu.memory_space<vmem>>, %arg10: memref<4x8x8xf32, #tpu.memory_space<vmem>>) attributes {dimension_semantics = [#tpu.dimension_semantics<parallel>, #tpu.dimension_semantics<parallel>, #tpu.dimension_semantics<arbitrary>], iteration_bounds = array<i64: 2, 1, 1>, scalar_prefetch = 1 : i64, scratch_operands = 3 : i64, tpu.core_type = #tpu.core_type<tc>, window_params = [{transform_indices = @transform_0, window_bounds = array<i64: 1, 8, 1, 4, 8>}, {transform_indices = @transform_1, window_bounds = array<i64: 1, 8, 1, 4, 8>}, {transform_indices = @transform_2, window_bounds = array<i64: 1, 8, 1, 4, 8>}, {transform_indices = @transform_3, window_bounds = array<i64: 1, 8, 4, 8>}]} {
    %0 = arith.index_cast %arg0 : i32 to index
    %1 = memref.load %arg3[%0] : memref<2xi32, #tpu.memory_space<smem>>
    %c8_i32 = arith.constant 8 : i32
    %2 = arith.muli %arg2, %c8_i32 : i32
    %c0_i32 = arith.constant 0 : i32
    %3 = arith.cmpi eq, %arg2, %c0_i32 : i32
    %4 = arith.extui %3 : i1 to i32
    %c0_i32_0 = arith.constant 0 : i32
    %5 = arith.cmpi ne, %4, %c0_i32_0 : i32
    scf.if %5 {
      %cst = arith.constant 0xFF800000 : f32
      %19 = vector.broadcast %cst : f32 to vector<4x8x1xf32>
      %c0 = arith.constant 0 : index
      %c0_6 = arith.constant 0 : index
      %c0_7 = arith.constant 0 : index
      %20 = vector.load %arg8[%c0, %c0_6, %c0_7] : memref<4x8x1xf32, #tpu.memory_space<vmem>>, vector<4x8x1xf32>
      tpu.vector_store %arg8[%c0, %c0_6, %c0_7], %19 {strides = array<i32>} : memref<4x8x1xf32, #tpu.memory_space<vmem>>, vector<4x8x1xf32>,
      %cst_8 = arith.constant 0.000000e+00 : f32
      %21 = vector.broadcast %cst_8 : f32 to vector<4x8x1xf32>
      %c0_9 = arith.constant 0 : index
      %c0_10 = arith.constant 0 : index
      %c0_11 = arith.constant 0 : index
      %22 = vector.load %arg9[%c0_9, %c0_10, %c0_11] : memref<4x8x1xf32, #tpu.memory_space<vmem>>, vector<4x8x1xf32>
      tpu.vector_store %arg9[%c0_9, %c0_10, %c0_11], %21 {strides = array<i32>} : memref<4x8x1xf32, #tpu.memory_space<vmem>>, vector<4x8x1xf32>,
      %cst_12 = arith.constant 0.000000e+00 : f32
      %23 = vector.broadcast %cst_12 : f32 to vector<4x8x8xf32>
      %c0_13 = arith.constant 0 : index
      %c0_14 = arith.constant 0 : index
      %c0_15 = arith.constant 0 : index
      %24 = vector.load %arg10[%c0_13, %c0_14, %c0_15] : memref<4x8x8xf32, #tpu.memory_space<vmem>>, vector<4x8x8xf32>
      tpu.vector_store %arg10[%c0_13, %c0_14, %c0_15], %23 {strides = array<i32>} : memref<4x8x8xf32, #tpu.memory_space<vmem>>, vector<4x8x8xf32>,
    } else {
    }
    %6 = arith.cmpi slt, %2, %1 : i32
    %c8_i32_1 = arith.constant 8 : i32
    %7 = arith.addi %2, %c8_i32_1 : i32
    %8 = arith.cmpi sle, %7, %1 : i32
    %9 = arith.andi %6, %8 : i1
    %10 = arith.extui %9 : i1 to i32
    %c0_i32_2 = arith.constant 0 : i32
    %11 = arith.cmpi ne, %10, %c0_i32_2 : i32
    scf.if %11 {
      %c0 = arith.constant 0 : index
      %c0_6 = arith.constant 0 : index
      %c0_7 = arith.constant 0 : index
      %c0_8 = arith.constant 0 : index
      %c0_9 = arith.constant 0 : index
      %19 = vector.load %arg4[%c0, %c0_6, %c0_7, %c0_8, %c0_9] : memref<1x8x1x4x8xbf16, #tpu.memory_space<vmem>>, vector<1x8x1x1x8xbf16>
      %20 = vector.shape_cast %19 : vector<1x8x1x1x8xbf16> to vector<8x8xbf16>
      %c0_10 = arith.constant 0 : index
      %c0_11 = arith.constant 0 : index
      %c0_12 = arith.constant 0 : index
      %c0_13 = arith.constant 0 : index
      %c0_14 = arith.constant 0 : index
      %21 = vector.load %arg5[%c0_10, %c0_11, %c0_12, %c0_13, %c0_14] : memref<1x8x1x4x8xbf16, #tpu.memory_space<vmem>>, vector<1x8x1x1x8xbf16>
      %22 = vector.shape_cast %21 : vector<1x8x1x1x8xbf16> to vector<8x8xbf16>
      %cst = arith.constant dense<0.000000e+00> : vector<8x8xf32>
      %23 = tpu.matmul %20, %22, %cst {dimension_numbers = #tpu.dot_dimension_numbers<[1], [1], [0], [0], [0, 0, 1, 0], [], []>} : vector<8x8xbf16>, vector<8x8xbf16>, vector<8x8xf32> -> vector<8x8xf32>
      %c0_15 = arith.constant 0 : index
      %c0_16 = arith.constant 0 : index
      %c0_17 = arith.constant 0 : index
      %24 = vector.load %arg8[%c0_15, %c0_16, %c0_17] : memref<4x8x1xf32, #tpu.memory_space<vmem>>, vector<1x8x1xf32>
      %25 = vector.shape_cast %24 : vector<1x8x1xf32> to vector<8x1xf32>
      %cst_18 = arith.constant dense<0xFF800000> : vector<8xf32>
      %26 = vector.multi_reduction <maximumf>, %23, %cst_18 [1] : vector<8x8xf32> to vector<8xf32>
      %27 = vector.shape_cast %26 : vector<8xf32> to vector<8x1xf32>
      %28 = arith.maximumf %25, %27 : vector<8x1xf32>
      %29 = arith.subf %25, %28 : vector<8x1xf32>
      %30 = math.exp %29 : vector<8x1xf32>
      %31 = vector.broadcast %28 : vector<8x1xf32> to vector<8x8xf32>
      %32 = arith.subf %23, %31 : vector<8x8xf32>
      %33 = math.exp %32 : vector<8x8xf32>
      %c0_19 = arith.constant 0 : index
      %c0_20 = arith.constant 0 : index
      %c0_21 = arith.constant 0 : index
      %34 = vector.load %arg9[%c0_19, %c0_20, %c0_21] : memref<4x8x1xf32, #tpu.memory_space<vmem>>, vector<1x8x1xf32>
      %35 = vector.shape_cast %34 : vector<1x8x1xf32> to vector<8x1xf32>
      %36 = arith.mulf %30, %35 : vector<8x1xf32>
      %cst_22 = arith.constant dense<0.000000e+00> : vector<8xf32>
      %37 = vector.multi_reduction <add>, %33, %cst_22 [1] : vector<8x8xf32> to vector<8xf32>
      %38 = vector.shape_cast %37 : vector<8xf32> to vector<8x1xf32>
      %39 = arith.addf %36, %38 : vector<8x1xf32>
      %c0_23 = arith.constant 0 : index
      %c0_24 = arith.constant 0 : index
      %c0_25 = arith.constant 0 : index
      %40 = vector.load %arg9[%c0_23, %c0_24, %c0_25] : memref<4x8x1xf32, #tpu.memory_space<vmem>>, vector<1x8x1xf32>
      %41 = vector.shape_cast %40 : vector<1x8x1xf32> to vector<8x1xf32>
      %42 = vector.shape_cast %39 : vector<8x1xf32> to vector<1x8x1xf32>
      tpu.vector_store %arg9[%c0_23, %c0_24, %c0_25], %42 {strides = array<i32>} : memref<4x8x1xf32, #tpu.memory_space<vmem>>, vector<1x8x1xf32>,
      %c0_26 = arith.constant 0 : index
      %c0_27 = arith.constant 0 : index
      %c0_28 = arith.constant 0 : index
      %43 = vector.load %arg10[%c0_26, %c0_27, %c0_28] : memref<4x8x8xf32, #tpu.memory_space<vmem>>, vector<1x8x8xf32>
      %44 = vector.shape_cast %43 : vector<1x8x8xf32> to vector<8x8xf32>
      %45 = vector.broadcast %30 : vector<8x1xf32> to vector<8x8xf32>
      %46 = arith.mulf %45, %44 : vector<8x8xf32>
      %47 = arith.truncf %33 : vector<8x8xf32> to vector<8x8xbf16>
      %c0_29 = arith.constant 0 : index
      %c0_30 = arith.constant 0 : index
      %c0_31 = arith.constant 0 : index
      %c0_32 = arith.constant 0 : index
      %c0_33 = arith.constant 0 : index
      %48 = vector.load %arg6[%c0_29, %c0_30, %c0_31, %c0_32, %c0_33] : memref<1x8x1x4x8xbf16, #tpu.memory_space<vmem>>, vector<1x8x1x1x8xbf16>
      %49 = vector.shape_cast %48 : vector<1x8x1x1x8xbf16> to vector<8x8xbf16>
      %cst_34 = arith.constant dense<0.000000e+00> : vector<8x8xf32>
      %50 = tpu.matmul %47, %49, %cst_34 {dimension_numbers = #tpu.dot_dimension_numbers<[1], [0], [0], [1], [0, 0, 1, 1], [], []>} : vector<8x8xbf16>, vector<8x8xbf16>, vector<8x8xf32> -> vector<8x8xf32>
      %51 = arith.addf %46, %50 : vector<8x8xf32>
      %c0_35 = arith.constant 0 : index
      %c0_36 = arith.constant 0 : index
      %c0_37 = arith.constant 0 : index
      %52 = vector.load %arg10[%c0_35, %c0_36, %c0_37] : memref<4x8x8xf32, #tpu.memory_space<vmem>>, vector<1x8x8xf32>
      %53 = vector.shape_cast %52 : vector<1x8x8xf32> to vector<8x8xf32>
      %54 = vector.shape_cast %51 : vector<8x8xf32> to vector<1x8x8xf32>
      tpu.vector_store %arg10[%c0_35, %c0_36, %c0_37], %54 {strides = array<i32>} : memref<4x8x8xf32, #tpu.memory_space<vmem>>, vector<1x8x8xf32>,
      %c0_38 = arith.constant 0 : index
      %c0_39 = arith.constant 0 : index
      %c0_40 = arith.constant 0 : index
      %55 = vector.load %arg8[%c0_38, %c0_39, %c0_40] : memref<4x8x1xf32, #tpu.memory_space<vmem>>, vector<1x8x1xf32>
      %56 = vector.shape_cast %55 : vector<1x8x1xf32> to vector<8x1xf32>
      %57 = vector.shape_cast %28 : vector<8x1xf32> to vector<1x8x1xf32>
      tpu.vector_store %arg8[%c0_38, %c0_39, %c0_40], %57 {strides = array<i32>} : memref<4x8x1xf32, #tpu.memory_space<vmem>>, vector<1x8x1xf32>,
      %c0_41 = arith.constant 0 : index
      %c0_42 = arith.constant 0 : index
      %c0_43 = arith.constant 0 : index
      %c1 = arith.constant 1 : index
      %c0_44 = arith.constant 0 : index
      %58 = vector.load %arg4[%c0_41, %c0_42, %c0_43, %c1, %c0_44] : memref<1x8x1x4x8xbf16, #tpu.memory_space<vmem>>, vector<1x8x1x1x8xbf16>
      %59 = vector.shape_cast %58 : vector<1x8x1x1x8xbf16> to vector<8x8xbf16>
      %c0_45 = arith.constant 0 : index
      %c0_46 = arith.constant 0 : index
      %c0_47 = arith.constant 0 : index
      %c1_48 = arith.constant 1 : index
      %c0_49 = arith.constant 0 : index
      %60 = vector.load %arg5[%c0_45, %c0_46, %c0_47, %c1_48, %c0_49] : memref<1x8x1x4x8xbf16, #tpu.memory_space<vmem>>, vector<1x8x1x1x8xbf16>
      %61 = vector.shape_cast %60 : vector<1x8x1x1x8xbf16> to vector<8x8xbf16>
      %cst_50 = arith.constant dense<0.000000e+00> : vector<8x8xf32>
      %62 = tpu.matmul %59, %61, %cst_50 {dimension_numbers = #tpu.dot_dimension_numbers<[1], [1], [0], [0], [0, 0, 1, 0], [], []>} : vector<8x8xbf16>, vector<8x8xbf16>, vector<8x8xf32> -> vector<8x8xf32>
      %c1_51 = arith.constant 1 : index
      %c0_52 = arith.constant 0 : index
      %c0_53 = arith.constant 0 : index
      %63 = vector.load %arg8[%c1_51, %c0_52, %c0_53] : memref<4x8x1xf32, #tpu.memory_space<vmem>>, vector<1x8x1xf32>
      %64 = vector.shape_cast %63 : vector<1x8x1xf32> to vector<8x1xf32>
      %cst_54 = arith.constant dense<0xFF800000> : vector<8xf32>
      %65 = vector.multi_reduction <maximumf>, %62, %cst_54 [1] : vector<8x8xf32> to vector<8xf32>
      %66 = vector.shape_cast %65 : vector<8xf32> to vector<8x1xf32>
      %67 = arith.maximumf %64, %66 : vector<8x1xf32>
      %68 = arith.subf %64, %67 : vector<8x1xf32>
      %69 = math.exp %68 : vector<8x1xf32>
      %70 = vector.broadcast %67 : vector<8x1xf32> to vector<8x8xf32>
      %71 = arith.subf %62, %70 : vector<8x8xf32>
      %72 = math.exp %71 : vector<8x8xf32>
      %c1_55 = arith.constant 1 : index
      %c0_56 = arith.constant 0 : index
      %c0_57 = arith.constant 0 : index
      %73 = vector.load %arg9[%c1_55, %c0_56, %c0_57] : memref<4x8x1xf32, #tpu.memory_space<vmem>>, vector<1x8x1xf32>
      %74 = vector.shape_cast %73 : vector<1x8x1xf32> to vector<8x1xf32>
      %75 = arith.mulf %69, %74 : vector<8x1xf32>
      %cst_58 = arith.constant dense<0.000000e+00> : vector<8xf32>
      %76 = vector.multi_reduction <add>, %72, %cst_58 [1] : vector<8x8xf32> to vector<8xf32>
      %77 = vector.shape_cast %76 : vector<8xf32> to vector<8x1xf32>
      %78 = arith.addf %75, %77 : vector<8x1xf32>
      %c1_59 = arith.constant 1 : index
      %c0_60 = arith.constant 0 : index
      %c0_61 = arith.constant 0 : index
      %79 = vector.load %arg9[%c1_59, %c0_60, %c0_61] : memref<4x8x1xf32, #tpu.memory_space<vmem>>, vector<1x8x1xf32>
      %80 = vector.shape_cast %79 : vector<1x8x1xf32> to vector<8x1xf32>
      %81 = vector.shape_cast %78 : vector<8x1xf32> to vector<1x8x1xf32>
      tpu.vector_store %arg9[%c1_59, %c0_60, %c0_61], %81 {strides = array<i32>} : memref<4x8x1xf32, #tpu.memory_space<vmem>>, vector<1x8x1xf32>,
      %c1_62 = arith.constant 1 : index
      %c0_63 = arith.constant 0 : index
      %c0_64 = arith.constant 0 : index
      %82 = vector.load %arg10[%c1_62, %c0_63, %c0_64] : memref<4x8x8xf32, #tpu.memory_space<vmem>>, vector<1x8x8xf32>
      %83 = vector.shape_cast %82 : vector<1x8x8xf32> to vector<8x8xf32>
      %84 = vector.broadcast %69 : vector<8x1xf32> to vector<8x8xf32>
      %85 = arith.mulf %84, %83 : vector<8x8xf32>
      %86 = arith.truncf %72 : vector<8x8xf32> to vector<8x8xbf16>
      %c0_65 = arith.constant 0 : index
      %c0_66 = arith.constant 0 : index
      %c0_67 = arith.constant 0 : index
      %c1_68 = arith.constant 1 : index
      %c0_69 = arith.constant 0 : index
      %87 = vector.load %arg6[%c0_65, %c0_66, %c0_67, %c1_68, %c0_69] : memref<1x8x1x4x8xbf16, #tpu.memory_space<vmem>>, vector<1x8x1x1x8xbf16>
      %88 = vector.shape_cast %87 : vector<1x8x1x1x8xbf16> to vector<8x8xbf16>
      %cst_70 = arith.constant dense<0.000000e+00> : vector<8x8xf32>
      %89 = tpu.matmul %86, %88, %cst_70 {dimension_numbers = #tpu.dot_dimension_numbers<[1], [0], [0], [1], [0, 0, 1, 1], [], []>} : vector<8x8xbf16>, vector<8x8xbf16>, vector<8x8xf32> -> vector<8x8xf32>
      %90 = arith.addf %85, %89 : vector<8x8xf32>
      %c1_71 = arith.constant 1 : index
      %c0_72 = arith.constant 0 : index
      %c0_73 = arith.constant 0 : index
      %91 = vector.load %arg10[%c1_71, %c0_72, %c0_73] : memref<4x8x8xf32, #tpu.memory_space<vmem>>, vector<1x8x8xf32>
      %92 = vector.shape_cast %91 : vector<1x8x8xf32> to vector<8x8xf32>
      %93 = vector.shape_cast %90 : vector<8x8xf32> to vector<1x8x8xf32>
      tpu.vector_store %arg10[%c1_71, %c0_72, %c0_73], %93 {strides = array<i32>} : memref<4x8x8xf32, #tpu.memory_space<vmem>>, vector<1x8x8xf32>,
      %c1_74 = arith.constant 1 : index
      %c0_75 = arith.constant 0 : index
      %c0_76 = arith.constant 0 : index
      %94 = vector.load %arg8[%c1_74, %c0_75, %c0_76] : memref<4x8x1xf32, #tpu.memory_space<vmem>>, vector<1x8x1xf32>
      %95 = vector.shape_cast %94 : vector<1x8x1xf32> to vector<8x1xf32>
      %96 = vector.shape_cast %67 : vector<8x1xf32> to vector<1x8x1xf32>
      tpu.vector_store %arg8[%c1_74, %c0_75, %c0_76], %96 {strides = array<i32>} : memref<4x8x1xf32, #tpu.memory_space<vmem>>, vector<1x8x1xf32>,
      %c0_77 = arith.constant 0 : index
      %c0_78 = arith.constant 0 : index
      %c0_79 = arith.constant 0 : index
      %c2 = arith.constant 2 : index
      %c0_80 = arith.constant 0 : index
      %97 = vector.load %arg4[%c0_77, %c0_78, %c0_79, %c2, %c0_80] : memref<1x8x1x4x8xbf16, #tpu.memory_space<vmem>>, vector<1x8x1x1x8xbf16>
      %98 = vector.shape_cast %97 : vector<1x8x1x1x8xbf16> to vector<8x8xbf16>
      %c0_81 = arith.constant 0 : index
      %c0_82 = arith.constant 0 : index
      %c0_83 = arith.constant 0 : index
      %c2_84 = arith.constant 2 : index
      %c0_85 = arith.constant 0 : index
      %99 = vector.load %arg5[%c0_81, %c0_82, %c0_83, %c2_84, %c0_85] : memref<1x8x1x4x8xbf16, #tpu.memory_space<vmem>>, vector<1x8x1x1x8xbf16>
      %100 = vector.shape_cast %99 : vector<1x8x1x1x8xbf16> to vector<8x8xbf16>
      %cst_86 = arith.constant dense<0.000000e+00> : vector<8x8xf32>
      %101 = tpu.matmul %98, %100, %cst_86 {dimension_numbers = #tpu.dot_dimension_numbers<[1], [1], [0], [0], [0, 0, 1, 0], [], []>} : vector<8x8xbf16>, vector<8x8xbf16>, vector<8x8xf32> -> vector<8x8xf32>
      %c2_87 = arith.constant 2 : index
      %c0_88 = arith.constant 0 : index
      %c0_89 = arith.constant 0 : index
      %102 = vector.load %arg8[%c2_87, %c0_88, %c0_89] : memref<4x8x1xf32, #tpu.memory_space<vmem>>, vector<1x8x1xf32>
      %103 = vector.shape_cast %102 : vector<1x8x1xf32> to vector<8x1xf32>
      %cst_90 = arith.constant dense<0xFF800000> : vector<8xf32>
      %104 = vector.multi_reduction <maximumf>, %101, %cst_90 [1] : vector<8x8xf32> to vector<8xf32>
      %105 = vector.shape_cast %104 : vector<8xf32> to vector<8x1xf32>
      %106 = arith.maximumf %103, %105 : vector<8x1xf32>
      %107 = arith.subf %103, %106 : vector<8x1xf32>
      %108 = math.exp %107 : vector<8x1xf32>
      %109 = vector.broadcast %106 : vector<8x1xf32> to vector<8x8xf32>
      %110 = arith.subf %101, %109 : vector<8x8xf32>
      %111 = math.exp %110 : vector<8x8xf32>
      %c2_91 = arith.constant 2 : index
      %c0_92 = arith.constant 0 : index
      %c0_93 = arith.constant 0 : index
      %112 = vector.load %arg9[%c2_91, %c0_92, %c0_93] : memref<4x8x1xf32, #tpu.memory_space<vmem>>, vector<1x8x1xf32>
      %113 = vector.shape_cast %112 : vector<1x8x1xf32> to vector<8x1xf32>
      %114 = arith.mulf %108, %113 : vector<8x1xf32>
      %cst_94 = arith.constant dense<0.000000e+00> : vector<8xf32>
      %115 = vector.multi_reduction <add>, %111, %cst_94 [1] : vector<8x8xf32> to vector<8xf32>
      %116 = vector.shape_cast %115 : vector<8xf32> to vector<8x1xf32>
      %117 = arith.addf %114, %116 : vector<8x1xf32>
      %c2_95 = arith.constant 2 : index
      %c0_96 = arith.constant 0 : index
      %c0_97 = arith.constant 0 : index
      %118 = vector.load %arg9[%c2_95, %c0_96, %c0_97] : memref<4x8x1xf32, #tpu.memory_space<vmem>>, vector<1x8x1xf32>
      %119 = vector.shape_cast %118 : vector<1x8x1xf32> to vector<8x1xf32>
      %120 = vector.shape_cast %117 : vector<8x1xf32> to vector<1x8x1xf32>
      tpu.vector_store %arg9[%c2_95, %c0_96, %c0_97], %120 {strides = array<i32>} : memref<4x8x1xf32, #tpu.memory_space<vmem>>, vector<1x8x1xf32>,
      %c2_98 = arith.constant 2 : index
      %c0_99 = arith.constant 0 : index
      %c0_100 = arith.constant 0 : index
      %121 = vector.load %arg10[%c2_98, %c0_99, %c0_100] : memref<4x8x8xf32, #tpu.memory_space<vmem>>, vector<1x8x8xf32>
      %122 = vector.shape_cast %121 : vector<1x8x8xf32> to vector<8x8xf32>
      %123 = vector.broadcast %108 : vector<8x1xf32> to vector<8x8xf32>
      %124 = arith.mulf %123, %122 : vector<8x8xf32>
      %125 = arith.truncf %111 : vector<8x8xf32> to vector<8x8xbf16>
      %c0_101 = arith.constant 0 : index
      %c0_102 = arith.constant 0 : index
      %c0_103 = arith.constant 0 : index
      %c2_104 = arith.constant 2 : index
      %c0_105 = arith.constant 0 : index
      %126 = vector.load %arg6[%c0_101, %c0_102, %c0_103, %c2_104, %c0_105] : memref<1x8x1x4x8xbf16, #tpu.memory_space<vmem>>, vector<1x8x1x1x8xbf16>
      %127 = vector.shape_cast %126 : vector<1x8x1x1x8xbf16> to vector<8x8xbf16>
      %cst_106 = arith.constant dense<0.000000e+00> : vector<8x8xf32>
      %128 = tpu.matmul %125, %127, %cst_106 {dimension_numbers = #tpu.dot_dimension_numbers<[1], [0], [0], [1], [0, 0, 1, 1], [], []>} : vector<8x8xbf16>, vector<8x8xbf16>, vector<8x8xf32> -> vector<8x8xf32>
      %129 = arith.addf %124, %128 : vector<8x8xf32>
      %c2_107 = arith.constant 2 : index
      %c0_108 = arith.constant 0 : index
      %c0_109 = arith.constant 0 : index
      %130 = vector.load %arg10[%c2_107, %c0_108, %c0_109] : memref<4x8x8xf32, #tpu.memory_space<vmem>>, vector<1x8x8xf32>
      %131 = vector.shape_cast %130 : vector<1x8x8xf32> to vector<8x8xf32>
      %132 = vector.shape_cast %129 : vector<8x8xf32> to vector<1x8x8xf32>
      tpu.vector_store %arg10[%c2_107, %c0_108, %c0_109], %132 {strides = array<i32>} : memref<4x8x8xf32, #tpu.memory_space<vmem>>, vector<1x8x8xf32>,
      %c2_110 = arith.constant 2 : index
      %c0_111 = arith.constant 0 : index
      %c0_112 = arith.constant 0 : index
      %133 = vector.load %arg8[%c2_110, %c0_111, %c0_112] : memref<4x8x1xf32, #tpu.memory_space<vmem>>, vector<1x8x1xf32>
      %134 = vector.shape_cast %133 : vector<1x8x1xf32> to vector<8x1xf32>
      %135 = vector.shape_cast %106 : vector<8x1xf32> to vector<1x8x1xf32>
      tpu.vector_store %arg8[%c2_110, %c0_111, %c0_112], %135 {strides = array<i32>} : memref<4x8x1xf32, #tpu.memory_space<vmem>>, vector<1x8x1xf32>,
      %c0_113 = arith.constant 0 : index
      %c0_114 = arith.constant 0 : index
      %c0_115 = arith.constant 0 : index
      %c3 = arith.constant 3 : index
      %c0_116 = arith.constant 0 : index
      %136 = vector.load %arg4[%c0_113, %c0_114, %c0_115, %c3, %c0_116] : memref<1x8x1x4x8xbf16, #tpu.memory_space<vmem>>, vector<1x8x1x1x8xbf16>
      %137 = vector.shape_cast %136 : vector<1x8x1x1x8xbf16> to vector<8x8xbf16>
      %c0_117 = arith.constant 0 : index
      %c0_118 = arith.constant 0 : index
      %c0_119 = arith.constant 0 : index
      %c3_120 = arith.constant 3 : index
      %c0_121 = arith.constant 0 : index
      %138 = vector.load %arg5[%c0_117, %c0_118, %c0_119, %c3_120, %c0_121] : memref<1x8x1x4x8xbf16, #tpu.memory_space<vmem>>, vector<1x8x1x1x8xbf16>
      %139 = vector.shape_cast %138 : vector<1x8x1x1x8xbf16> to vector<8x8xbf16>
      %cst_122 = arith.constant dense<0.000000e+00> : vector<8x8xf32>
      %140 = tpu.matmul %137, %139, %cst_122 {dimension_numbers = #tpu.dot_dimension_numbers<[1], [1], [0], [0], [0, 0, 1, 0], [], []>} : vector<8x8xbf16>, vector<8x8xbf16>, vector<8x8xf32> -> vector<8x8xf32>
      %c3_123 = arith.constant 3 : index
      %c0_124 = arith.constant 0 : index
      %c0_125 = arith.constant 0 : index
      %141 = vector.load %arg8[%c3_123, %c0_124, %c0_125] : memref<4x8x1xf32, #tpu.memory_space<vmem>>, vector<1x8x1xf32>
      %142 = vector.shape_cast %141 : vector<1x8x1xf32> to vector<8x1xf32>
      %cst_126 = arith.constant dense<0xFF800000> : vector<8xf32>
      %143 = vector.multi_reduction <maximumf>, %140, %cst_126 [1] : vector<8x8xf32> to vector<8xf32>
      %144 = vector.shape_cast %143 : vector<8xf32> to vector<8x1xf32>
      %145 = arith.maximumf %142, %144 : vector<8x1xf32>
      %146 = arith.subf %142, %145 : vector<8x1xf32>
      %147 = math.exp %146 : vector<8x1xf32>
      %148 = vector.broadcast %145 : vector<8x1xf32> to vector<8x8xf32>
      %149 = arith.subf %140, %148 : vector<8x8xf32>
      %150 = math.exp %149 : vector<8x8xf32>
      %c3_127 = arith.constant 3 : index
      %c0_128 = arith.constant 0 : index
      %c0_129 = arith.constant 0 : index
      %151 = vector.load %arg9[%c3_127, %c0_128, %c0_129] : memref<4x8x1xf32, #tpu.memory_space<vmem>>, vector<1x8x1xf32>
      %152 = vector.shape_cast %151 : vector<1x8x1xf32> to vector<8x1xf32>
      %153 = arith.mulf %147, %152 : vector<8x1xf32>
      %cst_130 = arith.constant dense<0.000000e+00> : vector<8xf32>
      %154 = vector.multi_reduction <add>, %150, %cst_130 [1] : vector<8x8xf32> to vector<8xf32>
      %155 = vector.shape_cast %154 : vector<8xf32> to vector<8x1xf32>
      %156 = arith.addf %153, %155 : vector<8x1xf32>
      %c3_131 = arith.constant 3 : index
      %c0_132 = arith.constant 0 : index
      %c0_133 = arith.constant 0 : index
      %157 = vector.load %arg9[%c3_131, %c0_132, %c0_133] : memref<4x8x1xf32, #tpu.memory_space<vmem>>, vector<1x8x1xf32>
      %158 = vector.shape_cast %157 : vector<1x8x1xf32> to vector<8x1xf32>
      %159 = vector.shape_cast %156 : vector<8x1xf32> to vector<1x8x1xf32>
      tpu.vector_store %arg9[%c3_131, %c0_132, %c0_133], %159 {strides = array<i32>} : memref<4x8x1xf32, #tpu.memory_space<vmem>>, vector<1x8x1xf32>,
      %c3_134 = arith.constant 3 : index
      %c0_135 = arith.constant 0 : index
      %c0_136 = arith.constant 0 : index
      %160 = vector.load %arg10[%c3_134, %c0_135, %c0_136] : memref<4x8x8xf32, #tpu.memory_space<vmem>>, vector<1x8x8xf32>
      %161 = vector.shape_cast %160 : vector<1x8x8xf32> to vector<8x8xf32>
      %162 = vector.broadcast %147 : vector<8x1xf32> to vector<8x8xf32>
      %163 = arith.mulf %162, %161 : vector<8x8xf32>
      %164 = arith.truncf %150 : vector<8x8xf32> to vector<8x8xbf16>
      %c0_137 = arith.constant 0 : index
      %c0_138 = arith.constant 0 : index
      %c0_139 = arith.constant 0 : index
      %c3_140 = arith.constant 3 : index
      %c0_141 = arith.constant 0 : index
      %165 = vector.load %arg6[%c0_137, %c0_138, %c0_139, %c3_140, %c0_141] : memref<1x8x1x4x8xbf16, #tpu.memory_space<vmem>>, vector<1x8x1x1x8xbf16>
      %166 = vector.shape_cast %165 : vector<1x8x1x1x8xbf16> to vector<8x8xbf16>
      %cst_142 = arith.constant dense<0.000000e+00> : vector<8x8xf32>
      %167 = tpu.matmul %164, %166, %cst_142 {dimension_numbers = #tpu.dot_dimension_numbers<[1], [0], [0], [1], [0, 0, 1, 1], [], []>} : vector<8x8xbf16>, vector<8x8xbf16>, vector<8x8xf32> -> vector<8x8xf32>
      %168 = arith.addf %163, %167 : vector<8x8xf32>
      %c3_143 = arith.constant 3 : index
      %c0_144 = arith.constant 0 : index
      %c0_145 = arith.constant 0 : index
      %169 = vector.load %arg10[%c3_143, %c0_144, %c0_145] : memref<4x8x8xf32, #tpu.memory_space<vmem>>, vector<1x8x8xf32>
      %170 = vector.shape_cast %169 : vector<1x8x8xf32> to vector<8x8xf32>
      %171 = vector.shape_cast %168 : vector<8x8xf32> to vector<1x8x8xf32>
      tpu.vector_store %arg10[%c3_143, %c0_144, %c0_145], %171 {strides = array<i32>} : memref<4x8x8xf32, #tpu.memory_space<vmem>>, vector<1x8x8xf32>,
      %c3_146 = arith.constant 3 : index
      %c0_147 = arith.constant 0 : index
      %c0_148 = arith.constant 0 : index
      %172 = vector.load %arg8[%c3_146, %c0_147, %c0_148] : memref<4x8x1xf32, #tpu.memory_space<vmem>>, vector<1x8x1xf32>
      %173 = vector.shape_cast %172 : vector<1x8x1xf32> to vector<8x1xf32>
      %174 = vector.shape_cast %145 : vector<8x1xf32> to vector<1x8x1xf32>
      tpu.vector_store %arg8[%c3_146, %c0_147, %c0_148], %174 {strides = array<i32>} : memref<4x8x1xf32, #tpu.memory_space<vmem>>, vector<1x8x1xf32>,
    } else {
    }
    %true = arith.constant true
    %12 = arith.xori %8, %true : i1
    %13 = arith.andi %6, %12 : i1
    %14 = arith.extui %13 : i1 to i32
    %c0_i32_3 = arith.constant 0 : i32
    %15 = arith.cmpi ne, %14, %c0_i32_3 : i32
    scf.if %15 {
      %19 = tpu.iota {dimensions = array<i32: 1>} : vector<1x8xi32>
      %20 = vector.broadcast %2 : i32 to vector<1x8xi32>
      %21 = arith.addi %20, %19 : vector<1x8xi32>
      %22 = vector.broadcast %1 : i32 to vector<1x8xi32>
      %23 = arith.cmpi sge, %21, %22 : vector<1x8xi32>
      %c0 = arith.constant 0 : index
      %c0_6 = arith.constant 0 : index
      %c0_7 = arith.constant 0 : index
      %c0_8 = arith.constant 0 : index
      %c0_9 = arith.constant 0 : index
      %24 = vector.load %arg4[%c0, %c0_6, %c0_7, %c0_8, %c0_9] : memref<1x8x1x4x8xbf16, #tpu.memory_space<vmem>>, vector<1x8x1x1x8xbf16>
      %25 = vector.shape_cast %24 : vector<1x8x1x1x8xbf16> to vector<8x8xbf16>
      %c0_10 = arith.constant 0 : index
      %c0_11 = arith.constant 0 : index
      %c0_12 = arith.constant 0 : index
      %c0_13 = arith.constant 0 : index
      %c0_14 = arith.constant 0 : index
      %26 = vector.load %arg5[%c0_10, %c0_11, %c0_12, %c0_13, %c0_14] : memref<1x8x1x4x8xbf16, #tpu.memory_space<vmem>>, vector<1x8x1x1x8xbf16>
      %27 = vector.shape_cast %26 : vector<1x8x1x1x8xbf16> to vector<8x8xbf16>
      %cst = arith.constant dense<0.000000e+00> : vector<8x8xf32>
      %28 = tpu.matmul %25, %27, %cst {dimension_numbers = #tpu.dot_dimension_numbers<[1], [1], [0], [0], [0, 0, 1, 0], [], []>} : vector<8x8xbf16>, vector<8x8xbf16>, vector<8x8xf32> -> vector<8x8xf32>
      %cst_15 = arith.constant -1.000000e+30 : f32
      %29 = vector.shape_cast %23 : vector<1x8xi1> to vector<1x8xi1>
      %30 = vector.broadcast %29 : vector<1x8xi1> to vector<8x8xi1>
      %31 = vector.broadcast %cst_15 : f32 to vector<8x8xf32>
      %32 = arith.select %30, %31, %28 : vector<8x8xi1>, vector<8x8xf32>
      %c0_16 = arith.constant 0 : index
      %c0_17 = arith.constant 0 : index
      %c0_18 = arith.constant 0 : index
      %33 = vector.load %arg8[%c0_16, %c0_17, %c0_18] : memref<4x8x1xf32, #tpu.memory_space<vmem>>, vector<1x8x1xf32>
      %34 = vector.shape_cast %33 : vector<1x8x1xf32> to vector<8x1xf32>
      %cst_19 = arith.constant dense<0xFF800000> : vector<8xf32>
      %35 = vector.multi_reduction <maximumf>, %32, %cst_19 [1] : vector<8x8xf32> to vector<8xf32>
      %36 = vector.shape_cast %35 : vector<8xf32> to vector<8x1xf32>
      %37 = arith.maximumf %34, %36 : vector<8x1xf32>
      %38 = arith.subf %34, %37 : vector<8x1xf32>
      %39 = math.exp %38 : vector<8x1xf32>
      %40 = vector.broadcast %37 : vector<8x1xf32> to vector<8x8xf32>
      %41 = arith.subf %32, %40 : vector<8x8xf32>
      %42 = math.exp %41 : vector<8x8xf32>
      %c0_20 = arith.constant 0 : index
      %c0_21 = arith.constant 0 : index
      %c0_22 = arith.constant 0 : index
      %43 = vector.load %arg9[%c0_20, %c0_21, %c0_22] : memref<4x8x1xf32, #tpu.memory_space<vmem>>, vector<1x8x1xf32>
      %44 = vector.shape_cast %43 : vector<1x8x1xf32> to vector<8x1xf32>
      %45 = arith.mulf %39, %44 : vector<8x1xf32>
      %cst_23 = arith.constant dense<0.000000e+00> : vector<8xf32>
      %46 = vector.multi_reduction <add>, %42, %cst_23 [1] : vector<8x8xf32> to vector<8xf32>
      %47 = vector.shape_cast %46 : vector<8xf32> to vector<8x1xf32>
      %48 = arith.addf %45, %47 : vector<8x1xf32>
      %c0_24 = arith.constant 0 : index
      %c0_25 = arith.constant 0 : index
      %c0_26 = arith.constant 0 : index
      %49 = vector.load %arg9[%c0_24, %c0_25, %c0_26] : memref<4x8x1xf32, #tpu.memory_space<vmem>>, vector<1x8x1xf32>
      %50 = vector.shape_cast %49 : vector<1x8x1xf32> to vector<8x1xf32>
      %51 = vector.shape_cast %48 : vector<8x1xf32> to vector<1x8x1xf32>
      tpu.vector_store %arg9[%c0_24, %c0_25, %c0_26], %51 {strides = array<i32>} : memref<4x8x1xf32, #tpu.memory_space<vmem>>, vector<1x8x1xf32>,
      %c0_27 = arith.constant 0 : index
      %c0_28 = arith.constant 0 : index
      %c0_29 = arith.constant 0 : index
      %52 = vector.load %arg10[%c0_27, %c0_28, %c0_29] : memref<4x8x8xf32, #tpu.memory_space<vmem>>, vector<1x8x8xf32>
      %53 = vector.shape_cast %52 : vector<1x8x8xf32> to vector<8x8xf32>
      %54 = vector.broadcast %39 : vector<8x1xf32> to vector<8x8xf32>
      %55 = arith.mulf %54, %53 : vector<8x8xf32>
      %56 = arith.truncf %42 : vector<8x8xf32> to vector<8x8xbf16>
      %c0_30 = arith.constant 0 : index
      %c0_31 = arith.constant 0 : index
      %c0_32 = arith.constant 0 : index
      %c0_33 = arith.constant 0 : index
      %c0_34 = arith.constant 0 : index
      %57 = vector.load %arg6[%c0_30, %c0_31, %c0_32, %c0_33, %c0_34] : memref<1x8x1x4x8xbf16, #tpu.memory_space<vmem>>, vector<1x8x1x1x8xbf16>
      %58 = vector.shape_cast %57 : vector<1x8x1x1x8xbf16> to vector<8x8xbf16>
      %cst_35 = arith.constant dense<0.000000e+00> : vector<8x8xf32>
      %59 = tpu.matmul %56, %58, %cst_35 {dimension_numbers = #tpu.dot_dimension_numbers<[1], [0], [0], [1], [0, 0, 1, 1], [], []>} : vector<8x8xbf16>, vector<8x8xbf16>, vector<8x8xf32> -> vector<8x8xf32>
      %60 = arith.addf %55, %59 : vector<8x8xf32>
      %c0_36 = arith.constant 0 : index
      %c0_37 = arith.constant 0 : index
      %c0_38 = arith.constant 0 : index
      %61 = vector.load %arg10[%c0_36, %c0_37, %c0_38] : memref<4x8x8xf32, #tpu.memory_space<vmem>>, vector<1x8x8xf32>
      %62 = vector.shape_cast %61 : vector<1x8x8xf32> to vector<8x8xf32>
      %63 = vector.shape_cast %60 : vector<8x8xf32> to vector<1x8x8xf32>
      tpu.vector_store %arg10[%c0_36, %c0_37, %c0_38], %63 {strides = array<i32>} : memref<4x8x8xf32, #tpu.memory_space<vmem>>, vector<1x8x8xf32>,
      %c0_39 = arith.constant 0 : index
      %c0_40 = arith.constant 0 : index
      %c0_41 = arith.constant 0 : index
      %64 = vector.load %arg8[%c0_39, %c0_40, %c0_41] : memref<4x8x1xf32, #tpu.memory_space<vmem>>, vector<1x8x1xf32>
      %65 = vector.shape_cast %64 : vector<1x8x1xf32> to vector<8x1xf32>
      %66 = vector.shape_cast %37 : vector<8x1xf32> to vector<1x8x1xf32>
      tpu.vector_store %arg8[%c0_39, %c0_40, %c0_41], %66 {strides = array<i32>} : memref<4x8x1xf32, #tpu.memory_space<vmem>>, vector<1x8x1xf32>,
      %c0_42 = arith.constant 0 : index
      %c0_43 = arith.constant 0 : index
      %c0_44 = arith.constant 0 : index
      %c1 = arith.constant 1 : index
      %c0_45 = arith.constant 0 : index
      %67 = vector.load %arg4[%c0_42, %c0_43, %c0_44, %c1, %c0_45] : memref<1x8x1x4x8xbf16, #tpu.memory_space<vmem>>, vector<1x8x1x1x8xbf16>
      %68 = vector.shape_cast %67 : vector<1x8x1x1x8xbf16> to vector<8x8xbf16>
      %c0_46 = arith.constant 0 : index
      %c0_47 = arith.constant 0 : index
      %c0_48 = arith.constant 0 : index
      %c1_49 = arith.constant 1 : index
      %c0_50 = arith.constant 0 : index
      %69 = vector.load %arg5[%c0_46, %c0_47, %c0_48, %c1_49, %c0_50] : memref<1x8x1x4x8xbf16, #tpu.memory_space<vmem>>, vector<1x8x1x1x8xbf16>
      %70 = vector.shape_cast %69 : vector<1x8x1x1x8xbf16> to vector<8x8xbf16>
      %cst_51 = arith.constant dense<0.000000e+00> : vector<8x8xf32>
      %71 = tpu.matmul %68, %70, %cst_51 {dimension_numbers = #tpu.dot_dimension_numbers<[1], [1], [0], [0], [0, 0, 1, 0], [], []>} : vector<8x8xbf16>, vector<8x8xbf16>, vector<8x8xf32> -> vector<8x8xf32>
      %cst_52 = arith.constant -1.000000e+30 : f32
      %72 = vector.shape_cast %23 : vector<1x8xi1> to vector<1x8xi1>
      %73 = vector.broadcast %72 : vector<1x8xi1> to vector<8x8xi1>
      %74 = vector.broadcast %cst_52 : f32 to vector<8x8xf32>
      %75 = arith.select %73, %74, %71 : vector<8x8xi1>, vector<8x8xf32>
      %c1_53 = arith.constant 1 : index
      %c0_54 = arith.constant 0 : index
      %c0_55 = arith.constant 0 : index
      %76 = vector.load %arg8[%c1_53, %c0_54, %c0_55] : memref<4x8x1xf32, #tpu.memory_space<vmem>>, vector<1x8x1xf32>
      %77 = vector.shape_cast %76 : vector<1x8x1xf32> to vector<8x1xf32>
      %cst_56 = arith.constant dense<0xFF800000> : vector<8xf32>
      %78 = vector.multi_reduction <maximumf>, %75, %cst_56 [1] : vector<8x8xf32> to vector<8xf32>
      %79 = vector.shape_cast %78 : vector<8xf32> to vector<8x1xf32>
      %80 = arith.maximumf %77, %79 : vector<8x1xf32>
      %81 = arith.subf %77, %80 : vector<8x1xf32>
      %82 = math.exp %81 : vector<8x1xf32>
      %83 = vector.broadcast %80 : vector<8x1xf32> to vector<8x8xf32>
      %84 = arith.subf %75, %83 : vector<8x8xf32>
      %85 = math.exp %84 : vector<8x8xf32>
      %c1_57 = arith.constant 1 : index
      %c0_58 = arith.constant 0 : index
      %c0_59 = arith.constant 0 : index
      %86 = vector.load %arg9[%c1_57, %c0_58, %c0_59] : memref<4x8x1xf32, #tpu.memory_space<vmem>>, vector<1x8x1xf32>
      %87 = vector.shape_cast %86 : vector<1x8x1xf32> to vector<8x1xf32>
      %88 = arith.mulf %82, %87 : vector<8x1xf32>
      %cst_60 = arith.constant dense<0.000000e+00> : vector<8xf32>
      %89 = vector.multi_reduction <add>, %85, %cst_60 [1] : vector<8x8xf32> to vector<8xf32>
      %90 = vector.shape_cast %89 : vector<8xf32> to vector<8x1xf32>
      %91 = arith.addf %88, %90 : vector<8x1xf32>
      %c1_61 = arith.constant 1 : index
      %c0_62 = arith.constant 0 : index
      %c0_63 = arith.constant 0 : index
      %92 = vector.load %arg9[%c1_61, %c0_62, %c0_63] : memref<4x8x1xf32, #tpu.memory_space<vmem>>, vector<1x8x1xf32>
      %93 = vector.shape_cast %92 : vector<1x8x1xf32> to vector<8x1xf32>
      %94 = vector.shape_cast %91 : vector<8x1xf32> to vector<1x8x1xf32>
      tpu.vector_store %arg9[%c1_61, %c0_62, %c0_63], %94 {strides = array<i32>} : memref<4x8x1xf32, #tpu.memory_space<vmem>>, vector<1x8x1xf32>,
      %c1_64 = arith.constant 1 : index
      %c0_65 = arith.constant 0 : index
      %c0_66 = arith.constant 0 : index
      %95 = vector.load %arg10[%c1_64, %c0_65, %c0_66] : memref<4x8x8xf32, #tpu.memory_space<vmem>>, vector<1x8x8xf32>
      %96 = vector.shape_cast %95 : vector<1x8x8xf32> to vector<8x8xf32>
      %97 = vector.broadcast %82 : vector<8x1xf32> to vector<8x8xf32>
      %98 = arith.mulf %97, %96 : vector<8x8xf32>
      %99 = arith.truncf %85 : vector<8x8xf32> to vector<8x8xbf16>
      %c0_67 = arith.constant 0 : index
      %c0_68 = arith.constant 0 : index
      %c0_69 = arith.constant 0 : index
      %c1_70 = arith.constant 1 : index
      %c0_71 = arith.constant 0 : index
      %100 = vector.load %arg6[%c0_67, %c0_68, %c0_69, %c1_70, %c0_71] : memref<1x8x1x4x8xbf16, #tpu.memory_space<vmem>>, vector<1x8x1x1x8xbf16>
      %101 = vector.shape_cast %100 : vector<1x8x1x1x8xbf16> to vector<8x8xbf16>
      %cst_72 = arith.constant dense<0.000000e+00> : vector<8x8xf32>
      %102 = tpu.matmul %99, %101, %cst_72 {dimension_numbers = #tpu.dot_dimension_numbers<[1], [0], [0], [1], [0, 0, 1, 1], [], []>} : vector<8x8xbf16>, vector<8x8xbf16>, vector<8x8xf32> -> vector<8x8xf32>
      %103 = arith.addf %98, %102 : vector<8x8xf32>
      %c1_73 = arith.constant 1 : index
      %c0_74 = arith.constant 0 : index
      %c0_75 = arith.constant 0 : index
      %104 = vector.load %arg10[%c1_73, %c0_74, %c0_75] : memref<4x8x8xf32, #tpu.memory_space<vmem>>, vector<1x8x8xf32>
      %105 = vector.shape_cast %104 : vector<1x8x8xf32> to vector<8x8xf32>
      %106 = vector.shape_cast %103 : vector<8x8xf32> to vector<1x8x8xf32>
      tpu.vector_store %arg10[%c1_73, %c0_74, %c0_75], %106 {strides = array<i32>} : memref<4x8x8xf32, #tpu.memory_space<vmem>>, vector<1x8x8xf32>,
      %c1_76 = arith.constant 1 : index
      %c0_77 = arith.constant 0 : index
      %c0_78 = arith.constant 0 : index
      %107 = vector.load %arg8[%c1_76, %c0_77, %c0_78] : memref<4x8x1xf32, #tpu.memory_space<vmem>>, vector<1x8x1xf32>
      %108 = vector.shape_cast %107 : vector<1x8x1xf32> to vector<8x1xf32>
      %109 = vector.shape_cast %80 : vector<8x1xf32> to vector<1x8x1xf32>
      tpu.vector_store %arg8[%c1_76, %c0_77, %c0_78], %109 {strides = array<i32>} : memref<4x8x1xf32, #tpu.memory_space<vmem>>, vector<1x8x1xf32>,
      %c0_79 = arith.constant 0 : index
      %c0_80 = arith.constant 0 : index
      %c0_81 = arith.constant 0 : index
      %c2 = arith.constant 2 : index
      %c0_82 = arith.constant 0 : index
      %110 = vector.load %arg4[%c0_79, %c0_80, %c0_81, %c2, %c0_82] : memref<1x8x1x4x8xbf16, #tpu.memory_space<vmem>>, vector<1x8x1x1x8xbf16>
      %111 = vector.shape_cast %110 : vector<1x8x1x1x8xbf16> to vector<8x8xbf16>
      %c0_83 = arith.constant 0 : index
      %c0_84 = arith.constant 0 : index
      %c0_85 = arith.constant 0 : index
      %c2_86 = arith.constant 2 : index
      %c0_87 = arith.constant 0 : index
      %112 = vector.load %arg5[%c0_83, %c0_84, %c0_85, %c2_86, %c0_87] : memref<1x8x1x4x8xbf16, #tpu.memory_space<vmem>>, vector<1x8x1x1x8xbf16>
      %113 = vector.shape_cast %112 : vector<1x8x1x1x8xbf16> to vector<8x8xbf16>
      %cst_88 = arith.constant dense<0.000000e+00> : vector<8x8xf32>
      %114 = tpu.matmul %111, %113, %cst_88 {dimension_numbers = #tpu.dot_dimension_numbers<[1], [1], [0], [0], [0, 0, 1, 0], [], []>} : vector<8x8xbf16>, vector<8x8xbf16>, vector<8x8xf32> -> vector<8x8xf32>
      %cst_89 = arith.constant -1.000000e+30 : f32
      %115 = vector.shape_cast %23 : vector<1x8xi1> to vector<1x8xi1>
      %116 = vector.broadcast %115 : vector<1x8xi1> to vector<8x8xi1>
      %117 = vector.broadcast %cst_89 : f32 to vector<8x8xf32>
      %118 = arith.select %116, %117, %114 : vector<8x8xi1>, vector<8x8xf32>
      %c2_90 = arith.constant 2 : index
      %c0_91 = arith.constant 0 : index
      %c0_92 = arith.constant 0 : index
      %119 = vector.load %arg8[%c2_90, %c0_91, %c0_92] : memref<4x8x1xf32, #tpu.memory_space<vmem>>, vector<1x8x1xf32>
      %120 = vector.shape_cast %119 : vector<1x8x1xf32> to vector<8x1xf32>
      %cst_93 = arith.constant dense<0xFF800000> : vector<8xf32>
      %121 = vector.multi_reduction <maximumf>, %118, %cst_93 [1] : vector<8x8xf32> to vector<8xf32>
      %122 = vector.shape_cast %121 : vector<8xf32> to vector<8x1xf32>
      %123 = arith.maximumf %120, %122 : vector<8x1xf32>
      %124 = arith.subf %120, %123 : vector<8x1xf32>
      %125 = math.exp %124 : vector<8x1xf32>
      %126 = vector.broadcast %123 : vector<8x1xf32> to vector<8x8xf32>
      %127 = arith.subf %118, %126 : vector<8x8xf32>
      %128 = math.exp %127 : vector<8x8xf32>
      %c2_94 = arith.constant 2 : index
      %c0_95 = arith.constant 0 : index
      %c0_96 = arith.constant 0 : index
      %129 = vector.load %arg9[%c2_94, %c0_95, %c0_96] : memref<4x8x1xf32, #tpu.memory_space<vmem>>, vector<1x8x1xf32>
      %130 = vector.shape_cast %129 : vector<1x8x1xf32> to vector<8x1xf32>
      %131 = arith.mulf %125, %130 : vector<8x1xf32>
      %cst_97 = arith.constant dense<0.000000e+00> : vector<8xf32>
      %132 = vector.multi_reduction <add>, %128, %cst_97 [1] : vector<8x8xf32> to vector<8xf32>
      %133 = vector.shape_cast %132 : vector<8xf32> to vector<8x1xf32>
      %134 = arith.addf %131, %133 : vector<8x1xf32>
      %c2_98 = arith.constant 2 : index
      %c0_99 = arith.constant 0 : index
      %c0_100 = arith.constant 0 : index
      %135 = vector.load %arg9[%c2_98, %c0_99, %c0_100] : memref<4x8x1xf32, #tpu.memory_space<vmem>>, vector<1x8x1xf32>
      %136 = vector.shape_cast %135 : vector<1x8x1xf32> to vector<8x1xf32>
      %137 = vector.shape_cast %134 : vector<8x1xf32> to vector<1x8x1xf32>
      tpu.vector_store %arg9[%c2_98, %c0_99, %c0_100], %137 {strides = array<i32>} : memref<4x8x1xf32, #tpu.memory_space<vmem>>, vector<1x8x1xf32>,
      %c2_101 = arith.constant 2 : index
      %c0_102 = arith.constant 0 : index
      %c0_103 = arith.constant 0 : index
      %138 = vector.load %arg10[%c2_101, %c0_102, %c0_103] : memref<4x8x8xf32, #tpu.memory_space<vmem>>, vector<1x8x8xf32>
      %139 = vector.shape_cast %138 : vector<1x8x8xf32> to vector<8x8xf32>
      %140 = vector.broadcast %125 : vector<8x1xf32> to vector<8x8xf32>
      %141 = arith.mulf %140, %139 : vector<8x8xf32>
      %142 = arith.truncf %128 : vector<8x8xf32> to vector<8x8xbf16>
      %c0_104 = arith.constant 0 : index
      %c0_105 = arith.constant 0 : index
      %c0_106 = arith.constant 0 : index
      %c2_107 = arith.constant 2 : index
      %c0_108 = arith.constant 0 : index
      %143 = vector.load %arg6[%c0_104, %c0_105, %c0_106, %c2_107, %c0_108] : memref<1x8x1x4x8xbf16, #tpu.memory_space<vmem>>, vector<1x8x1x1x8xbf16>
      %144 = vector.shape_cast %143 : vector<1x8x1x1x8xbf16> to vector<8x8xbf16>
      %cst_109 = arith.constant dense<0.000000e+00> : vector<8x8xf32>
      %145 = tpu.matmul %142, %144, %cst_109 {dimension_numbers = #tpu.dot_dimension_numbers<[1], [0], [0], [1], [0, 0, 1, 1], [], []>} : vector<8x8xbf16>, vector<8x8xbf16>, vector<8x8xf32> -> vector<8x8xf32>
      %146 = arith.addf %141, %145 : vector<8x8xf32>
      %c2_110 = arith.constant 2 : index
      %c0_111 = arith.constant 0 : index
      %c0_112 = arith.constant 0 : index
      %147 = vector.load %arg10[%c2_110, %c0_111, %c0_112] : memref<4x8x8xf32, #tpu.memory_space<vmem>>, vector<1x8x8xf32>
      %148 = vector.shape_cast %147 : vector<1x8x8xf32> to vector<8x8xf32>
      %149 = vector.shape_cast %146 : vector<8x8xf32> to vector<1x8x8xf32>
      tpu.vector_store %arg10[%c2_110, %c0_111, %c0_112], %149 {strides = array<i32>} : memref<4x8x8xf32, #tpu.memory_space<vmem>>, vector<1x8x8xf32>,
      %c2_113 = arith.constant 2 : index
      %c0_114 = arith.constant 0 : index
      %c0_115 = arith.constant 0 : index
      %150 = vector.load %arg8[%c2_113, %c0_114, %c0_115] : memref<4x8x1xf32, #tpu.memory_space<vmem>>, vector<1x8x1xf32>
      %151 = vector.shape_cast %150 : vector<1x8x1xf32> to vector<8x1xf32>
      %152 = vector.shape_cast %123 : vector<8x1xf32> to vector<1x8x1xf32>
      tpu.vector_store %arg8[%c2_113, %c0_114, %c0_115], %152 {strides = array<i32>} : memref<4x8x1xf32, #tpu.memory_space<vmem>>, vector<1x8x1xf32>,
      %c0_116 = arith.constant 0 : index
      %c0_117 = arith.constant 0 : index
      %c0_118 = arith.constant 0 : index
      %c3 = arith.constant 3 : index
      %c0_119 = arith.constant 0 : index
      %153 = vector.load %arg4[%c0_116, %c0_117, %c0_118, %c3, %c0_119] : memref<1x8x1x4x8xbf16, #tpu.memory_space<vmem>>, vector<1x8x1x1x8xbf16>
      %154 = vector.shape_cast %153 : vector<1x8x1x1x8xbf16> to vector<8x8xbf16>
      %c0_120 = arith.constant 0 : index
      %c0_121 = arith.constant 0 : index
      %c0_122 = arith.constant 0 : index
      %c3_123 = arith.constant 3 : index
      %c0_124 = arith.constant 0 : index
      %155 = vector.load %arg5[%c0_120, %c0_121, %c0_122, %c3_123, %c0_124] : memref<1x8x1x4x8xbf16, #tpu.memory_space<vmem>>, vector<1x8x1x1x8xbf16>
      %156 = vector.shape_cast %155 : vector<1x8x1x1x8xbf16> to vector<8x8xbf16>
      %cst_125 = arith.constant dense<0.000000e+00> : vector<8x8xf32>
      %157 = tpu.matmul %154, %156, %cst_125 {dimension_numbers = #tpu.dot_dimension_numbers<[1], [1], [0], [0], [0, 0, 1, 0], [], []>} : vector<8x8xbf16>, vector<8x8xbf16>, vector<8x8xf32> -> vector<8x8xf32>
      %cst_126 = arith.constant -1.000000e+30 : f32
      %158 = vector.shape_cast %23 : vector<1x8xi1> to vector<1x8xi1>
      %159 = vector.broadcast %158 : vector<1x8xi1> to vector<8x8xi1>
      %160 = vector.broadcast %cst_126 : f32 to vector<8x8xf32>
      %161 = arith.select %159, %160, %157 : vector<8x8xi1>, vector<8x8xf32>
      %c3_127 = arith.constant 3 : index
      %c0_128 = arith.constant 0 : index
      %c0_129 = arith.constant 0 : index
      %162 = vector.load %arg8[%c3_127, %c0_128, %c0_129] : memref<4x8x1xf32, #tpu.memory_space<vmem>>, vector<1x8x1xf32>
      %163 = vector.shape_cast %162 : vector<1x8x1xf32> to vector<8x1xf32>
      %cst_130 = arith.constant dense<0xFF800000> : vector<8xf32>
      %164 = vector.multi_reduction <maximumf>, %161, %cst_130 [1] : vector<8x8xf32> to vector<8xf32>
      %165 = vector.shape_cast %164 : vector<8xf32> to vector<8x1xf32>
      %166 = arith.maximumf %163, %165 : vector<8x1xf32>
      %167 = arith.subf %163, %166 : vector<8x1xf32>
      %168 = math.exp %167 : vector<8x1xf32>
      %169 = vector.broadcast %166 : vector<8x1xf32> to vector<8x8xf32>
      %170 = arith.subf %161, %169 : vector<8x8xf32>
      %171 = math.exp %170 : vector<8x8xf32>
      %c3_131 = arith.constant 3 : index
      %c0_132 = arith.constant 0 : index
      %c0_133 = arith.constant 0 : index
      %172 = vector.load %arg9[%c3_131, %c0_132, %c0_133] : memref<4x8x1xf32, #tpu.memory_space<vmem>>, vector<1x8x1xf32>
      %173 = vector.shape_cast %172 : vector<1x8x1xf32> to vector<8x1xf32>
      %174 = arith.mulf %168, %173 : vector<8x1xf32>
      %cst_134 = arith.constant dense<0.000000e+00> : vector<8xf32>
      %175 = vector.multi_reduction <add>, %171, %cst_134 [1] : vector<8x8xf32> to vector<8xf32>
      %176 = vector.shape_cast %175 : vector<8xf32> to vector<8x1xf32>
      %177 = arith.addf %174, %176 : vector<8x1xf32>
      %c3_135 = arith.constant 3 : index
      %c0_136 = arith.constant 0 : index
      %c0_137 = arith.constant 0 : index
      %178 = vector.load %arg9[%c3_135, %c0_136, %c0_137] : memref<4x8x1xf32, #tpu.memory_space<vmem>>, vector<1x8x1xf32>
      %179 = vector.shape_cast %178 : vector<1x8x1xf32> to vector<8x1xf32>
      %180 = vector.shape_cast %177 : vector<8x1xf32> to vector<1x8x1xf32>
      tpu.vector_store %arg9[%c3_135, %c0_136, %c0_137], %180 {strides = array<i32>} : memref<4x8x1xf32, #tpu.memory_space<vmem>>, vector<1x8x1xf32>,
      %c3_138 = arith.constant 3 : index
      %c0_139 = arith.constant 0 : index
      %c0_140 = arith.constant 0 : index
      %181 = vector.load %arg10[%c3_138, %c0_139, %c0_140] : memref<4x8x8xf32, #tpu.memory_space<vmem>>, vector<1x8x8xf32>
      %182 = vector.shape_cast %181 : vector<1x8x8xf32> to vector<8x8xf32>
      %183 = vector.broadcast %168 : vector<8x1xf32> to vector<8x8xf32>
      %184 = arith.mulf %183, %182 : vector<8x8xf32>
      %185 = arith.truncf %171 : vector<8x8xf32> to vector<8x8xbf16>
      %c0_141 = arith.constant 0 : index
      %c0_142 = arith.constant 0 : index
      %c0_143 = arith.constant 0 : index
      %c3_144 = arith.constant 3 : index
      %c0_145 = arith.constant 0 : index
      %186 = vector.load %arg6[%c0_141, %c0_142, %c0_143, %c3_144, %c0_145] : memref<1x8x1x4x8xbf16, #tpu.memory_space<vmem>>, vector<1x8x1x1x8xbf16>
      %187 = vector.shape_cast %186 : vector<1x8x1x1x8xbf16> to vector<8x8xbf16>
      %cst_146 = arith.constant dense<0.000000e+00> : vector<8x8xf32>
      %188 = tpu.matmul %185, %187, %cst_146 {dimension_numbers = #tpu.dot_dimension_numbers<[1], [0], [0], [1], [0, 0, 1, 1], [], []>} : vector<8x8xbf16>, vector<8x8xbf16>, vector<8x8xf32> -> vector<8x8xf32>
      %189 = arith.addf %184, %188 : vector<8x8xf32>
      %c3_147 = arith.constant 3 : index
      %c0_148 = arith.constant 0 : index
      %c0_149 = arith.constant 0 : index
      %190 = vector.load %arg10[%c3_147, %c0_148, %c0_149] : memref<4x8x8xf32, #tpu.memory_space<vmem>>, vector<1x8x8xf32>
      %191 = vector.shape_cast %190 : vector<1x8x8xf32> to vector<8x8xf32>
      %192 = vector.shape_cast %189 : vector<8x8xf32> to vector<1x8x8xf32>
      tpu.vector_store %arg10[%c3_147, %c0_148, %c0_149], %192 {strides = array<i32>} : memref<4x8x8xf32, #tpu.memory_space<vmem>>, vector<1x8x8xf32>,
      %c3_150 = arith.constant 3 : index
      %c0_151 = arith.constant 0 : index
      %c0_152 = arith.constant 0 : index
      %193 = vector.load %arg8[%c3_150, %c0_151, %c0_152] : memref<4x8x1xf32, #tpu.memory_space<vmem>>, vector<1x8x1xf32>
      %194 = vector.shape_cast %193 : vector<1x8x1xf32> to vector<8x1xf32>
      %195 = vector.shape_cast %166 : vector<8x1xf32> to vector<1x8x1xf32>
      tpu.vector_store %arg8[%c3_150, %c0_151, %c0_152], %195 {strides = array<i32>} : memref<4x8x1xf32, #tpu.memory_space<vmem>>, vector<1x8x1xf32>,
    } else {
    }
    %c0_i32_4 = arith.constant 0 : i32
    %16 = arith.cmpi eq, %arg2, %c0_i32_4 : i32
    %17 = arith.extui %16 : i1 to i32
    %c0_i32_5 = arith.constant 0 : i32
    %18 = arith.cmpi ne, %17, %c0_i32_5 : i32
    scf.if %18 {
      %c0 = arith.constant 0 : index
      %c0_6 = arith.constant 0 : index
      %c0_7 = arith.constant 0 : index
      %19 = vector.load %arg9[%c0, %c0_6, %c0_7] : memref<4x8x1xf32, #tpu.memory_space<vmem>>, vector<1x8x1xf32>
      %20 = vector.shape_cast %19 : vector<1x8x1xf32> to vector<8x1xf32>
      %cst = arith.constant 0.000000e+00 : f32
      %21 = vector.broadcast %cst : f32 to vector<8x1xf32>
      %22 = arith.cmpf ogt, %20, %21 : vector<8x1xf32>
      %cst_8 = arith.constant 1.000000e-30 : f32
      %23 = vector.broadcast %cst_8 : f32 to vector<8x1xf32>
      %24 = arith.maximumf %20, %23 : vector<8x1xf32>
      %25 = tpu.reciprocal %24 {approx = true} : vector<8x1xf32> -> vector<8x1xf32>
      %cst_9 = arith.constant 0.000000e+00 : f32
      %26 = vector.broadcast %cst_9 : f32 to vector<8x1xf32>
      %27 = arith.select %22, %25, %26 : vector<8x1xi1>, vector<8x1xf32>
      %c0_10 = arith.constant 0 : index
      %c0_11 = arith.constant 0 : index
      %c0_12 = arith.constant 0 : index
      %28 = vector.load %arg10[%c0_10, %c0_11, %c0_12] : memref<4x8x8xf32, #tpu.memory_space<vmem>>, vector<1x8x8xf32>
      %29 = vector.shape_cast %28 : vector<1x8x8xf32> to vector<8x8xf32>
      %30 = vector.broadcast %27 : vector<8x1xf32> to vector<8x8xf32>
      %31 = arith.mulf %29, %30 : vector<8x8xf32>
      %32 = arith.truncf %31 : vector<8x8xf32> to vector<8x8xbf16>
      %c0_13 = arith.constant 0 : index
      %c0_14 = arith.constant 0 : index
      %c0_15 = arith.constant 0 : index
      %c0_16 = arith.constant 0 : index
      %33 = vector.load %arg7[%c0_13, %c0_14, %c0_15, %c0_16] : memref<1x8x4x8xbf16, #tpu.memory_space<vmem>>, vector<1x8x1x8xbf16>
      %34 = vector.shape_cast %33 : vector<1x8x1x8xbf16> to vector<8x8xbf16>
      %35 = vector.shape_cast %32 : vector<8x8xbf16> to vector<1x8x1x8xbf16>
      tpu.vector_store %arg7[%c0_13, %c0_14, %c0_15, %c0_16], %35 {strides = array<i32>} : memref<1x8x4x8xbf16, #tpu.memory_space<vmem>>, vector<1x8x1x8xbf16>,
      %c1 = arith.constant 1 : index
      %c0_17 = arith.constant 0 : index
      %c0_18 = arith.constant 0 : index
      %36 = vector.load %arg9[%c1, %c0_17, %c0_18] : memref<4x8x1xf32, #tpu.memory_space<vmem>>, vector<1x8x1xf32>
      %37 = vector.shape_cast %36 : vector<1x8x1xf32> to vector<8x1xf32>
      %cst_19 = arith.constant 0.000000e+00 : f32
      %38 = vector.broadcast %cst_19 : f32 to vector<8x1xf32>
      %39 = arith.cmpf ogt, %37, %38 : vector<8x1xf32>
      %cst_20 = arith.constant 1.000000e-30 : f32
      %40 = vector.broadcast %cst_20 : f32 to vector<8x1xf32>
      %41 = arith.maximumf %37, %40 : vector<8x1xf32>
      %42 = tpu.reciprocal %41 {approx = true} : vector<8x1xf32> -> vector<8x1xf32>
      %cst_21 = arith.constant 0.000000e+00 : f32
      %43 = vector.broadcast %cst_21 : f32 to vector<8x1xf32>
      %44 = arith.select %39, %42, %43 : vector<8x1xi1>, vector<8x1xf32>
      %c1_22 = arith.constant 1 : index
      %c0_23 = arith.constant 0 : index
      %c0_24 = arith.constant 0 : index
      %45 = vector.load %arg10[%c1_22, %c0_23, %c0_24] : memref<4x8x8xf32, #tpu.memory_space<vmem>>, vector<1x8x8xf32>
      %46 = vector.shape_cast %45 : vector<1x8x8xf32> to vector<8x8xf32>
      %47 = vector.broadcast %44 : vector<8x1xf32> to vector<8x8xf32>
      %48 = arith.mulf %46, %47 : vector<8x8xf32>
      %49 = arith.truncf %48 : vector<8x8xf32> to vector<8x8xbf16>
      %c0_25 = arith.constant 0 : index
      %c0_26 = arith.constant 0 : index
      %c1_27 = arith.constant 1 : index
      %c0_28 = arith.constant 0 : index
      %50 = vector.load %arg7[%c0_25, %c0_26, %c1_27, %c0_28] : memref<1x8x4x8xbf16, #tpu.memory_space<vmem>>, vector<1x8x1x8xbf16>
      %51 = vector.shape_cast %50 : vector<1x8x1x8xbf16> to vector<8x8xbf16>
      %52 = vector.shape_cast %49 : vector<8x8xbf16> to vector<1x8x1x8xbf16>
      tpu.vector_store %arg7[%c0_25, %c0_26, %c1_27, %c0_28], %52 {strides = array<i32>} : memref<1x8x4x8xbf16, #tpu.memory_space<vmem>>, vector<1x8x1x8xbf16>,
      %c2 = arith.constant 2 : index
      %c0_29 = arith.constant 0 : index
      %c0_30 = arith.constant 0 : index
      %53 = vector.load %arg9[%c2, %c0_29, %c0_30] : memref<4x8x1xf32, #tpu.memory_space<vmem>>, vector<1x8x1xf32>
      %54 = vector.shape_cast %53 : vector<1x8x1xf32> to vector<8x1xf32>
      %cst_31 = arith.constant 0.000000e+00 : f32
      %55 = vector.broadcast %cst_31 : f32 to vector<8x1xf32>
      %56 = arith.cmpf ogt, %54, %55 : vector<8x1xf32>
      %cst_32 = arith.constant 1.000000e-30 : f32
      %57 = vector.broadcast %cst_32 : f32 to vector<8x1xf32>
      %58 = arith.maximumf %54, %57 : vector<8x1xf32>
      %59 = tpu.reciprocal %58 {approx = true} : vector<8x1xf32> -> vector<8x1xf32>
      %cst_33 = arith.constant 0.000000e+00 : f32
      %60 = vector.broadcast %cst_33 : f32 to vector<8x1xf32>
      %61 = arith.select %56, %59, %60 : vector<8x1xi1>, vector<8x1xf32>
      %c2_34 = arith.constant 2 : index
      %c0_35 = arith.constant 0 : index
      %c0_36 = arith.constant 0 : index
      %62 = vector.load %arg10[%c2_34, %c0_35, %c0_36] : memref<4x8x8xf32, #tpu.memory_space<vmem>>, vector<1x8x8xf32>
      %63 = vector.shape_cast %62 : vector<1x8x8xf32> to vector<8x8xf32>
      %64 = vector.broadcast %61 : vector<8x1xf32> to vector<8x8xf32>
      %65 = arith.mulf %63, %64 : vector<8x8xf32>
      %66 = arith.truncf %65 : vector<8x8xf32> to vector<8x8xbf16>
      %c0_37 = arith.constant 0 : index
      %c0_38 = arith.constant 0 : index
      %c2_39 = arith.constant 2 : index
      %c0_40 = arith.constant 0 : index
      %67 = vector.load %arg7[%c0_37, %c0_38, %c2_39, %c0_40] : memref<1x8x4x8xbf16, #tpu.memory_space<vmem>>, vector<1x8x1x8xbf16>
      %68 = vector.shape_cast %67 : vector<1x8x1x8xbf16> to vector<8x8xbf16>
      %69 = vector.shape_cast %66 : vector<8x8xbf16> to vector<1x8x1x8xbf16>
      tpu.vector_store %arg7[%c0_37, %c0_38, %c2_39, %c0_40], %69 {strides = array<i32>} : memref<1x8x4x8xbf16, #tpu.memory_space<vmem>>, vector<1x8x1x8xbf16>,
      %c3 = arith.constant 3 : index
      %c0_41 = arith.constant 0 : index
      %c0_42 = arith.constant 0 : index
      %70 = vector.load %arg9[%c3, %c0_41, %c0_42] : memref<4x8x1xf32, #tpu.memory_space<vmem>>, vector<1x8x1xf32>
      %71 = vector.shape_cast %70 : vector<1x8x1xf32> to vector<8x1xf32>
      %cst_43 = arith.constant 0.000000e+00 : f32
      %72 = vector.broadcast %cst_43 : f32 to vector<8x1xf32>
      %73 = arith.cmpf ogt, %71, %72 : vector<8x1xf32>
      %cst_44 = arith.constant 1.000000e-30 : f32
      %74 = vector.broadcast %cst_44 : f32 to vector<8x1xf32>
      %75 = arith.maximumf %71, %74 : vector<8x1xf32>
      %76 = tpu.reciprocal %75 {approx = true} : vector<8x1xf32> -> vector<8x1xf32>
      %cst_45 = arith.constant 0.000000e+00 : f32
      %77 = vector.broadcast %cst_45 : f32 to vector<8x1xf32>
      %78 = arith.select %73, %76, %77 : vector<8x1xi1>, vector<8x1xf32>
      %c3_46 = arith.constant 3 : index
      %c0_47 = arith.constant 0 : index
      %c0_48 = arith.constant 0 : index
      %79 = vector.load %arg10[%c3_46, %c0_47, %c0_48] : memref<4x8x8xf32, #tpu.memory_space<vmem>>, vector<1x8x8xf32>
      %80 = vector.shape_cast %79 : vector<1x8x8xf32> to vector<8x8xf32>
      %81 = vector.broadcast %78 : vector<8x1xf32> to vector<8x8xf32>
      %82 = arith.mulf %80, %81 : vector<8x8xf32>
      %83 = arith.truncf %82 : vector<8x8xf32> to vector<8x8xbf16>
      %c0_49 = arith.constant 0 : index
      %c0_50 = arith.constant 0 : index
      %c3_51 = arith.constant 3 : index
      %c0_52 = arith.constant 0 : index
      %84 = vector.load %arg7[%c0_49, %c0_50, %c3_51, %c0_52] : memref<1x8x4x8xbf16, #tpu.memory_space<vmem>>, vector<1x8x1x8xbf16>
      %85 = vector.shape_cast %84 : vector<1x8x1x8xbf16> to vector<8x8xbf16>
      %86 = vector.shape_cast %83 : vector<8x8xbf16> to vector<1x8x1x8xbf16>
      tpu.vector_store %arg7[%c0_49, %c0_50, %c3_51, %c0_52], %86 {strides = array<i32>} : memref<1x8x4x8xbf16, #tpu.memory_space<vmem>>, vector<1x8x1x8xbf16>,
    } else {
    }
    return
  }
  func.func @transform_0(%arg0: i32, %arg1: i32, %arg2: i32, %arg3: memref<2xi32, #tpu.memory_space<smem>>) -> (i32, i32, i32, i32, i32) {
    %c0_i32 = arith.constant 0 : i32
    %c0_i32_0 = arith.constant 0 : i32
    %c0_i32_1 = arith.constant 0 : i32
    %c0_i32_2 = arith.constant 0 : i32
    return %arg0, %arg1, %c0_i32, %c0_i32_0, %c0_i32_1 : i32, i32, i32, i32, i32
  }
  func.func @transform_1(%arg0: i32, %arg1: i32, %arg2: i32, %arg3: memref<2xi32, #tpu.memory_space<smem>>) -> (i32, i32, i32, i32, i32) {
    %0 = arith.index_cast %arg0 : i32 to index
    %1 = memref.load %arg3[%0] : memref<2xi32, #tpu.memory_space<smem>>
    %c7_i32 = arith.constant 7 : i32
    %2 = arith.addi %1, %c7_i32 : i32
    %c8_i32 = arith.constant 8 : i32
    %3 = arith.divsi %2, %c8_i32 : i32
    %c1_i32 = arith.constant 1 : i32
    %4 = arith.subi %3, %c1_i32 : i32
    %c0_i32 = arith.constant 0 : i32
    %5 = arith.maxsi %4, %c0_i32 : i32
    %6 = arith.minsi %arg2, %5 : i32
    %c1_i32_0 = arith.constant 1 : i32
    %c0_i32_1 = arith.constant 0 : i32
    %c0_i32_2 = arith.constant 0 : i32
    %c0_i32_3 = arith.constant 0 : i32
    return %arg0, %6, %c1_i32_0, %c0_i32_1, %c0_i32_2 : i32, i32, i32, i32, i32
  }
  func.func @transform_2(%arg0: i32, %arg1: i32, %arg2: i32, %arg3: memref<2xi32, #tpu.memory_space<smem>>) -> (i32, i32, i32, i32, i32) {
    %0 = arith.index_cast %arg0 : i32 to index
    %1 = memref.load %arg3[%0] : memref<2xi32, #tpu.memory_space<smem>>
    %c7_i32 = arith.constant 7 : i32
    %2 = arith.addi %1, %c7_i32 : i32
    %c8_i32 = arith.constant 8 : i32
    %3 = arith.divsi %2, %c8_i32 : i32
    %c1_i32 = arith.constant 1 : i32
    %4 = arith.subi %3, %c1_i32 : i32
    %c0_i32 = arith.constant 0 : i32
    %5 = arith.maxsi %4, %c0_i32 : i32
    %6 = arith.minsi %arg2, %5 : i32
    %c2_i32 = arith.constant 2 : i32
    %c0_i32_0 = arith.constant 0 : i32
    %c0_i32_1 = arith.constant 0 : i32
    %c0_i32_2 = arith.constant 0 : i32
    return %arg0, %6, %c2_i32, %c0_i32_0, %c0_i32_1 : i32, i32, i32, i32, i32
  }
  func.func @transform_3(%arg0: i32, %arg1: i32, %arg2: i32, %arg3: memref<2xi32, #tpu.memory_space<smem>>) -> (i32, i32, i32, i32) {
    %c0_i32 = arith.constant 0 : i32
    %c0_i32_0 = arith.constant 0 : i32
    %c0_i32_1 = arith.constant 0 : i32
    return %arg0, %arg1, %c0_i32, %c0_i32_0 : i32, i32, i32, i32
  }
}

module attributes {stable_mosaic.version = 11 : i64} {
  func.func @_linear_kernel(%arg0: i32, %arg1: i32, %arg2: memref<16x32xbf16, #tpu.memory_space<vmem>>, %arg3: memref<32x128xbf16, #tpu.memory_space<vmem>>, %arg4: memref<1x128xf32, #tpu.memory_space<vmem>>, %arg5: memref<16x128xf32, #tpu.memory_space<vmem>>) attributes {dimension_semantics = [#tpu.dimension_semantics<parallel>, #tpu.dimension_semantics<parallel>], iteration_bounds = array<i64: 1, 1>, scalar_prefetch = 0 : i64, scratch_operands = 0 : i64, tpu.core_type = #tpu.core_type<tc>, window_params = [{transform_indices = @transform_0, window_bounds = array<i64: 16, 32>}, {transform_indices = @transform_1, window_bounds = array<i64: 32, 128>}, {transform_indices = @transform_2, window_bounds = array<i64: 1, 128>}, {transform_indices = @transform_3, window_bounds = array<i64: 16, 128>}]} {
    %c0 = arith.constant 0 : index
    %c0_0 = arith.constant 0 : index
    %0 = vector.load %arg2[%c0, %c0_0] : memref<16x32xbf16, #tpu.memory_space<vmem>>, vector<16x32xbf16>
    %c0_1 = arith.constant 0 : index
    %c0_2 = arith.constant 0 : index
    %1 = vector.load %arg3[%c0_1, %c0_2] : memref<32x128xbf16, #tpu.memory_space<vmem>>, vector<32x128xbf16>
    %cst = arith.constant dense<0.000000e+00> : vector<16x128xf32>
    %2 = tpu.matmul %0, %1, %cst {dimension_numbers = #tpu.dot_dimension_numbers<[1], [0], [0], [1], [0, 0, 1, 1], [], []>} : vector<16x32xbf16>, vector<32x128xbf16>, vector<16x128xf32> -> vector<16x128xf32>
    %c0_3 = arith.constant 0 : index
    %c0_4 = arith.constant 0 : index
    %3 = vector.load %arg4[%c0_3, %c0_4] : memref<1x128xf32, #tpu.memory_space<vmem>>, vector<1x128xf32>
    %4 = vector.broadcast %3 : vector<1x128xf32> to vector<16x128xf32>
    %5 = arith.addf %2, %4 : vector<16x128xf32>
    %c0_5 = arith.constant 0 : index
    %c0_6 = arith.constant 0 : index
    %6 = vector.load %arg5[%c0_5, %c0_6] : memref<16x128xf32, #tpu.memory_space<vmem>>, vector<16x128xf32>
    tpu.vector_store %arg5[%c0_5, %c0_6], %5 {strides = array<i32>} : memref<16x128xf32, #tpu.memory_space<vmem>>, vector<16x128xf32>,
    return
  }
  func.func @transform_0(%arg0: i32, %arg1: i32) -> (i32, i32) {
    %c0_i32 = arith.constant 0 : i32
    %c0_i32_0 = arith.constant 0 : i32
    return %arg0, %c0_i32 : i32, i32
  }
  func.func @transform_1(%arg0: i32, %arg1: i32) -> (i32, i32) {
    %c0_i32 = arith.constant 0 : i32
    %c0_i32_0 = arith.constant 0 : i32
    return %c0_i32, %arg1 : i32, i32
  }
  func.func @transform_2(%arg0: i32, %arg1: i32) -> (i32, i32) {
    %c0_i32 = arith.constant 0 : i32
    %c0_i32_0 = arith.constant 0 : i32
    return %c0_i32, %arg1 : i32, i32
  }
  func.func @transform_3(%arg0: i32, %arg1: i32) -> (i32, i32) {
    %c0_i32 = arith.constant 0 : i32
    return %arg0, %arg1 : i32, i32
  }
}

</mosaic_0001>

<bundles_post_ra>
// kernel: attentions_forward.7
= control target key start
LH: loop header
LB: loop body
LE: loop exit
PB: predicated region body
PF: predicated region fallthrough
CT: control target
= control target key end

     0   :  { %v134_v0 = vmov 0.0   ;;  %vm135_vm0 = vmmov 0   ;;  %vm45_vm1 = vcmask 261120   ;;  %s171_s1 = inlined_call_operand.vmem [shape: bf16[32,128], index: 1, kind: input, shape index: {}]   ;;  %s172_s0 = inlined_call_operand.vmem [shape: bf16[16,32], index: 0, kind: input, shape index: {}]   ;;  %s173_s2 = inlined_call_operand.vmem [shape: f32[1,128], index: 2, kind: input, shape index: {}]   ;;  %s174_s3 = inlined_call_operand.vmem [shape: bf16[16,128], index: 3, kind: output, shape index: {}]  }
   0x1   :  { %121 = vmatprep.subr.bf16.mxu0 %v134_v0  ;;  %v131_v1 = vld [vmem:[%s171_s1 + $0x8] sm:$0xff]   ;;  %125 = vmatprep.mubr.msk.bf16.mxu0 %vm135_vm0, %v134_v0  ;;  %v132_v2 = vld [vmem:[%s171_s1] sm:$0xff]  }
   0x2   :  { %122 = vmatpush3.bf16.msra.mxu0 %v131_v1  ;;  %v133_v3 = vld [vmem:[%s172_s0] sm:$0xff]  }
   0x3   :  { %123 = vmatprep.subr.bf16.mxu0 %v134_v0  ;;  %v104_v5 = vld [vmem:[%s173_s2] ss:$0 sm:$0xff] }
   0x6   :  { %124 = vmatpush3.bf16.msra.mxu0 %v132_v2 }
   0x9   :  { %126 = vmatmul.mubr.msk.bf16.vlgmr.msra.gmra.mxu0 %vm45_vm1, %v133_v3 }
  0xc9   :  { %v83_v4 = vpop.f32.mrf.mxu0 }
  0xca   :  { %v84_v8 = vadd.f32 %v104_v5, %v83_v4 }
  0xcb   :  { %v127_v6 = vpop.f32.mrf.mxu0 }
  0xcd   :  { %v86_v7 = vpop.f32.mrf.mxu0 }
  0xce   :  { %v87_v9 = vadd.f32 %v104_v5, %v86_v7 }
  0xcf   :  { %v128_v10 = vpop.f32.mrf.mxu0 }
  0xd0   :  { %v116_v11 = vpack.c.bf16 %v87_v9, %v84_v8 }
  0xd2   :  { %117 = vst [vmem:[%s174_s3] sm:$0xff] %v116_v11  }

// kernel: attentions_forward.13
= control target key start
LH: loop header
LB: loop body
LE: loop exit
PB: predicated region body
PF: predicated region fallthrough
CT: control target
= control target key end

     0   :  { %v117_v0 = vmov 0.0   ;;  %vm118_vm0 = vmmov 0   ;;  %vm45_vm1 = vcmask 261120   ;;  %s157_s1 = inlined_call_operand.vmem [shape: bf16[32,128], index: 1, kind: input, shape index: {}]   ;;  %s158_s0 = inlined_call_operand.vmem [shape: bf16[16,32], index: 0, kind: input, shape index: {}]   ;;  %s159_s2 = inlined_call_operand.vmem [shape: f32[1,128], index: 2, kind: input, shape index: {}]   ;;  %s160_s3 = inlined_call_operand.vmem [shape: f32[16,128], index: 3, kind: output, shape index: {}]  }
   0x1   :  { %104 = vmatprep.subr.bf16.mxu0 %v117_v0  ;;  %v114_v1 = vld [vmem:[%s157_s1 + $0x8] sm:$0xff]   ;;  %108 = vmatprep.mubr.msk.bf16.mxu0 %vm118_vm0, %v117_v0  ;;  %v115_v2 = vld [vmem:[%s157_s1] sm:$0xff]  }
   0x2   :  { %105 = vmatpush3.bf16.msra.mxu0 %v114_v1  ;;  %v116_v3 = vld [vmem:[%s158_s0] sm:$0xff]  }
   0x3   :  { %106 = vmatprep.subr.bf16.mxu0 %v117_v0  ;;  %v96_v4 = vld [vmem:[%s159_s2] ss:$0 sm:$0xff] }
   0x6   :  { %107 = vmatpush3.bf16.msra.mxu0 %v115_v2 }
   0x9   :  { %109 = vmatmul.mubr.msk.bf16.vlgmr.msra.gmra.mxu0 %vm45_vm1, %v116_v3 }
  0xc9   :  { %v83_v5 = vpop.f32.mrf.mxu0 }
  0xca   :  { %v84_v6 = vadd.f32 %v96_v4, %v83_v5 }
  0xcb   :  { %v110_v7 = vpop.f32.mrf.mxu0 }
  0xcc   :  { %90 = vst [vmem:[%s160_s3] sm:$0xff] %v84_v6 }
  0xcd   :  { %v86_v8 = vpop.f32.mrf.mxu0 }
  0xce   :  { %v87_v9 = vadd.f32 %v96_v4, %v86_v8 }
  0xcf   :  { %v111_v10 = vpop.f32.mrf.mxu0 }
  0xd0   :  { %91 = vst [vmem:[%s160_s3 + $0x8] sm:$0xff] %v87_v9 }

// kernel: attentions_forward.8
= control target key start
LH: loop header
LB: loop body
LE: loop exit
PB: predicated region body
PF: predicated region fallthrough
CT: control target
= control target key end

     0   :  { %s6668_s0 = inlined_call_operand.vmem [shape: s32[2], index: 0, kind: input, shape index: {}]   ;;  %s6669_s1 = inlined_call_operand.vmem [shape: bf16[2,8,3,4,8], index: 1, kind: input, shape index: {}, may-alias: {1,2,3}]   ;;  %s6670_s2 = inlined_call_operand.vmem [shape: bf16[2,8,3,4,8], index: 2, kind: input, shape index: {}, may-alias: {1,2,3}]   ;;  %s6671_s3 = inlined_call_operand.vmem [shape: bf16[2,8,3,4,8], index: 3, kind: input, shape index: {}, may-alias: {1,2,3}]   ;;  %s6672_s4 = inlined_call_operand.vmem [shape: bf16[2,8,4,8], index: 4, kind: output, shape index: {}]  }
   0x1   :  { %6674 = sst [smem:[#allocation13_spill]] %s6672_s4  ;;  %s9_s17 = sshll.u32 %s6668_s0, 4  ;;  %s10_s17 = int_to_ptr.vmem [resolvable:$true] %s9_s17 }
   0x2   :  { %s5240_s18 = scalar_lea.vmem %s10_s17, 16  ;;  %p5245_p1 = scmp.lt.s32.totalorder %s10_s17, %s10_s17 }
   0x3   :  { %p5241_p0 = scmp.ne.s32.totalorder %s10_s17, %s5240_s18  ;;  %p5246_p2 = scmp.lt.s32.totalorder %s5240_s18, %s5240_s18 }
   0x5   :  { %p5247_p3 = por %p5246_p2, %p5245_p1 }
   0x7   :  { %p5248_p4 = pnand %p5247_p3, %p5241_p0 }
   0x9   :  { %5251 = shalt.err (!%p5248_p4)  }
   0xa   :  { %s5326_s19 = smov [#allocation6]  }
   0xb   :  { %12 = dma.vmem_to_smem %s10_s17, 16, %s5326_s19, [#allocation5] }
   0xc   :  { %5288 = dma.done.wait [#allocation5], 16 }
   0xd   :  { %5289 = vsyncadd [#allocation5], 4294967280 }
   0xe   :  { %14 = sfence }
   0xf   :  { %s5366_s20 = smov 0   ;;  %s5368_s21 = smov 0  }
  0x10   :  { %s5370_s22 = smov 0   ;;  %s5372_s0 = smov 0  }
  0x11   :  { %s5374_s23 = smov 0   ;;  %s5376_s24 = smov 0  }
  0x12   :  { %s5378_s25 = smov 0   ;;  %s5380_s26 = smov 0  }
  0x13   :  { %s5382_s27 = smov 0  }
  0x14 LB: > { %s39_s28 = sadd.s32 1, %s5320_s26  ;;  %p55_p6 = scmp.ne.s32.totalorder %s5312_s24, %s5308_s23  ;;  %s5324_s27 = sphi %s5382_s27, %s20_s27   ;;  %s5320_s26 = sphi %s5380_s26, %s6701_s26   ;;  %s5316_s25 = sphi %s5378_s25, %s6700_s25   ;;  %s5312_s24 = sphi %s5376_s24, %s6699_s24   ;;  %s5308_s23 = sphi %s5374_s23, %s6698_s23   ;;  %s5304_s0 = sphi %s5372_s0, %s6697_s0   ;;  %s5300_s22 = sphi %s5370_s22, %s6696_s22   ;;  %s5296_s21 = sphi %s5368_s21, %s6695_s21   ;;  %s5292_s20 = sphi %s5366_s20, %s6694_s20  }
  0x15   : > { %p41_p5 = scmp.ge.s32.totalorder %s39_s28, 2  ;;  %p56_p7 = scmp.eq.s32.totalorder %s5324_s27, 0 }
  0x16   : > { %s71_s29 = sld [smem:[#allocation6 + %s5320_s26]]  ;;  %s48_s30 = sadd.s32 1, %s5312_s24 }
  0x17   : > { %s6703_s28 = smov (%p41_p5, %s39_s28), 0  ;;  %p5421_p8 = por %p56_p7, %p55_p6 }
  0x18   : > { %6675 = sst [smem:[#allocation11_spill]] %s6703_s28  ;;  %s5427_s6 = ssub.s32 %s5320_s26, %s6703_s28 }
  0x19   : > { %s84_s7 = sld [smem:[#allocation6 + %s6703_s28]]  ;;  %p46_p9 = scmp.eq.s32.totalorder %s5427_s6, 0 }
  0x1a   : > { %p109_p10 = scmp.ne.s32.totalorder %s5304_s0, %s5300_s22  ;;  %s125_s8 = sld [smem:[#allocation6 + %s5320_s26]] }
  0x1b   : > { %s5435_s9 = scalar_select %p46_p9, %s5312_s24, %s48_s30  }
  0x1c   : > { %s72_s10 = sadd.s32 7, %s71_s29  ;;  %p5439_p11 = por %p109_p10, %p56_p7 }
  0x1d   : > { %6677 = sst [smem:[#allocation12_spill]] %s5435_s9  ;;  %p73_p12 = scmp.lt.s32.totalorder %s72_s10, 0 }
  0x1e   : > { %s74_s12 = ssub.s32 0, %s72_s10  ;;  %p163_p2 = scmp.ne.s32.totalorder %s5296_s21, %s5292_s20 }
  0x1f   : > { %s4685_s13 = smin.u32 %s74_s12, %s72_s10  ;;  %s85_s14 = sadd.s32 7, %s84_s7 }
  0x20   : > { %s76_s15 = sshrl.u32 %s4685_s13, 3  ;;  %p86_p13 = scmp.lt.s32.totalorder %s85_s14, 0 }
  0x21   : > { %s77_s16 = ssub.s32 0, %s76_s15  ;;  %s87_s17 = ssub.s32 0, %s85_s14 }
  0x22   : > { %s6705_s16 = smov (!%p73_p12, %s77_s16), %s76_s15  ;;  %s4688_s18 = smin.u32 %s87_s17, %s85_s14 }
  0x23   : > { %s126_s19 = sadd.s32 7, %s125_s8  ;;  %s4686_s29 = sadd.s32 4294967295, %s6705_s16 }
  0x24   : > { %s89_s30 = sshrl.u32 %s4688_s18, 3  ;;  %p5443_p0 = scmp.gt.s32.totalorder %s4686_s29, 0 }
  0x25   : > { %s90_s7 = ssub.s32 0, %s89_s30  ;;  %s128_s8 = ssub.s32 0, %s126_s19 }
  0x26   : > { %s6707_s7 = smov (!%p86_p13, %s90_s7), %s89_s30  ;;  %s6709_s29 = smov (!%p5443_p0, %s4686_s29), 0 }
  0x27   : > { %s4689_s10 = sadd.s32 4294967295, %s6707_s7  ;;  %s6711_s29 = smov (%p5443_p0, %s6709_s29), 0 }
  0x28   : > { %p93_p1 = scmp.gt.s32.totalorder %s4689_s10, 0  ;;  %s4691_s12 = smin.u32 %s128_s8, %s126_s19 }
  0x29   : > { %s138_s13 = sld [smem:[#allocation6 + %s6703_s28]]  ;;  %s130_s14 = sshrl.u32 %s4691_s12, 3 }
  0x2a   : > { %s6713_s10 = smov (!%p93_p1, %s4689_s10), 0  ;;  %p127_p3 = scmp.lt.s32.totalorder %s126_s19, 0 }
  0x2b   : > { %s6715_s10 = smov (%p93_p1, %s6713_s10), 0  ;;  %p5456_p4 = por %p163_p2, %p56_p7 }
  0x2c   : > { %s98_s16 = ssub.s32 %s6711_s29, %s6715_s10  ;;  %s131_s17 = ssub.s32 0, %s130_s14 }
  0x2d   : > { %s99_s18 = sor.u32 %s98_s16, %s5427_s6  ;;  %s102_s9 = sadd.s32 1, %s5304_s0 }
  0x2e   : > { %p100_p5 = scmp.eq.s32.totalorder %s99_s18, 0  ;;  %s6717_s17 = smov (!%p127_p3, %s131_s17), %s130_s14 }
  0x2f   : > { %s139_s30 = sadd.s32 7, %s138_s13  ;;  %s4692_s8 = sadd.s32 4294967295, %s6717_s17 }
  0x30   : > { %s5463_s7 = scalar_select %p100_p5, %s5304_s0, %s102_s9  }
  0x31   : > { %s141_s12 = ssub.s32 0, %s139_s30  ;;  %p134_p6 = scmp.gt.s32.totalorder %s4692_s8, 0 }
  0x32   : > { %s4694_s19 = smin.u32 %s141_s12, %s139_s30  ;;  %p140_p7 = scmp.lt.s32.totalorder %s139_s30, 0 }
  0x33   : > { %s143_s28 = sshrl.u32 %s4694_s19, 3  ;;  %s6719_s8 = smov (!%p134_p6, %s4692_s8), 0 }
  0x34   : > { %s144_s4 = ssub.s32 0, %s143_s28  ;;  %s6723_s8 = smov (%p134_p6, %s6719_s8), 0 }
  0x35   : > { %s6721_s4 = smov (!%p140_p7, %s144_s4), %s143_s28  ;;  %s156_s14 = sadd.s32 1, %s5296_s21 }
  0x36   : > { %s4695_s29 = sadd.s32 4294967295, %s6721_s4  ;;  %p4698_p12 = scmp.ge.s32.totalorder %s5324_s27, 2 }
  0x37   : > { %p147_p9 = scmp.gt.s32.totalorder %s4695_s29, 0 }
  0x39   : > { %s6725_s29 = smov (!%p147_p9, %s4695_s29), 0 }
  0x3a   : > { %s6727_s29 = smov (%p147_p9, %s6725_s29), 0 }
  0x3b   : > { %s152_s10 = ssub.s32 %s6723_s8, %s6727_s29  ;;  %217 = sbr.rel (%p4698_p12) target bundleno = 130 (0x82), region = 16 }
  0x3c   : > { %s153_s13 = sor.u32 %s152_s10, %s5427_s6 }
  0x3d   : > { %p154_p10 = scmp.eq.s32.totalorder %s153_s13, 0 }
  0x3f   : > { %s5468_s16 = scalar_select %p154_p10, %s5296_s21, %s156_s14  }
  0x40   : > { %220 = sbr.rel (!%p5421_p8) target bundleno = 74 (0x4a), region = 20  ;;  %s222_s28 = sand.u32 (%p5421_p8), 1, %s5312_s24  }
  0x41   : > { %s5109_s4 = smul.u32 (%p5421_p8), 48, %s5320_s26  ;;  %s4699_s17 = sshll.u32 (%p5421_p8), %s222_s28, 4 }
  0x42   : > { %s224_s6 = scalar_lea.vmem (%p5421_p8), [#allocation7], %s4699_s17 }
  0x43   : > { %s230_s30 = scalar_lea.vmem (%p5421_p8), %s6669_s1, %s5109_s4 }
  0x44   : > { %v247_v0 = vld [vmem:[%s230_s30] sm:$0x3] (%p5421_p8)  ;;  %v249_v1 = vld [vmem:[%s230_s30 + $0x6] sm:$0x3] (%p5421_p8)  ;;  %v251_v2 = vld [vmem:[%s230_s30 + $0xc] sm:$0x3] (%p5421_p8) }
  0x45   : > { %248 = vst [vmem:[%s224_s6] sm:$0x3] %v247_v0  ;;  %250 = vst [vmem:[%s224_s6 + $0x2] sm:$0x3] %v249_v1  ;;  %v253_v3 = vld [vmem:[%s230_s30 + $0x12] sm:$0x3] }
  0x46   : > { %252 = vst [vmem:[%s224_s6 + $0x4] sm:$0x3] %v251_v2  ;;  %v255_v4 = vld [vmem:[%s230_s30 + $0x18] sm:$0x3]  ;;  %v257_v5 = vld [vmem:[%s230_s30 + $0x1e] sm:$0x3] }
  0x47   : > { %254 = vst [vmem:[%s224_s6 + $0x6] sm:$0x3] %v253_v3  ;;  %256 = vst [vmem:[%s224_s6 + $0x8] sm:$0x3] %v255_v4  ;;  %v259_v6 = vld [vmem:[%s230_s30 + $0x24] sm:$0x3] }
  0x48   : > { %258 = vst [vmem:[%s224_s6 + $0xa] sm:$0x3] %v257_v5  ;;  %v261_v7 = vld [vmem:[%s230_s30 + $0x2a] sm:$0x3]  ;;  %260 = vst [vmem:[%s224_s6 + $0xc] sm:$0x3] %v259_v6 }
  0x49   : > { %262 = vst [vmem:[%s224_s6 + $0xe] sm:$0x3] %v261_v7 }
  0x4a PF: > { %302 = sbr.rel (!%p5439_p11) target bundleno = 102 (0x66), region = 61  ;;  %s307_s5 = sld [smem:[#allocation6 + %s5320_s26]] (%p5439_p11) }
  0x4b   : > { %s304_s14 = sand.u32 (%p5439_p11), 1, %s5304_s0   ;;  %s4586_s28 = smul.u32 (%p5439_p11), 24, %s5320_s26 }
  0x4c   : > { %s4701_s4 = sshll.u32 (%p5439_p11), %s304_s14, 4 }
  0x50   : > { %s308_s8 = sadd.s32 7, %s307_s5  ;;  %s306_s5 = scalar_lea.vmem [#allocation8], %s4701_s4 }
  0x51   : > { %p309_p8 = scmp.lt.s32.totalorder %s308_s8, 0  ;;  %s310_s12 = ssub.s32 0, %s308_s8 }
  0x52   : > { %s4702_s19 = smin.u32 %s310_s12, %s308_s8 }
  0x53   : > { %s312_s29 = sshrl.u32 %s4702_s19, 3 }
  0x54   : > { %s313_s10 = ssub.s32 0, %s312_s29 }
  0x55   : > { %s6729_s10 = smov (!%p309_p8, %s313_s10), %s312_s29 }
  0x56   : > { %s4703_s13 = sadd.s32 4294967295, %s6729_s10 }
  0x57   : > { %p316_p13 = scmp.gt.s32.totalorder %s4703_s13, 0 }
  0x59   : > { %s6731_s13 = smov (!%p316_p13, %s4703_s13), 0 }
  0x5a   : > { %s6733_s13 = smov (%p316_p13, %s6731_s13), 0 }
  0x5b   : > { %s4585_s11 = smul.u32 24, %s6733_s13 }
  0x5d   : > { %s4587_s17 = sadd.s32 %s4586_s28, %s4585_s11 }
  0x5e   : > { %s4705_s18 = sshll.u32 %s4587_s17, 1 }
  0x5f   : > { %s4589_s6 = scalar_lea.vmem %s6670_s2, %s4705_s18 }
  0x60   : > { %v4706_v8 = vld [vmem:[%s4589_s6 + $0x2] sm:$0x3]  ;;  %v4707_v9 = vld [vmem:[%s4589_s6 + $0x8] sm:$0x3]  ;;  %v4708_v10 = vld [vmem:[%s4589_s6 + $0xe] sm:$0x3] }
  0x61   : > { %344 = vst [vmem:[%s306_s5] sm:$0x3] %v4706_v8  ;;  %346 = vst [vmem:[%s306_s5 + $0x2] sm:$0x3] %v4707_v9  ;;  %v4709_v11 = vld [vmem:[%s4589_s6 + $0x14] sm:$0x3] }
  0x62   : > { %348 = vst [vmem:[%s306_s5 + $0x4] sm:$0x3] %v4708_v10  ;;  %v4710_v12 = vld [vmem:[%s4589_s6 + $0x1a] sm:$0x3]  ;;  %v4711_v13 = vld [vmem:[%s4589_s6 + $0x20] sm:$0x3] }
  0x63   : > { %350 = vst [vmem:[%s306_s5 + $0x6] sm:$0x3] %v4709_v11  ;;  %352 = vst [vmem:[%s306_s5 + $0x8] sm:$0x3] %v4710_v12  ;;  %v4712_v14 = vld [vmem:[%s4589_s6 + $0x26] sm:$0x3] }
  0x64   : > { %354 = vst [vmem:[%s306_s5 + $0xa] sm:$0x3] %v4711_v13  ;;  %v4713_v15 = vld [vmem:[%s4589_s6 + $0x2c] sm:$0x3]  ;;  %356 = vst [vmem:[%s306_s5 + $0xc] sm:$0x3] %v4712_v14 }
  0x65   : > { %358 = vst [vmem:[%s306_s5 + $0xe] sm:$0x3] %v4713_v15 }
  0x66 PF: > { %398 = sbr.rel (!%p5456_p4) target bundleno = 130 (0x82), region = 102  ;;  %s403_s8 = sld [smem:[#allocation6 + %s5320_s26]] (%p5456_p4) }
  0x67   : > { %s400_s28 = sand.u32 (%p5456_p4), 1, %s5296_s21   ;;  %s4594_s4 = smul.u32 (%p5456_p4), 24, %s5320_s26 }
  0x68   : > { %s4714_s11 = sshll.u32 (%p5456_p4), %s400_s28, 4 }
  0x69   : > { %s402_s5 = scalar_lea.vmem (%p5456_p4), [#allocation9], %s4714_s11 }
  0x6c   : > { %s404_s12 = sadd.s32 7, %s403_s8 }
  0x6d   : > { %p405_p11 = scmp.lt.s32.totalorder %s404_s12, 0  ;;  %s406_s19 = ssub.s32 0, %s404_s12 }
  0x6e   : > { %s4715_s29 = smin.u32 %s406_s19, %s404_s12 }
  0x6f   : > { %s408_s10 = sshrl.u32 %s4715_s29, 3 }
  0x70   : > { %s409_s13 = ssub.s32 0, %s408_s10 }
  0x71   : > { %s6735_s13 = smov (!%p405_p11, %s409_s13), %s408_s10 }
  0x72   : > { %s4716_s14 = sadd.s32 4294967295, %s6735_s13 }
  0x73   : > { %p412_p0 = scmp.gt.s32.totalorder %s4716_s14, 0 }
  0x75   : > { %s6737_s14 = smov (!%p412_p0, %s4716_s14), 0 }
  0x76   : > { %s6739_s14 = smov (%p412_p0, %s6737_s14), 0 }
  0x77   : > { %s4593_s15 = smul.u32 24, %s6739_s14 }
  0x79   : > { %s4595_s17 = sadd.s32 %s4594_s4, %s4593_s15 }
  0x7a   : > { %s4718_s18 = sshll.u32 %s4595_s17, 1 }
  0x7b   : > { %s4597_s6 = scalar_lea.vmem %s6671_s3, %s4718_s18 }
  0x7c   : > { %v4719_v16 = vld [vmem:[%s4597_s6 + $0x4] sm:$0x3]  ;;  %v4720_v17 = vld [vmem:[%s4597_s6 + $0xa] sm:$0x3]  ;;  %v4721_v18 = vld [vmem:[%s4597_s6 + $0x10] sm:$0x3] }
  0x7d   : > { %440 = vst [vmem:[%s402_s5] sm:$0x3] %v4719_v16  ;;  %442 = vst [vmem:[%s402_s5 + $0x2] sm:$0x3] %v4720_v17  ;;  %v4722_v19 = vld [vmem:[%s4597_s6 + $0x16] sm:$0x3] }
  0x7e   : > { %444 = vst [vmem:[%s402_s5 + $0x4] sm:$0x3] %v4721_v18  ;;  %v4723_v20 = vld [vmem:[%s4597_s6 + $0x1c] sm:$0x3]  ;;  %v4724_v21 = vld [vmem:[%s4597_s6 + $0x22] sm:$0x3] }
  0x7f   : > { %446 = vst [vmem:[%s402_s5 + $0x6] sm:$0x3] %v4722_v19  ;;  %448 = vst [vmem:[%s402_s5 + $0x8] sm:$0x3] %v4723_v20  ;;  %v4725_v22 = vld [vmem:[%s4597_s6 + $0x28] sm:$0x3] }
  0x80   : > { %450 = vst [vmem:[%s402_s5 + $0xa] sm:$0x3] %v4724_v21  ;;  %v4726_v23 = vld [vmem:[%s4597_s6 + $0x2e] sm:$0x3]  ;;  %452 = vst [vmem:[%s402_s5 + $0xc] sm:$0x3] %v4725_v22 }
  0x81   : > { %454 = vst [vmem:[%s402_s5 + $0xe] sm:$0x3] %v4726_v23 }
  0x82 PF: > { %p4727_p1 = scmp.ge.s32.totalorder %s5324_s27, 1  ;;  %p493_p2 = scmp.lt.s32.totalorder %s5324_s27, 3 }
  0x84   : > { %p494_p3 = pnand %p4727_p1, %p493_p2 }
  0x85   : > { %s500_s8 = sand.u32 (!%p494_p3), 1, %s5308_s23   ;;  %s507_s12 = sand.u32 (!%p494_p3), 1, %s5300_s22  }
  0x86   : > { %497 = sbr.rel (%p494_p3) target bundleno = 2758 (0xac6), region = 143  ;;  %s4728_s19 = sshll.u32 (!%p494_p3), %s500_s8, 4 }
  0x87   : > { %s4729_s29 = sshll.u32 (!%p494_p3), %s507_s12, 4  ;;  %s514_s22 = sand.u32 (!%p494_p3), 1, %s5292_s20  }
  0x88   : > { %p579_p4 = scmp.lt.s32.totalorder (!%p494_p3), %s5316_s25, 1  ;;  %s4730_s23 = sshll.u32 (!%p494_p3), %s514_s22, 4 }
  0x89   : > { %s5513_s10 = sld [smem:[#allocation6 + %s5316_s25]] (!%p494_p3)  ;;  %s5525_s15 = scalar_lea.vmem (!%p494_p3), [#allocation7], %s4728_s19 }
  0x8a   : > { %s6681_s4 = sld [smem:[#allocation13_spill]] (!%p494_p3)  ;;  %s5527_s20 = scalar_lea.vmem (!%p494_p3), [#allocation8], %s4729_s29 }
  0x8b   : > { %vm595_vm0 = vcmask 7168   ;;  %vm604_vm1 = vcmask 64512   ;;  %v5327_v24 = vmov -inf   ;;  %v5328_v25 = vmov 0.0   ;;  %s6741_s25 = smov (!%p579_p4, %s5316_s25), 1  ;;  %s5529_s17 = scalar_lea.vmem [#allocation9], %s4730_s23 }
  0x8c   : > { %596 = vst.msk [vmem:[#allocation2] sm:$0xff] %vm595_vm0, %v5327_v24  ;;  %597 = vst.msk [vmem:[#allocation2 + $0x8] sm:$0xff] %vm595_vm0, %v5327_v24  ;;  %s4980_s13 = sshll.u32 %s6741_s25, 4 }
  0x8d   : > { %598 = vst.msk [vmem:[#allocation2 + $0x10] sm:$0xff] %vm595_vm0, %v5327_v24  ;;  %599 = vst.msk [vmem:[#allocation2 + $0x18] sm:$0xff] %vm595_vm0, %v5327_v24 }
  0x8e   : > { %600 = vst.msk [vmem:[#allocation3] sm:$0xff] %vm595_vm0, %v5328_v25  ;;  %601 = vst.msk [vmem:[#allocation3 + $0x8] sm:$0xff] %vm595_vm0, %v5328_v25 }
  0x8f   : > { %602 = vst.msk [vmem:[#allocation3 + $0x10] sm:$0xff] %vm595_vm0, %v5328_v25  ;;  %603 = vst.msk [vmem:[#allocation3 + $0x18] sm:$0xff] %vm595_vm0, %v5328_v25  ;;  %p4733_p5 = scmp.gt.s32.totalorder %s5513_s10, 0  ;;  %p4734_p6 = scmp.ge.s32.totalorder %s5513_s10, 8 }
  0x90   : > { %605 = vst.msk [vmem:[#allocation4] sm:$0xff] %vm604_vm1, %v5328_v25  ;;  %606 = vst.msk [vmem:[#allocation4 + $0x8] sm:$0xff] %vm604_vm1, %v5328_v25  ;;  %s5519_s11 = scalar_lea.vmem %s6681_s4, %s4980_s13 }
  0x91   : > { %607 = vst.msk [vmem:[#allocation4 + $0x10] sm:$0xff] %vm604_vm1, %v5328_v25  ;;  %608 = vst.msk [vmem:[#allocation4 + $0x18] sm:$0xff] %vm604_vm1, %v5328_v25  ;;  %p612_p7 = pnand %p4734_p6, %p4733_p5 }
  0x93   : > { %615 = sbr.rel (%p612_p7) target bundleno = 1354 (0x54a), region = 163 }
  0x98   : > { %v5532_v26 = vld.sshfl [vmem:[%s5527_s20] sm:$0x1 pattern:$0x76325410]  ;;  %v5329_v27 = vmov 0.0   ;;  %vm705_vm2 = vcmask 1041409  }
  0x99   : > { %5013 = vmatprep.subr.bf16.mxu0 %v5329_v27  ;;  %v5536_v28 = vld.sshfl [vmem:[%s5527_s20 + $0x2] sm:$0x1 pattern:$0x76325410]  ;;  %5019 = vmatprep.subr.bf16.mxu1 %v5329_v27  ;;  %v790_v30 = vunpack.c.l.b16 %v5532_v26  ;;  %vm708_vm3 = vcmask 1042434   ;;  %vm711_vm4 = vcmask 1043459  }
  0x9a   : > { %v5540_v29 = vld.sshfl [vmem:[%s5527_s20 + $0x4] sm:$0x1 pattern:$0x76325410]  ;;  %v791_v31 = vunpack.c.l.b16 %v5536_v28  ;;  %vm5330_vm5 = vmmov 0   ;;  %vm714_vm6 = vcmask 1044484  }
  0x9b   : > { %v5545_v32 = vld.sshfl [vmem:[%s5527_s20 + $0x6] sm:$0x1 pattern:$0x76325410]  ;;  %v792_v33 = vunpack.c.l.b16 %v5540_v29  ;;  %5015 = vmatprep.mubr.msk.bf16.mxu0 %vm5330_vm5, %v5329_v27  ;;  %5021 = vmatprep.mubr.msk.bf16.mxu1 %vm5330_vm5, %v5329_v27  ;;  %vm717_vm7 = vcmask 1045509   ;;  %vm720_vm8 = vcmask 1046534  }
  0x9c   : > { %v5549_v34 = vld.sshfl [vmem:[%s5527_s20 + $0x8] sm:$0x1 pattern:$0x76325410]  ;;  %v793_v35 = vunpack.c.l.b16 %v5545_v32  ;;  %v798_v36 = vrot.slane %v791_v31, 7  ;;  %vm723_vm9 = vcmask 1047559  }
  0x9d   : > { %v5555_v37 = vld.sshfl [vmem:[%s5527_s20 + $0xa] sm:$0x1 pattern:$0x76325410]  ;;  %v794_v38 = vunpack.c.l.b16 %v5549_v34  ;;  %v800_v39 = vrot.slane %v792_v33, 6  ;;  %vm990_vm10 = vcmask 1043456  }
  0x9e   : > { %v5565_v40 = vld.sshfl [vmem:[%s5527_s20 + $0xc] sm:$0x1 pattern:$0x76325410]  ;;  %v795_v41 = vunpack.c.l.b16 %v5555_v37  ;;  %v799_v42 = vsel %vm705_vm2, %v798_v36, %v790_v30  ;;  %v802_v43 = vrot.slane %v793_v35, 5 }
  0x9f   : > { %v5574_v44 = vld.sshfl [vmem:[%s5527_s20 + $0xe] sm:$0x1 pattern:$0x76325410]  ;;  %v796_v45 = vunpack.c.l.b16 %v5565_v40  ;;  %v801_v46 = vsel %vm708_vm3, %v800_v39, %v799_v42  ;;  %v804_v47 = vrot.slane %v794_v38, 4  ;;  %v1218_v26 = vrot.slane %v794_v38, 5 }
  0xa0   : > { %v797_v48 = vunpack.c.l.b16 %v5574_v44  ;;  %v803_v49 = vsel %vm711_vm4, %v802_v43, %v801_v46  ;;  %v806_v50 = vrot.slane %v795_v41, 3  ;;  %v5585_v51 = vld.sshfl [vmem:[%s5525_s15] sm:$0x1 pattern:$0x76325410] }
  0xa1   : > { %v805_v52 = vsel %vm714_vm6, %v804_v47, %v803_v49  ;;  %v808_v53 = vrot.slane %v796_v45, 2  ;;  %v5591_v54 = vld.sshfl [vmem:[%s5525_s15 + $0x2] sm:$0x1 pattern:$0x76325410]  ;;  %v696_v58 = vunpack.c.l.b16 %v5585_v51  ;;  %v5331_v47 = vmov 0  }
  0xa2   : > { %v807_v55 = vsel %vm717_vm7, %v806_v50, %v805_v52  ;;  %v810_v56 = vrot.slane %v797_v48, 1  ;;  %v5597_v57 = vld.sshfl [vmem:[%s5525_s15 + $0x4] sm:$0x1 pattern:$0x76325410]  ;;  %v697_v59 = vunpack.c.l.b16 %v5591_v54  ;;  %5194 = vset.pattern.permute.xlu0 %v5331_v47  ;;  %5195 = vset.pattern.permute.xlu1 %v5331_v47  ;;  %v1222_v51 = vrot.slane %v796_v45, 3 }
  0xa3   : > { %v809_v60 = vsel %vm720_vm8, %v808_v53, %v807_v55  ;;  %v5603_v61 = vld.sshfl [vmem:[%s5525_s15 + $0x6] sm:$0x1 pattern:$0x76325410]  ;;  %v698_v62 = vunpack.c.l.b16 %v5597_v57  ;;  %v1224_v54 = vrot.slane %v797_v48, 2 }
  0xa4   : > { %v811_v63 = vsel %vm723_vm9, %v810_v56, %v809_v60  ;;  %v5608_v0 = vld.sshfl [vmem:[%s5525_s15 + $0x8] sm:$0x1 pattern:$0x76325410]  ;;  %v699_v1 = vunpack.c.l.b16 %v5603_v61  ;;  %v704_v2 = vrot.slane %v697_v59, 7  ;;  %v860_v49 = vld [vmem:[#allocation2] sm:$0xff] }
  0xa5   : > { %v812_v3 = vpack.c.b16 %v811_v63, %v811_v63  ;;  %v5614_v4 = vld.sshfl [vmem:[%s5525_s15 + $0xa] sm:$0x1 pattern:$0x76325410]  ;;  %v700_v5 = vunpack.c.l.b16 %v5608_v0  ;;  %v707_v6 = vrot.slane %v698_v62, 6 }
  0xa6   : > { %v5620_v7 = vld.sshfl [vmem:[%s5525_s15 + $0xc] sm:$0x1 pattern:$0x76325410]  ;;  %v701_v8 = vunpack.c.l.b16 %v5614_v4  ;;  %v706_v9 = vsel %vm705_vm2, %v704_v2, %v696_v58  ;;  %v710_v10 = vrot.slane %v699_v1, 5 }
  0xa7   : > { %v818_v11 = vsel %vm604_vm1, %v812_v3, 0  ;;  %v5630_v12 = vld.sshfl [vmem:[%s5525_s15 + $0xe] sm:$0x1 pattern:$0x76325410]  ;;  %v702_v13 = vunpack.c.l.b16 %v5620_v7  ;;  %v709_v14 = vsel %vm708_vm3, %v707_v6, %v706_v9  ;;  %v713_v15 = vrot.slane %v700_v5, 4 }
  0xa8   : > { %5014 = vmatpush3.bf16.xpose.msra.mxu0 %v818_v11  ;;  %v703_v16 = vunpack.c.l.b16 %v5630_v12  ;;  %v712_v17 = vsel %vm711_vm4, %v710_v10, %v709_v14  ;;  %v716_v18 = vrot.slane %v701_v8, 3  ;;  %v5657_v53 = vld.sshfl [vmem:[%s5529_s17 + $0x2] sm:$0x1 pattern:$0x76325410]  ;;  %v1131_v44 = vrot.slane %v700_v5, 5 }
  0xa9   : > { %v715_v19 = vsel %vm714_vm6, %v713_v15, %v712_v17  ;;  %v719_v20 = vrot.slane %v702_v13, 2  ;;  %5031 = vmatprep.subr.bf16.mxu0 %v5329_v27  ;;  %v5660_v55 = vld.sshfl [vmem:[%s5529_s17 + $0x4] sm:$0x1 pattern:$0x76325410]  ;;  %v965_v56 = vunpack.c.l.b16 %v5657_v53  ;;  %v1135_v4 = vrot.slane %v702_v13, 3 }
  0xaa   : > { %v718_v21 = vsel %vm717_vm7, %v716_v18, %v715_v19  ;;  %v722_v22 = vrot.slane %v703_v16, 1  ;;  %v5665_v63 = vld.sshfl [vmem:[%s5529_s17] sm:$0x1 pattern:$0x76325410]  ;;  %v966_v2 = vunpack.c.l.b16 %v5660_v55 }
  0xab   : > { %v721_v23 = vsel %vm720_vm8, %v719_v20, %v718_v21  ;;  %v5669_v3 = vld.sshfl [vmem:[%s5529_s17 + $0x6] sm:$0x1 pattern:$0x76325410]  ;;  %v964_v6 = vunpack.c.l.b16 %v5665_v63  ;;  %v972_v9 = vrot.slane %v965_v56, 7 }
  0xac   : > { %v724_v24 = vsel %vm723_vm9, %v722_v22, %v721_v23  ;;  %v5675_v11 = vld.sshfl [vmem:[%s5529_s17 + $0x8] sm:$0x1 pattern:$0x76325410]  ;;  %v967_v14 = vunpack.c.l.b16 %v5669_v3  ;;  %v974_v19 = vrot.slane %v966_v2, 6 }
  0xad   : > { %v725_v25 = vpack.c.b16 %v724_v24, %v724_v24  ;;  %v5679_v15 = vld.sshfl [vmem:[%s5529_s17 + $0xa] sm:$0x1 pattern:$0x76325410]  ;;  %v968_v17 = vunpack.c.l.b16 %v5675_v11  ;;  %v973_v18 = vsel %vm705_vm2, %v972_v9, %v964_v6 }
  0xae   : > { %v5688_v20 = vld.sshfl [vmem:[%s5529_s17 + $0xc] sm:$0x1 pattern:$0x76325410]  ;;  %v969_v21 = vunpack.c.l.b16 %v5679_v15  ;;  %v976_v22 = vrot.slane %v967_v14, 5 }
  0xaf   : > { %5016 = vmatmul.mubr.msk.bf16.vlgmr.msra.gmra.mxu0 %vm604_vm1, %v725_v25  ;;  %v5694_v23 = vld.sshfl [vmem:[%s5529_s17 + $0xe] sm:$0x1 pattern:$0x76325410]  ;;  %v970_v24 = vunpack.c.l.b16 %v5688_v20  ;;  %v975_v25 = vsel %vm708_vm3, %v974_v19, %v973_v18 }
  0xb0   : > { %5033 = vmatprep.mubr.msk.bf16.mxu0 %vm5330_vm5, %v5329_v27  ;;  %v5739_v32 = vld.sshfl [vmem:[%s5527_s20 + $0x8] sm:$0x2 pattern:$0x76325410]  ;;  %v1395_v55 = vrot.slane %v969_v21, 4 }
  0xb1   : > { %v5745_v38 = vld.sshfl [vmem:[%s5525_s15] sm:$0x2 pattern:$0x76325410]  ;;  %v1397_v53 = vrot.slane %v970_v24, 3 }
  0xb2   : > { %v1531_v45 = vunpack.c.l.b16 %v5745_v38  ;;  %v5783_v61 = vld.sshfl [vmem:[%s5525_s15 + $0x6] sm:$0x2 pattern:$0x76325410] }
  0xb3   : > { %v1534_v0 = vunpack.c.l.b16 %v5783_v61 }
 0x16f   : > { %v5652_v36 = vpop.f32.mrf.mxu0 }
 0x170   : > { %v861_v39 = vsel %vm604_vm1, %v5652_v36, -inf }
 0x171   : > { %862 = vmax.xlane.f32.xlu0 %v861_v39  ;;  %v5017_v42 = vpop.f32.mrf.mxu0  ;;  %v978_v39 = vrot.slane %v968_v17, 4 }
 0x172   : > { %v971_v42 = vunpack.c.l.b16 %v5694_v23 }
 0x173   : > { %v857_v43 = vpop.f32.mrf.mxu0 }
 0x174   : > { %v977_v43 = vsel %vm711_vm4, %v976_v22, %v975_v25  ;;  %v1212_v22 = vrot.slane %v790_v30, 1  ;;  %v4795_v25 = vld.sshfl [vmem:[%s5527_s20] sm:$0x2 pattern:$0x76325410]  ;;  %v1399_v3 = vrot.slane %v971_v42, 2 }
 0x175   : > { %v5018_v46 = vpop.f32.mrf.mxu0  ;;  %v979_v47 = vsel %vm714_vm6, %v978_v39, %v977_v43  ;;  %v1214_v39 = vrot.slane %v792_v33, 7  ;;  %v4796_v43 = vld.sshfl [vmem:[%s5527_s20 + $0x2] sm:$0x2 pattern:$0x76325410] }
 0x176   : > { %v980_v46 = vrot.slane %v969_v21, 3  ;;  %v5732_v30 = vld.sshfl [vmem:[%s5527_s20 + $0x6] sm:$0x2 pattern:$0x76325410] }
 0x177   : > { %v4797_v33 = vld.sshfl [vmem:[%s5527_s20 + $0x4] sm:$0x2 pattern:$0x76325410]  ;;  %v1621_v34 = vunpack.c.l.b16 %v5732_v30 }
 0x179   : > { %v1630_v40 = vrot.slane %v1621_v34, 7 }
 0x1fa   : > { %v863_v50 = vpop.xlane.xlu0 %862 }
 0x1fb   : > { %v864_v52 = vmax.f32 %v860_v49, %v863_v50  ;;  %v981_v50 = vsel %vm717_vm7, %v980_v46, %v979_v47  ;;  %v1213_v46 = vsel %vm705_vm2, %v791_v31, %v1212_v22  ;;  %v1216_v47 = vrot.slane %v793_v35, 6 }
 0x1fc   : > { %v1125_v31 = vrot.slane %v696_v58, 1  ;;  %v1620_v22 = vunpack.c.l.b16 %v4797_v33  ;;  %v1127_v58 = vrot.slane %v698_v62, 7  ;;  %v5771_v62 = vld.sshfl [vmem:[%s5527_s20 + $0xc] sm:$0x2 pattern:$0x76325410] }
 0x1fd   : > { %v865_v60 = vsub.f32 %v860_v49, %v864_v52  ;;  %1036 = vst.msk [vmem:[#allocation2] sm:$0xff] %vm595_vm0, %v864_v52  ;;  %870 = vperm.xlu0 %5194, %v864_v52   ;;  %v982_v49 = vrot.slane %v970_v24, 2  ;;  %v984_v52 = vrot.slane %v971_v42, 1  ;;  %v1624_v38 = vunpack.c.l.b16 %v5771_v62 }
 0x1ff   : > { %v866_v10 = vmul.f32 1.442695, %v865_v60  ;;  %v983_v60 = vsel %vm720_vm8, %v982_v49, %v981_v50  ;;  %v1618_v49 = vunpack.c.l.b16 %v4795_v25  ;;  %v1619_v50 = vunpack.c.l.b16 %v4796_v43  ;;  %v4788_v25 = vld.sshfl [vmem:[%s5525_s15 + $0x2] sm:$0x2 pattern:$0x76325410] }
 0x200   : > { %v985_v9 = vsel %vm723_vm9, %v984_v52, %v983_v60  ;;  %v1215_v52 = vsel %vm708_vm3, %v1214_v39, %v1213_v46  ;;  %v1126_v39 = vsel %vm705_vm2, %v697_v59, %v1125_v31  ;;  %v1622_v43 = vunpack.c.l.b16 %v5739_v32  ;;  %v4789_v31 = vld.sshfl [vmem:[%s5525_s15 + $0x4] sm:$0x2 pattern:$0x76325410] }
 0x201   : > { %5196 = vpow2.f32 %v866_v10  ;;  %v986_v10 = vpack.c.b16 %v985_v9, %v985_v9  ;;  %v1217_v29 = vsel %vm711_vm4, %v1216_v47, %v1215_v52  ;;  %v1626_v28 = vrot.slane %v1618_v49, 2 }
 0x202   : > { %v1627_v60 = vrot.slane %v1619_v50, 1  ;;  %v1220_v9 = vrot.slane %v795_v41, 4  ;;  %v1532_v57 = vunpack.c.l.b16 %v4788_v25  ;;  %v1129_v59 = vrot.slane %v699_v1, 6 }
 0x203   : > { %v992_v18 = vsel %vm990_vm10, %v986_v10, 0  ;;  %v1128_v52 = vsel %vm708_vm3, %v1127_v58, %v1126_v39  ;;  %v2040_v33 = vrot.slane %v1618_v49, 3  ;;  %v1632_v48 = vrot.slane %v1622_v43, 6 }
 0x204   : > { %5020 = vmatpush3.bf16.msra.mxu1 %v992_v18  ;;  %v1219_v18 = vsel %vm714_vm6, %v1218_v26, %v1217_v29  ;;  %v1628_v37 = vsel %vm705_vm2, %v1627_v60, %v1626_v28  ;;  %v5776_v26 = vld.sshfl [vmem:[%s5527_s20 + $0xe] sm:$0x2 pattern:$0x76325410]  ;;  %v2041_v28 = vrot.slane %v1619_v50, 2  ;;  %v1539_v32 = vrot.slane %v1531_v45, 2 }
 0x205   : > { %5025 = vmatprep.subr.bf16.mxu1 %v5329_v27  ;;  %v1221_v46 = vsel %vm717_vm7, %v1220_v9, %v1219_v18  ;;  %v1629_v47 = vsel %vm708_vm3, %v1620_v22, %v1628_v37  ;;  %v1130_v9 = vsel %vm711_vm4, %v1129_v59, %v1128_v52  ;;  %v2043_v49 = vrot.slane %v1620_v22, 1  ;;  %v4791_v18 = vld.sshfl [vmem:[%s5525_s15 + $0x8] sm:$0x2 pattern:$0x76325410] }
 0x206   : > { %v1223_v60 = vsel %vm720_vm8, %v1222_v51, %v1221_v46  ;;  %v1631_v1 = vsel %vm711_vm4, %v1630_v40, %v1629_v47  ;;  %v2042_v5 = vsel %vm705_vm2, %v2041_v28, %v2040_v33  ;;  %v1133_v25 = vrot.slane %v701_v8, 4  ;;  %v4792_v46 = vld.sshfl [vmem:[%s5525_s15 + $0xa] sm:$0x2 pattern:$0x76325410] }
 0x207   : > { %v1225_v50 = vsel %vm723_vm9, %v1224_v54, %v1223_v60  ;;  %v1625_v51 = vunpack.c.l.b16 %v5776_v26  ;;  %v1633_v58 = vsel %vm714_vm6, %v1632_v48, %v1631_v1  ;;  %v1533_v37 = vunpack.c.l.b16 %v4789_v31  ;;  %v4793_v33 = vld.sshfl [vmem:[%s5525_s15 + $0xc] sm:$0x2 pattern:$0x76325410] }
 0x208   : > { %v1226_v39 = vpack.c.b16 %v1225_v50, %v1225_v50  ;;  %v1535_v40 = vunpack.c.l.b16 %v4791_v18  ;;  %v2044_v54 = vsel %vm708_vm3, %v2043_v49, %v2042_v5  ;;  %v1543_v59 = vrot.slane %v1534_v0, 7 }
 0x209   : > { %v1638_v47 = vrot.slane %v1625_v51, 3  ;;  %v2046_v26 = vrot.slane %v1622_v43, 7  ;;  %v1536_v28 = vunpack.c.l.b16 %v4792_v46  ;;  %v2045_v60 = vsel %vm711_vm4, %v1621_v34, %v2044_v54  ;;  %v4794_v34 = vld.sshfl [vmem:[%s5525_s15 + $0xe] sm:$0x2 pattern:$0x76325410] }
 0x20a   : > { %v1954_v48 = vrot.slane %v1532_v57, 2  ;;  %v1231_v7 = vsel %vm604_vm1, %v1226_v39, 0  ;;  %v1545_v61 = vrot.slane %v1535_v40, 6  ;;  %v1137_v43 = vrot.slane %v703_v16, 2 }
 0x20b   : > { %v1547_v50 = vrot.slane %v1536_v28, 5  ;;  %v2050_v16 = vrot.slane %v1624_v38, 5  ;;  %v1538_v18 = vunpack.c.l.b16 %v4794_v34 }
 0x20d   : > { %v1551_v46 = vrot.slane %v1538_v18, 3 }
 0x20e   : > { %v5714_v19 = vpop.eup %5196 }
 0x20f   : > { %887 = vperm.xlu0 %5194, %v5714_v19  }
 0x278   : > { %v871_v35 = vpop.permute.xlu0 %870 }
 0x279   : > { %v873_v10 = vsub.f32 %v5652_v36, %v871_v35  ;;  %v5759_v36 = vld.sshfl [vmem:[%s5527_s20 + $0xa] sm:$0x2 pattern:$0x76325410]  ;;  %v1540_v35 = vrot.slane %v1532_v57, 1  ;;  %v2047_v57 = vsel %vm714_vm6, %v2046_v26, %v2045_v60 }
 0x27a   : > { %v1623_v29 = vunpack.c.l.b16 %v5759_v36  ;;  %v1636_v36 = vrot.slane %v1624_v38, 4 }
 0x27b   : > { %v874_v41 = vmul.f32 1.442695, %v873_v10  ;;  %v1541_v22 = vsel %vm705_vm2, %v1540_v35, %v1539_v32 }
 0x27c   : > { %v1634_v10 = vrot.slane %v1623_v29, 5  ;;  %v1542_v52 = vsel %vm708_vm3, %v1533_v37, %v1541_v22  ;;  %v2048_v35 = vrot.slane %v1623_v29, 6  ;;  %v2052_v22 = vrot.slane %v1625_v51, 4 }
 0x27d   : > { %5198 = vpow2.f32 %v874_v41  ;;  %v1132_v41 = vsel %vm714_vm6, %v1131_v44, %v1130_v9  ;;  %v1953_v44 = vrot.slane %v1531_v45, 3  ;;  %v1544_v32 = vsel %vm711_vm4, %v1543_v59, %v1542_v52 }
 0x27e   : > { %v1635_v8 = vsel %vm717_vm7, %v1634_v10, %v1633_v58  ;;  %v1134_v62 = vsel %vm717_vm7, %v1133_v25, %v1132_v41  ;;  %v1537_v45 = vunpack.c.l.b16 %v4793_v33  ;;  %v1956_v9 = vrot.slane %v1533_v37, 1 }
 0x27f   : > { %v1637_v13 = vsel %vm720_vm8, %v1636_v36, %v1635_v8  ;;  %v1136_v31 = vsel %vm720_vm8, %v1135_v4, %v1134_v62  ;;  %v1955_v10 = vsel %vm705_vm2, %v1954_v48, %v1953_v44  ;;  %v1546_v12 = vsel %vm714_vm6, %v1545_v61, %v1544_v32 }
 0x280   : > { %v1639_v49 = vsel %vm723_vm9, %v1638_v47, %v1637_v13  ;;  %v1138_v29 = vsel %vm723_vm9, %v1137_v43, %v1136_v31  ;;  %v2049_v5 = vsel %vm717_vm7, %v2048_v35, %v2047_v57  ;;  %v1549_v58 = vrot.slane %v1537_v45, 4 }
 0x281   : > { %v1640_v25 = vpack.c.b16 %v1639_v49, %v1639_v49  ;;  %v1957_v37 = vsel %vm708_vm3, %v1956_v9, %v1955_v10  ;;  %v1548_v41 = vsel %vm717_vm7, %v1547_v50, %v1546_v12  ;;  %v1139_v39 = vpack.c.b16 %v1138_v29, %v1138_v29 }
 0x282   : > { %v2051_v38 = vsel %vm720_vm8, %v2050_v16, %v2049_v5  ;;  %v1959_v36 = vrot.slane %v1535_v40, 7  ;;  %v1958_v54 = vsel %vm711_vm4, %v1534_v0, %v1957_v37  ;;  %v1550_v8 = vsel %vm720_vm8, %v1549_v58, %v1548_v41  ;;  %v1274_v41 = vld [vmem:[#allocation2 + $0x8] sm:$0xff] }
 0x283   : > { %v1645_v4 = vsel %vm604_vm1, %v1640_v25, 0  ;;  %v2053_v59 = vsel %vm723_vm9, %v2052_v22, %v2051_v38  ;;  %v1961_v62 = vrot.slane %v1536_v28, 6  ;;  %v1552_v51 = vsel %vm723_vm9, %v1551_v46, %v1550_v8  ;;  %v1688_v46 = vld [vmem:[#allocation2 + $0x10] sm:$0xff] }
 0x284   : > { %v1960_v47 = vsel %vm714_vm6, %v1959_v36, %v1958_v54  ;;  %v2054_v0 = vpack.c.b16 %v2053_v59, %v2053_v59  ;;  %v1963_v40 = vrot.slane %v1537_v45, 5  ;;  %v1553_v26 = vpack.c.b16 %v1552_v51, %v1552_v51 }
 0x285   : > { %v1962_v52 = vsel %vm717_vm7, %v1961_v62, %v1960_v47  ;;  %v1965_v33 = vrot.slane %v1538_v18, 4  ;;  %v1387_v38 = vrot.slane %v964_v6, 1  ;;  %v1389_v36 = vrot.slane %v966_v2, 7  ;;  %v5890_v47 = vld [vmem:[#allocation2 + $0x18] sm:$0xff] }
 0x286   : > { %v2059_v28 = vsel %vm604_vm1, %v2054_v0, 0  ;;  %v1964_v60 = vsel %vm720_vm8, %v1963_v40, %v1962_v52  ;;  %v1393_v59 = vrot.slane %v968_v17, 5 }
 0x287   : > { %v1966_v44 = vsel %vm723_vm9, %v1965_v33, %v1964_v60  ;;  %v1388_v54 = vsel %vm705_vm2, %v965_v56, %v1387_v38  ;;  %v4804_v33 = vld.sshfl [vmem:[%s5529_s17] sm:$0x2 pattern:$0x76325410] }
 0x288   : > { %v1967_v48 = vpack.c.b16 %v1966_v44, %v1966_v44  ;;  %v1390_v8 = vsel %vm708_vm3, %v1389_v36, %v1388_v54  ;;  %v1793_v60 = vunpack.c.l.b16 %v4804_v33 }
 0x28a   : > { %v5812_v1 = vpop.eup %5198  ;;  %v888_v13 = vpop.permute.xlu0 %887 }
 0x28b   : > { %v891_v30 = vpack.c.bf16 %v5812_v1, %v5812_v1  ;;  %v878_v52 = vsel %vm604_vm1, %v5812_v1, 0.0 }
 0x28d   : > { %5022 = vmatmul.mubr.msk.bf16.vlgmr.msra.gmra.mxu1 %vm604_vm1, %v891_v30 }
 0x28e   : > { %5026 = vmatpush3.bf16.xpose.msra.mxu1 %v1231_v7  ;;  %5027 = vmatprep.mubr.msk.bf16.mxu1 %vm5330_vm5, %v5329_v27  ;;  %v884_v7 = vld [vmem:[#allocation4] sm:$0xff] }
 0x28f   : > { %5037 = vmatprep.subr.bf16.mxu1 %v5329_v27  ;;  %v890_v61 = vmul.f32 %v888_v13, %v884_v7  ;;  %v4806_v7 = vld.sshfl [vmem:[%s5529_s17 + $0x4] sm:$0x2 pattern:$0x76325410]  ;;  %v1801_v13 = vrot.slane %v1793_v60, 2 }
 0x290   : > { %v1795_v1 = vunpack.c.l.b16 %v4806_v7 }
 0x295   : > { %5028 = vmatmul.mubr.msk.bf16.vlgmr.msra.gmra.mxu1 %vm604_vm1, %v1139_v39 }
 0x296   : > { %5038 = vmatpush3.bf16.xpose.msra.mxu1 %v1645_v4  ;;  %5039 = vmatprep.mubr.msk.bf16.mxu1 %vm5330_vm5, %v5329_v27  ;;  %v1391_v4 = vrot.slane %v967_v14, 6 }
 0x297   : > { %5049 = vmatprep.subr.bf16.mxu1 %v5329_v27 }
 0x298   : > { %v1392_v63 = vsel %vm711_vm4, %v1391_v4, %v1390_v8 }
 0x299   : > { %v1394_v6 = vsel %vm714_vm6, %v1393_v59, %v1392_v63 }
 0x29a   : > { %v1396_v56 = vsel %vm717_vm7, %v1395_v55, %v1394_v6 }
 0x29b   : > { %v1398_v11 = vsel %vm720_vm8, %v1397_v53, %v1396_v56 }
 0x29c   : > { %v1400_v15 = vsel %vm723_vm9, %v1399_v3, %v1398_v11 }
 0x29d   : > { %5040 = vmatmul.mubr.msk.bf16.vlgmr.msra.gmra.mxu1 %vm604_vm1, %v1553_v26  ;;  %v1401_v21 = vpack.c.b16 %v1400_v15, %v1400_v15 }
 0x29e   : > { %5050 = vmatpush3.bf16.xpose.msra.mxu1 %v2059_v28  ;;  %5051 = vmatprep.mubr.msk.bf16.mxu1 %vm5330_vm5, %v5329_v27  ;;  %v4805_v28 = vld.sshfl [vmem:[%s5529_s17 + $0x2] sm:$0x2 pattern:$0x76325410] }
 0x29f   : > { %v1406_v20 = vsel %vm990_vm10, %v1401_v21, 0  ;;  %v1794_v44 = vunpack.c.l.b16 %v4805_v28 }
 0x2a0   : > { %5032 = vmatpush3.bf16.msra.mxu0 %v1406_v20 }
 0x2a1   : > { %5043 = vmatprep.subr.bf16.mxu0 %v5329_v27 }
 0x2a5   : > { %5052 = vmatmul.mubr.msk.bf16.vlgmr.msra.gmra.mxu1 %vm604_vm1, %v1967_v48  ;;  %v4807_v48 = vld.sshfl [vmem:[%s5529_s17 + $0x6] sm:$0x2 pattern:$0x76325410] }
 0x34d   : > { %v1028_v31 = vpop.f32.mrf.mxu1 }
 0x34e   : > { %v1034_v43 = vadd.f32 %v1028_v31, %v890_v61  ;;  %v1802_v61 = vrot.slane %v1794_v44, 1  ;;  %v4808_v31 = vld.sshfl [vmem:[%s5529_s17 + $0x8] sm:$0x2 pattern:$0x76325410] }
 0x34f   : > { %v5023_v32 = vpop.f32.mrf.mxu1 }
 0x350   : > { %1035 = vst.msk [vmem:[#allocation4] sm:$0xff] %vm604_vm1, %v1034_v43  ;;  %v1796_v43 = vunpack.c.l.b16 %v4807_v48  ;;  %v1803_v32 = vsel %vm705_vm2, %v1802_v61, %v1801_v13 }
 0x351   : > { %v1031_v35 = vpop.f32.mrf.mxu1 }
 0x352   : > { %v4809_v35 = vld.sshfl [vmem:[%s5529_s17 + $0xa] sm:$0x2 pattern:$0x76325410] }
 0x353   : > { %v5024_v30 = vpop.f32.mrf.mxu1 }
 0x354   : > { %v1797_v30 = vunpack.c.l.b16 %v4808_v31 }
 0x355   : > { %v5853_v34 = vpop.f32.mrf.mxu1 }
 0x356   : > { %v1275_v45 = vsel %vm604_vm1, %v5853_v34, -inf  ;;  %v2221_v59 = vrot.slane %v1797_v30, 7 }
 0x357   : > { %1276 = vmax.xlane.f32.xlu1 %v1275_v45  ;;  %v5029_v57 = vpop.f32.mrf.mxu1  ;;  %v1805_v45 = vrot.slane %v1796_v43, 7 }
 0x358   : > { %v1804_v57 = vsel %vm708_vm3, %v1795_v1, %v1803_v32  ;;  %v876_v32 = vld [vmem:[#allocation3] sm:$0xff] }
 0x359   : > { %v1270_v9 = vpop.f32.mrf.mxu1 }
 0x35a   : > { %v4810_v9 = vld.sshfl [vmem:[%s5529_s17 + $0xc] sm:$0x2 pattern:$0x76325410] }
 0x35b   : > { %v5030_v49 = vpop.f32.mrf.mxu1 }
 0x35c   : > { %v1798_v49 = vunpack.c.l.b16 %v4809_v35  ;;  %v877_v35 = vmul.f32 %v5714_v19, %v876_v32 }
 0x35d   : > { %v5857_v50 = vpop.f32.mrf.mxu1 }
 0x35e   : > { %v1689_v10 = vsel %vm604_vm1, %v5857_v50, -inf  ;;  %v2223_v6 = vrot.slane %v1798_v49, 6 }
 0x35f   : > { %1690 = vmax.xlane.f32.xlu1 %v1689_v10  ;;  %v5041_v12 = vpop.f32.mrf.mxu1  ;;  %v2215_v10 = vrot.slane %v1793_v60, 3 }
 0x360   : > { %v2216_v12 = vrot.slane %v1794_v44, 2 }
 0x361   : > { %v1684_v16 = vpop.f32.mrf.mxu1 }
 0x362   : > { %v1807_v16 = vrot.slane %v1797_v30, 6 }
 0x363   : > { %v5042_v29 = vpop.f32.mrf.mxu1 }
 0x365   : > { %v5861_v18 = vpop.f32.mrf.mxu1 }
 0x366   : > { %v2103_v5 = vsel %vm604_vm1, %v5861_v18, -inf }
 0x367   : > { %2104 = vmax.xlane.f32.xlu1 %v2103_v5  ;;  %v5053_v25 = vpop.f32.mrf.mxu1  ;;  %v1806_v5 = vsel %vm711_vm4, %v1805_v45, %v1804_v57 }
 0x368   : > { %v1808_v36 = vsel %vm714_vm6, %v1807_v16, %v1806_v5  ;;  %v2119_v16 = vld [vmem:[#allocation3 + $0x18] sm:$0xff] }
 0x369   : > { %v2098_v58 = vpop.f32.mrf.mxu1 }
 0x36a   : > { %v4811_v58 = vld.sshfl [vmem:[%s5529_s17 + $0xe] sm:$0x2 pattern:$0x76325410] }
 0x36b   : > { %v5054_v37 = vpop.f32.mrf.mxu1 }
 0x36c   : > { %v1799_v37 = vunpack.c.l.b16 %v4810_v9  ;;  %v1705_v9 = vld [vmem:[#allocation3 + $0x10] sm:$0xff] }
 0x36e   : > { %v1811_v54 = vrot.slane %v1799_v37, 4 }
 0x3e0   : > { %v1277_v22 = vpop.xlane.xlu1 %1276 }
 0x3e1   : > { %v1278_v39 = vmax.f32 %v1274_v41, %v1277_v22  ;;  %v1809_v22 = vrot.slane %v1798_v49, 5 }
 0x3e3   : > { %1450 = vst.msk [vmem:[#allocation2 + $0x8] sm:$0xff] %vm595_vm0, %v1278_v39  ;;  %1284 = vperm.xlu1 %5195, %v1278_v39   ;;  %v1279_v0 = vsub.f32 %v1274_v41, %v1278_v39  ;;  %v2218_v41 = vrot.slane %v1795_v1, 1  ;;  %v2217_v39 = vsel %vm705_vm2, %v2216_v12, %v2215_v10  ;;  %v1810_v8 = vsel %vm717_vm7, %v1809_v22, %v1808_v36 }
 0x3e5   : > { %v1280_v40 = vmul.f32 1.442695, %v1279_v0  ;;  %v2219_v4 = vsel %vm708_vm3, %v2218_v41, %v2217_v39  ;;  %v1713_v39 = vld [vmem:[#allocation4 + $0x10] sm:$0xff] }
 0x3e8   : > { %v1691_v62 = vpop.xlane.xlu1 %1690 }
 0x3e9   : > { %v1692_v2 = vmax.f32 %v1688_v46, %v1691_v62 }
 0x3eb   : > { %v1693_v14 = vsub.f32 %v1688_v46, %v1692_v2  ;;  %1864 = vst.msk [vmem:[#allocation2 + $0x10] sm:$0xff] %vm595_vm0, %v1692_v2  ;;  %1698 = vperm.xlu1 %5195, %v1692_v2   ;;  %v1800_v46 = vunpack.c.l.b16 %v4811_v58  ;;  %v1812_v2 = vsel %vm720_vm8, %v1811_v54, %v1810_v8  ;;  %v1299_v58 = vld [vmem:[#allocation4 + $0x8] sm:$0xff]  ;;  %v2127_v8 = vld [vmem:[#allocation4 + $0x18] sm:$0xff] }
 0x3ed   : > { %v1694_v17 = vmul.f32 1.442695, %v1693_v14  ;;  %v1813_v63 = vrot.slane %v1800_v46, 3  ;;  %v2225_v14 = vrot.slane %v1799_v37, 5  ;;  %v2227_v21 = vrot.slane %v1800_v46, 4 }
 0x3ef   : > { %5200 = vpow2.f32 %v1694_v17  ;;  %v1814_v3 = vsel %vm723_vm9, %v1813_v63, %v1812_v2 }
 0x3f0   : > { %v2105_v24 = vpop.xlane.xlu1 %2104  ;;  %5202 = vpow2.f32 %v1280_v40  ;;  %v1815_v15 = vpack.c.b16 %v1814_v3, %v1814_v3 }
 0x3f1   : > { %v5894_v23 = vmax.f32 %v5890_v47, %v2105_v24 }
 0x3f2   : > { %v1820_v33 = vsel %vm990_vm10, %v1815_v15, 0 }
 0x3f3   : > { %v2107_v42 = vsub.f32 %v5890_v47, %v5894_v23  ;;  %2278 = vst.msk [vmem:[#allocation2 + $0x18] sm:$0xff] %vm595_vm0, %v5894_v23  ;;  %2112 = vperm.xlu1 %5195, %v5894_v23   ;;  %v1291_v47 = vld [vmem:[#allocation3 + $0x8] sm:$0xff] }
 0x3f5   : > { %v2108_v13 = vmul.f32 1.442695, %v2107_v42 }
 0x3fc   : > { %v5902_v51 = vpop.eup %5200 }
 0x3fd   : > { %1716 = vperm.xlu0 %5194, %v5902_v51   ;;  %v5907_v26 = vpop.eup %5202  ;;  %v1706_v49 = vmul.f32 %v5902_v51, %v1705_v9 }
 0x3fe   : > { %v1292_v23 = vmul.f32 %v5907_v26, %v1291_v47 }
 0x417   : > { %879 = vadd.xlane.f32.xlu1 %v878_v52 }
 0x428   : > { %1302 = vperm.xlu1 %5195, %v5907_v26  }
 0x45e   : > { %v1285_v29 = vpop.permute.xlu1 %1284 }
 0x45f   : > { %v1287_v25 = vsub.f32 %v5853_v34, %v1285_v29  ;;  %v2220_v34 = vsel %vm711_vm4, %v1796_v43, %v2219_v4 }
 0x460   : > { %v2222_v56 = vsel %vm714_vm6, %v2221_v59, %v2220_v34 }
 0x461   : > { %v1288_v38 = vmul.f32 1.442695, %v1287_v25  ;;  %v2224_v11 = vsel %vm717_vm7, %v2223_v6, %v2222_v56 }
 0x462   : > { %v2226_v24 = vsel %vm720_vm8, %v2225_v14, %v2224_v11 }
 0x463   : > { %5204 = vpow2.f32 %v1288_v38  ;;  %v2228_v28 = vsel %vm723_vm9, %v2227_v21, %v2226_v24 }
 0x466   : > { %v1699_v62 = vpop.permute.xlu1 %1698 }
 0x467   : > { %v1701_v55 = vsub.f32 %v5857_v50, %v1699_v62 }
 0x469   : > { %v1702_v53 = vmul.f32 1.442695, %v1701_v55 }
 0x46b   : > { %5206 = vpow2.f32 %v1702_v53 }
 0x46e   : > { %v2113_v17 = vpop.permute.xlu1 %2112 }
 0x46f   : > { %v2115_v20 = vsub.f32 %v5861_v18, %v2113_v17  ;;  %v2229_v18 = vpack.c.b16 %v2228_v28, %v2228_v28 }
 0x470   : > { %v5205_v50 = vpop.eup %5204 }
 0x471   : > { %v2116_v0 = vmul.f32 1.442695, %v2115_v20  ;;  %v1293_v40 = vsel %vm604_vm1, %v5205_v50, 0.0  ;;  %v1306_v52 = vpack.c.bf16 %v5205_v50, %v5205_v50  ;;  %v2234_v7 = vsel %vm990_vm10, %v2229_v18, 0 }
 0x472   : > { %1294 = vadd.xlane.f32.xlu0 %v1293_v40 }
 0x473   : > { %5208 = vpow2.f32 %v2116_v0  ;;  %5034 = vmatmul.mubr.msk.bf16.vlgmr.msra.gmra.mxu0 %vm604_vm1, %v1306_v52 }
 0x474   : > { %5044 = vmatpush3.bf16.msra.mxu0 %v1820_v33  ;;  %5045 = vmatprep.mubr.msk.bf16.mxu0 %vm5330_vm5, %v5329_v27  ;;  %5210 = vpow2.f32 %v2108_v13 }
 0x475   : > { %5055 = vmatprep.subr.bf16.mxu0 %v5329_v27 }
 0x478   : > { %v5207_v60 = vpop.eup %5206 }
 0x479   : > { %v1707_v44 = vsel %vm604_vm1, %v5207_v60, 0.0  ;;  %v1720_v48 = vpack.c.bf16 %v5207_v60, %v5207_v60 }
 0x47a   : > { %1708 = vadd.xlane.f32.xlu0 %v1707_v44 }
 0x47b   : > { %5046 = vmatmul.mubr.msk.bf16.vlgmr.msra.gmra.mxu0 %vm604_vm1, %v1720_v48 }
 0x47c   : > { %5056 = vmatpush3.bf16.msra.mxu0 %v2234_v7  ;;  %5057 = vmatprep.mubr.msk.bf16.mxu0 %vm5330_vm5, %v5329_v27  ;;  %v1717_v27 = vpop.permute.xlu0 %1716 }
 0x47d   : > { %v1719_v36 = vmul.f32 %v1717_v27, %v1713_v39 }
 0x480   : > { %v5209_v61 = vpop.eup %5208 }
 0x481   : > { %v2121_v31 = vsel %vm604_vm1, %v5209_v61, 0.0  ;;  %v2134_v43 = vpack.c.bf16 %v5209_v61, %v5209_v61  ;;  %v5211_v1 = vpop.eup %5210 }
 0x482   : > { %2122 = vadd.xlane.f32.xlu1 %v2121_v31  ;;  %v2120_v29 = vmul.f32 %v5211_v1, %v2119_v16 }
 0x483   : > { %5058 = vmatmul.mubr.msk.bf16.vlgmr.msra.gmra.mxu0 %vm604_vm1, %v2134_v43 }
 0x490   : > { %2130 = vperm.xlu0 %5194, %v5211_v1  }
 0x4a0   : > { %v880_v30 = vpop.xlane.xlu1 %879 }
 0x4a1   : > { %v881_v45 = vadd.f32 %v880_v30, %v877_v35 }
 0x4a3   : > { %883 = vst.msk [vmem:[#allocation3] sm:$0xff] %vm595_vm0, %v881_v45 }
 0x4a4   : > { %v1303_v19 = vpop.permute.xlu1 %1302 }
 0x4a5   : > { %v1305_v26 = vmul.f32 %v1303_v19, %v1299_v58 }
 0x4fb   : > { %v1295_v42 = vpop.xlane.xlu0 %1294 }
 0x4fc   : > { %v1296_v57 = vadd.f32 %v1295_v42, %v1292_v23 }
 0x4fe   : > { %1297 = vst.msk [vmem:[#allocation3 + $0x8] sm:$0xff] %vm595_vm0, %v1296_v57 }
 0x503   : > { %v1709_v10 = vpop.xlane.xlu0 %1708 }
 0x504   : > { %v1710_v12 = vadd.f32 %v1709_v10, %v1706_v49 }
 0x506   : > { %1711 = vst.msk [vmem:[#allocation3 + $0x10] sm:$0xff] %vm595_vm0, %v1710_v12 }
 0x50b   : > { %v2123_v5 = vpop.xlane.xlu1 %2122  ;;  %v2131_v59 = vpop.permute.xlu0 %2130 }
 0x50c   : > { %v2124_v25 = vadd.f32 %v2123_v5, %v2120_v29  ;;  %v2133_v34 = vmul.f32 %v2131_v59, %v2127_v8 }
 0x50e   : > { %2125 = vst.msk [vmem:[#allocation3 + $0x18] sm:$0xff] %vm595_vm0, %v2124_v25 }
 0x533   : > { %v1442_v37 = vpop.f32.mrf.mxu0 }
 0x534   : > { %v1448_v41 = vadd.f32 %v1442_v37, %v1305_v26 }
 0x535   : > { %v5035_v22 = vpop.f32.mrf.mxu0 }
 0x536   : > { %1449 = vst.msk [vmem:[#allocation4 + $0x8] sm:$0xff] %vm604_vm1, %v1448_v41 }
 0x537   : > { %v1445_v51 = vpop.f32.mrf.mxu0 }
 0x539   : > { %v5036_v38 = vpop.f32.mrf.mxu0 }
 0x53b   : > { %v1856_v46 = vpop.f32.mrf.mxu0 }
 0x53c   : > { %v1862_v54 = vadd.f32 %v1856_v46, %v1719_v36 }
 0x53d   : > { %v5047_v4 = vpop.f32.mrf.mxu0 }
 0x53e   : > { %1863 = vst.msk [vmem:[#allocation4 + $0x10] sm:$0xff] %vm604_vm1, %v1862_v54 }
 0x53f   : > { %v1859_v62 = vpop.f32.mrf.mxu0 }
 0x541   : > { %v5048_v63 = vpop.f32.mrf.mxu0 }
 0x543   : > { %v2270_v55 = vpop.f32.mrf.mxu0 }
 0x544   : > { %v2276_v2 = vadd.f32 %v2270_v55, %v2133_v34 }
 0x545   : > { %v5059_v6 = vpop.f32.mrf.mxu0 }
 0x546   : > { %2277 = vst.msk [vmem:[#allocation4 + $0x18] sm:$0xff] %vm604_vm1, %v2276_v2 }
 0x547   : > { %v2273_v53 = vpop.f32.mrf.mxu0 }
 0x549   : > { %v5060_v56 = vpop.f32.mrf.mxu0 }
 0x54a PF: > { %p4839_p9 = scmp.lt.s32.totalorder %s5513_s10, 8 }
 0x54c   : > { %p2280_p10 = pnand %p4839_p9, %p4733_p5 }
 0x54e   : > { %2283 = sbr.rel (%p2280_p10) target bundleno = 2567 (0xa07), region = 167 }
 0x553   : > { %v5965_v3 = vld.sshfl [vmem:[%s5527_s20] sm:$0x1 pattern:$0x76325410]  ;;  %v5332_v14 = vmov 0.0   ;;  %vm2379_vm11 = vcmask 1041409  }
 0x554   : > { %5061 = vmatprep.subr.bf16.mxu0 %v5332_v14  ;;  %v5969_v11 = vld.sshfl [vmem:[%s5527_s20 + $0x2] sm:$0x1 pattern:$0x76325410]  ;;  %5067 = vmatprep.subr.bf16.mxu1 %v5332_v14  ;;  %v2464_v17 = vunpack.c.l.b16 %v5965_v3  ;;  %vm2382_vm12 = vcmask 1042434   ;;  %vm2385_vm13 = vcmask 1043459  }
 0x555   : > { %v5973_v15 = vld.sshfl [vmem:[%s5527_s20 + $0x4] sm:$0x1 pattern:$0x76325410]  ;;  %v2465_v21 = vunpack.c.l.b16 %v5969_v11  ;;  %vm5333_vm14 = vmmov 0   ;;  %vm2388_vm15 = vcmask 1044484  }
 0x556   : > { %v5978_v20 = vld.sshfl [vmem:[%s5527_s20 + $0x6] sm:$0x1 pattern:$0x76325410]  ;;  %v2466_v24 = vunpack.c.l.b16 %v5973_v15  ;;  %5063 = vmatprep.mubr.msk.bf16.mxu0 %vm5333_vm14, %v5332_v14  ;;  %5069 = vmatprep.mubr.msk.bf16.mxu1 %vm5333_vm14, %v5332_v14  ;;  %vm2391_vm2 = vcmask 1045509   ;;  %vm2394_vm3 = vcmask 1046534  }
 0x557   : > { %v5982_v50 = vld.sshfl [vmem:[%s5527_s20 + $0x8] sm:$0x1 pattern:$0x76325410]  ;;  %v2467_v0 = vunpack.c.l.b16 %v5978_v20  ;;  %v2472_v40 = vrot.slane %v2465_v21, 7  ;;  %vm2397_vm4 = vcmask 1047559  }
 0x558   : > { %v5988_v52 = vld.sshfl [vmem:[%s5527_s20 + $0xa] sm:$0x1 pattern:$0x76325410]  ;;  %v2468_v33 = vunpack.c.l.b16 %v5982_v50  ;;  %v2474_v28 = vrot.slane %v2466_v24, 6  ;;  %vm2667_vm6 = vcmask 1043456  }
 0x559   : > { %v5998_v18 = vld.sshfl [vmem:[%s5527_s20 + $0xc] sm:$0x1 pattern:$0x76325410]  ;;  %v2469_v60 = vunpack.c.l.b16 %v5988_v52  ;;  %v2473_v44 = vsel %vm2379_vm11, %v2472_v40, %v2464_v17  ;;  %v2476_v48 = vrot.slane %v2467_v0, 5  ;;  %v2284_v40 = vlaneseq }
 0x55a   : > { %v6007_v7 = vld.sshfl [vmem:[%s5527_s20 + $0xe] sm:$0x1 pattern:$0x76325410]  ;;  %v2470_v13 = vunpack.c.l.b16 %v5998_v18  ;;  %v2475_v61 = vsel %vm2382_vm12, %v2474_v28, %v2473_v44  ;;  %v2478_v31 = vrot.slane %v2468_v33, 4  ;;  %v2288_v44 = vstv %s5513_s10 }
 0x55b   : > { %v2471_v43 = vunpack.c.l.b16 %v6007_v7  ;;  %v2477_v1 = vsel %vm2385_vm13, %v2476_v48, %v2475_v61  ;;  %v2480_v32 = vrot.slane %v2469_v60, 3  ;;  %v6018_v35 = vld.sshfl [vmem:[%s5525_s15] sm:$0x1 pattern:$0x76325410]  ;;  %v2285_v28 = vand.u32 127, %v2284_v40 }
 0x55c   : > { %v2479_v30 = vsel %vm2388_vm15, %v2478_v31, %v2477_v1  ;;  %v2482_v45 = vrot.slane %v2470_v13, 2  ;;  %v6024_v27 = vld.sshfl [vmem:[%s5525_s15 + $0x2] sm:$0x1 pattern:$0x76325410]  ;;  %v2370_v57 = vunpack.c.l.b16 %v6018_v35  ;;  %v2895_v3 = vrot.slane %v2468_v33, 5 }
 0x55d   : > { %v2481_v47 = vsel %vm2391_vm2, %v2480_v32, %v2479_v30  ;;  %v2484_v23 = vrot.slane %v2471_v43, 1  ;;  %v6030_v42 = vld.sshfl [vmem:[%s5525_s15 + $0x4] sm:$0x1 pattern:$0x76325410]  ;;  %v2371_v9 = vunpack.c.l.b16 %v6024_v27  ;;  %vm6086_vm5 = vcmp.ge.s32.totalorder %v2285_v28, %v2288_v44 }
 0x55e   : > { %v2483_v49 = vsel %vm2394_vm3, %v2482_v45, %v2481_v47  ;;  %v6036_v10 = vld.sshfl [vmem:[%s5525_s15 + $0x6] sm:$0x1 pattern:$0x76325410]  ;;  %v2372_v12 = vunpack.c.l.b16 %v6030_v42  ;;  %v5334_v47 = vmov 0   ;;  %v2899_v35 = vrot.slane %v2470_v13, 3 }
 0x55f   : > { %v2485_v19 = vsel %vm2397_vm4, %v2484_v23, %v2483_v49  ;;  %v6041_v16 = vld.sshfl [vmem:[%s5525_s15 + $0x8] sm:$0x1 pattern:$0x76325410]  ;;  %v2373_v29 = vunpack.c.l.b16 %v6036_v10  ;;  %v2378_v5 = vrot.slane %v2371_v9, 7  ;;  %5212 = vset.pattern.permute.xlu0 %v5334_v47  ;;  %5213 = vset.pattern.permute.xlu1 %v5334_v47  ;;  %v2537_v23 = vld [vmem:[#allocation2] sm:$0xff] }
 0x560   : > { %v2486_v25 = vpack.c.b16 %v2485_v19, %v2485_v19  ;;  %v6047_v58 = vld.sshfl [vmem:[%s5525_s15 + $0xa] sm:$0x1 pattern:$0x76325410]  ;;  %v2374_v26 = vunpack.c.l.b16 %v6041_v16  ;;  %v2381_v37 = vrot.slane %v2372_v12, 6  ;;  %v2901_v27 = vrot.slane %v2471_v43, 2 }
 0x561   : > { %v6053_v41 = vld.sshfl [vmem:[%s5525_s15 + $0xc] sm:$0x1 pattern:$0x76325410]  ;;  %v2375_v22 = vunpack.c.l.b16 %v6047_v58  ;;  %v2380_v39 = vsel %vm2379_vm11, %v2378_v5, %v2370_v57  ;;  %v2384_v51 = vrot.slane %v2373_v29, 5 }
 0x562   : > { %v2492_v38 = vsel %vm604_vm1, %v2486_v25, 0  ;;  %v6063_v36 = vld.sshfl [vmem:[%s5525_s15 + $0xe] sm:$0x1 pattern:$0x76325410]  ;;  %v2376_v46 = vunpack.c.l.b16 %v6053_v41  ;;  %v2383_v54 = vsel %vm2382_vm12, %v2381_v37, %v2380_v39  ;;  %v2387_v4 = vrot.slane %v2374_v26, 4 }
 0x563   : > { %5062 = vmatpush3.bf16.xpose.msra.mxu0 %v2492_v38  ;;  %v2377_v8 = vunpack.c.l.b16 %v6063_v36  ;;  %v2386_v59 = vsel %vm2385_vm13, %v2384_v51, %v2383_v54  ;;  %v2390_v62 = vrot.slane %v2375_v22, 3  ;;  %v6097_v5 = vld.sshfl [vmem:[%s5529_s17 + $0x2] sm:$0x1 pattern:$0x76325410]  ;;  %v2808_v7 = vrot.slane %v2374_v26, 5 }
 0x564   : > { %v2389_v63 = vsel %vm2388_vm15, %v2387_v4, %v2386_v59  ;;  %v2393_v34 = vrot.slane %v2376_v46, 2  ;;  %5079 = vmatprep.subr.bf16.mxu0 %v5332_v14  ;;  %v6100_v25 = vld.sshfl [vmem:[%s5529_s17 + $0x4] sm:$0x1 pattern:$0x76325410]  ;;  %v2642_v37 = vunpack.c.l.b16 %v6097_v5  ;;  %v2812_v58 = vrot.slane %v2376_v46, 3 }
 0x565   : > { %v2392_v55 = vsel %vm2391_vm2, %v2390_v62, %v2389_v63  ;;  %v2396_v2 = vrot.slane %v2377_v8, 1  ;;  %v6105_v51 = vld.sshfl [vmem:[%s5529_s17] sm:$0x1 pattern:$0x76325410]  ;;  %v2643_v38 = vunpack.c.l.b16 %v6100_v25 }
 0x566   : > { %v2395_v6 = vsel %vm2394_vm3, %v2393_v34, %v2392_v55  ;;  %v6109_v54 = vld.sshfl [vmem:[%s5529_s17 + $0x6] sm:$0x1 pattern:$0x76325410]  ;;  %v2641_v4 = vunpack.c.l.b16 %v6105_v51  ;;  %v2649_v59 = vrot.slane %v2642_v37, 7 }
 0x567   : > { %v2398_v53 = vsel %vm2397_vm4, %v2396_v2, %v2395_v6  ;;  %v6115_v63 = vld.sshfl [vmem:[%s5529_s17 + $0x8] sm:$0x1 pattern:$0x76325410]  ;;  %v2644_v34 = vunpack.c.l.b16 %v6109_v54  ;;  %v3067_v48 = vrot.slane %v2643_v38, 7 }
 0x568   : > { %v2399_v56 = vpack.c.b16 %v2398_v53, %v2398_v53  ;;  %v6119_v55 = vld.sshfl [vmem:[%s5529_s17 + $0xa] sm:$0x1 pattern:$0x76325410]  ;;  %v2645_v2 = vunpack.c.l.b16 %v6115_v63  ;;  %v2650_v6 = vsel %vm2379_vm11, %v2649_v59, %v2641_v4  ;;  %v2651_v53 = vrot.slane %v2643_v38, 6 }
 0x569   : > { %v2646_v40 = vunpack.c.l.b16 %v6119_v55  ;;  %v2653_v28 = vrot.slane %v2644_v34, 5  ;;  %v6134_v44 = vld.sshfl [vmem:[%s5529_s17 + $0xe] sm:$0x1 pattern:$0x76325410] }
 0x56a   : > { %5064 = vmatmul.mubr.msk.bf16.vlgmr.msra.gmra.mxu0 %vm604_vm1, %v2399_v56  ;;  %v6128_v56 = vld.sshfl [vmem:[%s5529_s17 + $0xc] sm:$0x1 pattern:$0x76325410] }
 0x56b   : > { %5081 = vmatprep.mubr.msk.bf16.mxu0 %vm5333_vm14, %v5332_v14  ;;  %v2657_v47 = vrot.slane %v2646_v40, 3  ;;  %v6179_v20 = vld.sshfl [vmem:[%s5527_s20 + $0x8] sm:$0x2 pattern:$0x76325410]  ;;  %v3073_v25 = vrot.slane %v2646_v40, 4 }
 0x56c   : > { %v6185_v33 = vld.sshfl [vmem:[%s5525_s15] sm:$0x2 pattern:$0x76325410] }
 0x56d   : > { %v3209_v13 = vunpack.c.l.b16 %v6185_v33  ;;  %v6223_v10 = vld.sshfl [vmem:[%s5525_s15 + $0x6] sm:$0x2 pattern:$0x76325410] }
 0x56e   : > { %v3212_v16 = vunpack.c.l.b16 %v6223_v10 }
 0x62a   : > { %v2528_v61 = vpop.f32.mrf.mxu0 }
 0x62b   : > { %v6092_v31 = vsel %vm6086_vm5, -1e+30, %v2528_v61  ;;  %v2647_v61 = vunpack.c.l.b16 %v6128_v56 }
 0x62c   : > { %v5065_v1 = vpop.f32.mrf.mxu0  ;;  %v2538_v32 = vsel %vm604_vm1, %v6092_v31, -inf }
 0x62d   : > { %2539 = vmax.xlane.f32.xlu0 %v2538_v32  ;;  %v2652_v1 = vsel %vm2382_vm12, %v2651_v53, %v2650_v6  ;;  %v2655_v32 = vrot.slane %v2645_v2, 4  ;;  %v3075_v5 = vrot.slane %v2647_v61, 3 }
 0x62e   : > { %v2531_v30 = vpop.f32.mrf.mxu0 }
 0x62f   : > { %v2648_v30 = vunpack.c.l.b16 %v6134_v44 }
 0x630   : > { %v5066_v45 = vpop.f32.mrf.mxu0 }
 0x631   : > { %v2654_v45 = vsel %vm2385_vm13, %v2653_v28, %v2652_v1  ;;  %v2889_v1 = vrot.slane %v2464_v17, 1  ;;  %v6172_v17 = vld.sshfl [vmem:[%s5527_s20 + $0x6] sm:$0x2 pattern:$0x76325410]  ;;  %v3077_v54 = vrot.slane %v2648_v30, 2 }
 0x632   : > { %v3299_v50 = vunpack.c.l.b16 %v6172_v17 }
 0x634   : > { %v3308_v18 = vrot.slane %v3299_v50, 7 }
 0x6b6   : > { %v2540_v49 = vpop.xlane.xlu0 %2539 }
 0x6b7   : > { %v2541_v19 = vmax.f32 %v2537_v23, %v2540_v49  ;;  %v2659_v49 = vrot.slane %v2647_v61, 2 }
 0x6b9   : > { %v2542_v39 = vsub.f32 %v2537_v23, %v2541_v19  ;;  %2713 = vst.msk [vmem:[#allocation2] sm:$0xff] %vm595_vm0, %v2541_v19  ;;  %2547 = vperm.xlu0 %5212, %v2541_v19   ;;  %v2656_v23 = vsel %vm2388_vm15, %v2655_v32, %v2654_v45  ;;  %v4900_v32 = vld.sshfl [vmem:[%s5527_s20] sm:$0x2 pattern:$0x76325410]  ;;  %v2891_v45 = vrot.slane %v2466_v24, 7 }
 0x6ba   : > { %v2658_v19 = vsel %vm2391_vm2, %v2657_v47, %v2656_v23  ;;  %v4901_v47 = vld.sshfl [vmem:[%s5527_s20 + $0x2] sm:$0x2 pattern:$0x76325410]  ;;  %v2890_v23 = vsel %vm2379_vm11, %v2465_v21, %v2889_v1  ;;  %v2802_v21 = vrot.slane %v2370_v57, 1  ;;  %v2804_v57 = vrot.slane %v2372_v12, 7 }
 0x6bb   : > { %v2543_v62 = vmul.f32 1.442695, %v2542_v39  ;;  %v2661_v39 = vrot.slane %v2648_v30, 1  ;;  %v2660_v59 = vsel %vm2394_vm3, %v2659_v49, %v2658_v19  ;;  %v2893_v49 = vrot.slane %v2467_v0, 6 }
 0x6bc   : > { %v3296_v19 = vunpack.c.l.b16 %v4900_v32  ;;  %v4902_v24 = vld.sshfl [vmem:[%s5527_s20 + $0x4] sm:$0x2 pattern:$0x76325410] }
 0x6bd   : > { %5214 = vpow2.f32 %v2543_v62  ;;  %v2662_v62 = vsel %vm2397_vm4, %v2661_v39, %v2660_v59  ;;  %v3297_v39 = vunpack.c.l.b16 %v4901_v47  ;;  %v2892_v59 = vsel %vm2382_vm12, %v2891_v45, %v2890_v23  ;;  %v4893_v45 = vld.sshfl [vmem:[%s5525_s15 + $0x2] sm:$0x2 pattern:$0x76325410] }
 0x6be   : > { %v2663_v6 = vpack.c.b16 %v2662_v62, %v2662_v62  ;;  %v2894_v15 = vsel %vm2385_vm13, %v2893_v49, %v2892_v59  ;;  %v3304_v11 = vrot.slane %v3296_v19, 2  ;;  %v3298_v32 = vunpack.c.l.b16 %v4902_v24  ;;  %v6211_v12 = vld.sshfl [vmem:[%s5527_s20 + $0xc] sm:$0x2 pattern:$0x76325410] }
 0x6bf   : > { %v3305_v62 = vrot.slane %v3297_v39, 1  ;;  %v2896_v1 = vsel %vm2388_vm15, %v2895_v3, %v2894_v15  ;;  %v2803_v47 = vsel %vm2379_vm11, %v2371_v9, %v2802_v21  ;;  %v3300_v23 = vunpack.c.l.b16 %v6179_v20  ;;  %v6216_v15 = vld.sshfl [vmem:[%s5527_s20 + $0xe] sm:$0x2 pattern:$0x76325410] }
 0x6c0   : > { %v2669_v53 = vsel %vm2667_vm6, %v2663_v6, 0  ;;  %v2897_v6 = vrot.slane %v2469_v60, 4  ;;  %v3210_v42 = vunpack.c.l.b16 %v4893_v45  ;;  %v2806_v9 = vrot.slane %v2373_v29, 6 }
 0x6c1   : > { %5068 = vmatpush3.bf16.msra.mxu1 %v2669_v53  ;;  %v3306_v52 = vsel %vm2379_vm11, %v3305_v62, %v3304_v11  ;;  %v2805_v3 = vsel %vm2382_vm12, %v2804_v57, %v2803_v47  ;;  %v3719_v11 = vrot.slane %v3296_v19, 3  ;;  %v3720_v62 = vrot.slane %v3297_v39, 2  ;;  %v4894_v20 = vld.sshfl [vmem:[%s5525_s15 + $0x4] sm:$0x2 pattern:$0x76325410] }
 0x6c2   : > { %5073 = vmatprep.subr.bf16.mxu1 %v5332_v14  ;;  %v2898_v49 = vsel %vm2391_vm2, %v2897_v6, %v2896_v1  ;;  %v3307_v59 = vsel %vm2382_vm12, %v3298_v32, %v3306_v52  ;;  %v3310_v43 = vrot.slane %v3300_v23, 6  ;;  %v3218_v6 = vrot.slane %v3210_v42, 1  ;;  %v4896_v45 = vld.sshfl [vmem:[%s5525_s15 + $0x8] sm:$0x2 pattern:$0x76325410] }
 0x6c3   : > { %v2900_v21 = vsel %vm2394_vm3, %v2899_v35, %v2898_v49  ;;  %v3309_v29 = vsel %vm2385_vm13, %v3308_v18, %v3307_v59  ;;  %v2807_v33 = vsel %vm2385_vm13, %v2806_v9, %v2805_v3  ;;  %v3722_v19 = vrot.slane %v3298_v32, 1  ;;  %v4897_v18 = vld.sshfl [vmem:[%s5525_s15 + $0xa] sm:$0x2 pattern:$0x76325410] }
 0x6c4   : > { %v2902_v39 = vsel %vm2397_vm4, %v2901_v27, %v2900_v21  ;;  %v3721_v26 = vsel %vm2379_vm11, %v3720_v62, %v3719_v11  ;;  %v2810_v35 = vrot.slane %v2375_v22, 4  ;;  %v3303_v57 = vunpack.c.l.b16 %v6216_v15  ;;  %v4898_v62 = vld.sshfl [vmem:[%s5525_s15 + $0xc] sm:$0x2 pattern:$0x76325410] }
 0x6c5   : > { %v3311_v52 = vsel %vm2388_vm15, %v3310_v43, %v3309_v29  ;;  %v2809_v47 = vsel %vm2388_vm15, %v2808_v7, %v2807_v33  ;;  %v3213_v27 = vunpack.c.l.b16 %v4896_v45  ;;  %v3723_v9 = vsel %vm2382_vm12, %v3722_v19, %v3721_v26 }
 0x6c6   : > { %v2811_v59 = vsel %vm2391_vm2, %v2810_v35, %v2809_v47  ;;  %v3316_v3 = vrot.slane %v3303_v57, 3  ;;  %v3725_v11 = vrot.slane %v3300_v23, 7  ;;  %v3214_v21 = vunpack.c.l.b16 %v4897_v18 }
 0x6c7   : > { %v3724_v7 = vsel %vm2385_vm13, %v3299_v50, %v3723_v9  ;;  %v3632_v43 = vrot.slane %v3209_v13, 3  ;;  %v3633_v10 = vrot.slane %v3210_v42, 2  ;;  %v3223_v29 = vrot.slane %v3213_v27, 6 }
 0x6c8   : > { %v2814_v23 = vrot.slane %v2377_v8, 2  ;;  %v4899_v50 = vld.sshfl [vmem:[%s5525_s15 + $0xe] sm:$0x2 pattern:$0x76325410]  ;;  %v3726_v42 = vsel %vm2388_vm15, %v3725_v11, %v3724_v7  ;;  %v3638_v18 = vrot.slane %v3213_v27, 7 }
 0x6c9   : > { %v3634_v45 = vsel %vm2379_vm11, %v3633_v10, %v3632_v43  ;;  %v3216_v26 = vunpack.c.l.b16 %v4899_v50 }
 0x6ca   : > { %v6154_v28 = vpop.eup %5214 }
 0x6cb   : > { %2564 = vperm.xlu0 %5212, %v6154_v28   ;;  %v3229_v9 = vrot.slane %v3216_v26, 3  ;;  %v3644_v7 = vrot.slane %v3216_v26, 4 }
 0x734   : > { %v2548_v0 = vpop.permute.xlu0 %2547 }
 0x735   : > { %v2550_v53 = vsub.f32 %v6092_v31, %v2548_v0  ;;  %v6199_v31 = vld.sshfl [vmem:[%s5527_s20 + $0xa] sm:$0x2 pattern:$0x76325410]  ;;  %v3217_v0 = vrot.slane %v3209_v13, 2  ;;  %v3215_v13 = vunpack.c.l.b16 %v4898_v62 }
 0x736   : > { %v3301_v24 = vunpack.c.l.b16 %v6199_v31  ;;  %v2903_v31 = vpack.c.b16 %v2902_v39, %v2902_v39 }
 0x737   : > { %v2551_v60 = vmul.f32 1.442695, %v2550_v53  ;;  %v3302_v53 = vunpack.c.l.b16 %v6211_v12  ;;  %v3219_v32 = vsel %vm2379_vm11, %v3218_v6, %v3217_v0  ;;  %v3221_v12 = vrot.slane %v3212_v16, 7 }
 0x738   : > { %v3312_v1 = vrot.slane %v3301_v24, 5  ;;  %v2908_v41 = vsel %vm604_vm1, %v2903_v31, 0  ;;  %v2813_v0 = vsel %vm2394_vm3, %v2812_v58, %v2811_v59  ;;  %v3727_v33 = vrot.slane %v3301_v24, 6 }
 0x739   : > { %5216 = vpow2.f32 %v2551_v60  ;;  %v3211_v60 = vunpack.c.l.b16 %v4894_v20  ;;  %v3314_v49 = vrot.slane %v3302_v53, 4  ;;  %v3729_v8 = vrot.slane %v3302_v53, 5 }
 0x73a   : > { %v3313_v22 = vsel %vm2391_vm2, %v3312_v1, %v3311_v52  ;;  %v3225_v1 = vrot.slane %v3214_v21, 5  ;;  %v2815_v24 = vsel %vm2397_vm4, %v2814_v23, %v2813_v0  ;;  %v3728_v35 = vsel %vm2391_vm2, %v3727_v33, %v3726_v42 }
 0x73b   : > { %v3220_v15 = vsel %vm2382_vm12, %v3211_v60, %v3219_v32  ;;  %v3315_v46 = vsel %vm2394_vm3, %v3314_v49, %v3313_v22  ;;  %v3635_v19 = vrot.slane %v3211_v60, 1  ;;  %v3227_v60 = vrot.slane %v3215_v13, 4 }
 0x73c   : > { %v3222_v6 = vsel %vm2385_vm13, %v3221_v12, %v3220_v15  ;;  %v3317_v39 = vsel %vm2397_vm4, %v3316_v3, %v3315_v46  ;;  %v3731_v31 = vrot.slane %v3303_v57, 4  ;;  %v2816_v49 = vpack.c.b16 %v2815_v24, %v2815_v24  ;;  %v2561_v46 = vld [vmem:[#allocation4] sm:$0xff] }
 0x73d   : > { %v3224_v36 = vsel %vm2388_vm15, %v3223_v29, %v3222_v6  ;;  %v3318_v52 = vpack.c.b16 %v3317_v39, %v3317_v39  ;;  %v3636_v47 = vsel %vm2382_vm12, %v3635_v19, %v3634_v45  ;;  %v3730_v53 = vsel %vm2394_vm3, %v3729_v8, %v3728_v35 }
 0x73e   : > { %v3226_v32 = vsel %vm2391_vm2, %v3225_v1, %v3224_v36  ;;  %v3637_v58 = vsel %vm2385_vm13, %v3212_v16, %v3636_v47  ;;  %v3732_v59 = vsel %vm2397_vm4, %v3731_v31, %v3730_v53  ;;  %v3640_v3 = vrot.slane %v3214_v21, 6 }
 0x73f   : > { %v3323_v22 = vsel %vm604_vm1, %v3318_v52, 0  ;;  %v3228_v12 = vsel %vm2394_vm3, %v3227_v60, %v3226_v32  ;;  %v3639_v15 = vsel %vm2388_vm15, %v3638_v18, %v3637_v58  ;;  %v3733_v16 = vpack.c.b16 %v3732_v59, %v3732_v59  ;;  %v2952_v18 = vld [vmem:[#allocation2 + $0x8] sm:$0xff] }
 0x740   : > { %v3230_v57 = vsel %vm2397_vm4, %v3229_v9, %v3228_v12  ;;  %v3642_v27 = vrot.slane %v3215_v13, 5  ;;  %v3641_v11 = vsel %vm2391_vm2, %v3640_v3, %v3639_v15  ;;  %v3367_v12 = vld [vmem:[#allocation2 + $0x10] sm:$0xff]  ;;  %v3069_v3 = vrot.slane %v2644_v34, 6 }
 0x741   : > { %v3231_v62 = vpack.c.b16 %v3230_v57, %v3230_v57  ;;  %v3738_v21 = vsel %vm604_vm1, %v3733_v16, 0  ;;  %v3071_v57 = vrot.slane %v2645_v2, 5 }
 0x742   : > { %v3643_v43 = vsel %vm2394_vm3, %v3642_v27, %v3641_v11  ;;  %v6336_v27 = vld [vmem:[#allocation2 + $0x18] sm:$0xff] }
 0x743   : > { %v3645_v10 = vsel %vm2397_vm4, %v3644_v7, %v3643_v43 }
 0x746   : > { %v6252_v20 = vpop.eup %5216  ;;  %v2565_v29 = vpop.permute.xlu0 %2564 }
 0x747   : > { %v2568_v17 = vpack.c.bf16 %v6252_v20, %v6252_v20  ;;  %v2567_v0 = vmul.f32 %v2565_v29, %v2561_v46 }
 0x749   : > { %5070 = vmatmul.mubr.msk.bf16.vlgmr.msra.gmra.mxu1 %vm604_vm1, %v2568_v17 }
 0x74a   : > { %5074 = vmatpush3.bf16.xpose.msra.mxu1 %v2908_v41  ;;  %5075 = vmatprep.mubr.msk.bf16.mxu1 %vm5333_vm14, %v5332_v14  ;;  %v3646_v41 = vpack.c.b16 %v3645_v10, %v3645_v10  ;;  %v4909_v10 = vld.sshfl [vmem:[%s5529_s17] sm:$0x2 pattern:$0x76325410] }
 0x74b   : > { %5085 = vmatprep.subr.bf16.mxu1 %v5332_v14  ;;  %v3472_v46 = vunpack.c.l.b16 %v4909_v10 }
 0x751   : > { %5076 = vmatmul.mubr.msk.bf16.vlgmr.msra.gmra.mxu1 %vm604_vm1, %v2816_v49 }
 0x752   : > { %5086 = vmatpush3.bf16.xpose.msra.mxu1 %v3323_v22  ;;  %5087 = vmatprep.mubr.msk.bf16.mxu1 %vm5333_vm14, %v5332_v14  ;;  %v3065_v22 = vrot.slane %v2641_v4, 1 }
 0x753   : > { %5097 = vmatprep.subr.bf16.mxu1 %v5332_v14 }
 0x754   : > { %v3066_v59 = vsel %vm2379_vm11, %v2642_v37, %v3065_v22 }
 0x755   : > { %v3068_v15 = vsel %vm2382_vm12, %v3067_v48, %v3066_v59 }
 0x756   : > { %v3070_v51 = vsel %vm2385_vm13, %v3069_v3, %v3068_v15 }
 0x757   : > { %v3072_v4 = vsel %vm2388_vm15, %v3071_v57, %v3070_v51 }
 0x758   : > { %v3074_v37 = vsel %vm2391_vm2, %v3073_v25, %v3072_v4 }
 0x759   : > { %5088 = vmatmul.mubr.msk.bf16.vlgmr.msra.gmra.mxu1 %vm604_vm1, %v3231_v62  ;;  %v3076_v63 = vsel %vm2394_vm3, %v3075_v5, %v3074_v37 }
 0x75a   : > { %5098 = vmatpush3.bf16.xpose.msra.mxu1 %v3738_v21  ;;  %5099 = vmatprep.mubr.msk.bf16.mxu1 %vm5333_vm14, %v5332_v14  ;;  %v3078_v55 = vsel %vm2397_vm4, %v3077_v54, %v3076_v63  ;;  %v2555_v21 = vsel %vm604_vm1, %v6252_v20, 0.0 }
 0x75b   : > { %v3079_v40 = vpack.c.b16 %v3078_v55, %v3078_v55 }
 0x75d   : > { %v3084_v56 = vsel %vm2667_vm6, %v3079_v40, 0 }
 0x75e   : > { %5080 = vmatpush3.bf16.msra.mxu0 %v3084_v56 }
 0x75f   : > { %5091 = vmatprep.subr.bf16.mxu0 %v5332_v14 }
 0x761   : > { %5100 = vmatmul.mubr.msk.bf16.vlgmr.msra.gmra.mxu1 %vm604_vm1, %v3646_v41  ;;  %v4910_v41 = vld.sshfl [vmem:[%s5529_s17 + $0x2] sm:$0x2 pattern:$0x76325410] }
 0x762   : > { %v3473_v29 = vunpack.c.l.b16 %v4910_v41 }
 0x809   : > { %v2705_v23 = vpop.f32.mrf.mxu1 }
 0x80a   : > { %v2711_v6 = vadd.f32 %v2705_v23, %v2567_v0  ;;  %v4912_v0 = vld.sshfl [vmem:[%s5529_s17 + $0x6] sm:$0x2 pattern:$0x76325410] }
 0x80b   : > { %v5071_v33 = vpop.f32.mrf.mxu1  ;;  %v4911_v23 = vld.sshfl [vmem:[%s5529_s17 + $0x4] sm:$0x2 pattern:$0x76325410] }
 0x80c   : > { %2712 = vst.msk [vmem:[#allocation4] sm:$0xff] %vm604_vm1, %v2711_v6  ;;  %v3480_v6 = vrot.slane %v3472_v46, 2  ;;  %v3481_v33 = vrot.slane %v3473_v29, 1  ;;  %v3474_v20 = vunpack.c.l.b16 %v4911_v23 }
 0x80d   : > { %v2708_v17 = vpop.f32.mrf.mxu1 }
 0x80e   : > { %v4913_v17 = vld.sshfl [vmem:[%s5529_s17 + $0x8] sm:$0x2 pattern:$0x76325410] }
 0x80f   : > { %v5072_v50 = vpop.f32.mrf.mxu1 }
 0x810   : > { %v3475_v50 = vunpack.c.l.b16 %v4912_v0 }
 0x811   : > { %v2944_v13 = vpop.f32.mrf.mxu1 }
 0x812   : > { %v6295_v42 = vsel %vm6086_vm5, -1e+30, %v2944_v13  ;;  %v3482_v13 = vsel %vm2379_vm11, %v3481_v33, %v3480_v6 }
 0x813   : > { %v5077_v19 = vpop.f32.mrf.mxu1  ;;  %v2953_v39 = vsel %vm604_vm1, %v6295_v42, -inf }
 0x814   : > { %2954 = vmax.xlane.f32.xlu1 %v2953_v39  ;;  %v4914_v19 = vld.sshfl [vmem:[%s5529_s17 + $0xa] sm:$0x2 pattern:$0x76325410]  ;;  %v3476_v39 = vunpack.c.l.b16 %v4913_v17 }
 0x815   : > { %v2947_v1 = vpop.f32.mrf.mxu1 }
 0x816   : > { %v3484_v1 = vrot.slane %v3475_v50, 7  ;;  %v3901_v57 = vrot.slane %v3476_v39, 7 }
 0x817   : > { %v5078_v45 = vpop.f32.mrf.mxu1 }
 0x818   : > { %v3483_v45 = vsel %vm2382_vm12, %v3474_v20, %v3482_v13  ;;  %v2553_v13 = vld [vmem:[#allocation3] sm:$0xff] }
 0x819   : > { %v3359_v36 = vpop.f32.mrf.mxu1 }
 0x81a   : > { %v6301_v8 = vsel %vm6086_vm5, -1e+30, %v3359_v36  ;;  %v4915_v36 = vld.sshfl [vmem:[%s5529_s17 + $0xc] sm:$0x2 pattern:$0x76325410] }
 0x81b   : > { %v5089_v24 = vpop.f32.mrf.mxu1  ;;  %v3368_v26 = vsel %vm604_vm1, %v6301_v8, -inf }
 0x81c   : > { %3369 = vmax.xlane.f32.xlu1 %v3368_v26  ;;  %v3477_v24 = vunpack.c.l.b16 %v4914_v19  ;;  %v3895_v26 = vrot.slane %v3472_v46, 3  ;;  %v2554_v19 = vmul.f32 %v6154_v28, %v2553_v13 }
 0x81d   : > { %v3362_v35 = vpop.f32.mrf.mxu1 }
 0x81e   : > { %v3896_v35 = vrot.slane %v3473_v29, 2  ;;  %v3903_v4 = vrot.slane %v3477_v24, 6 }
 0x81f   : > { %v5090_v52 = vpop.f32.mrf.mxu1 }
 0x820   : > { %v3486_v52 = vrot.slane %v3476_v39, 6 }
 0x821   : > { %v3774_v60 = vpop.f32.mrf.mxu1 }
 0x822   : > { %v6307_v47 = vsel %vm6086_vm5, -1e+30, %v3774_v60 }
 0x823   : > { %v5101_v32 = vpop.f32.mrf.mxu1  ;;  %v3783_v31 = vsel %vm604_vm1, %v6307_v47, -inf }
 0x824   : > { %3784 = vmax.xlane.f32.xlu1 %v3783_v31  ;;  %v3485_v32 = vsel %vm2385_vm13, %v3484_v1, %v3483_v45 }
 0x825   : > { %v3777_v49 = vpop.f32.mrf.mxu1  ;;  %v3487_v48 = vsel %vm2388_vm15, %v3486_v52, %v3485_v32  ;;  %v3799_v52 = vld [vmem:[#allocation3 + $0x18] sm:$0xff] }
 0x826   : > { %v4916_v49 = vld.sshfl [vmem:[%s5529_s17 + $0xe] sm:$0x2 pattern:$0x76325410] }
 0x827   : > { %v5102_v53 = vpop.f32.mrf.mxu1 }
 0x828   : > { %v3478_v53 = vunpack.c.l.b16 %v4915_v36  ;;  %v3384_v36 = vld [vmem:[#allocation3 + $0x10] sm:$0xff] }
 0x82a   : > { %v3490_v59 = vrot.slane %v3478_v53, 4 }
 0x89d   : > { %v2955_v9 = vpop.xlane.xlu1 %2954 }
 0x89e   : > { %v2956_v58 = vmax.f32 %v2952_v18, %v2955_v9  ;;  %v3488_v9 = vrot.slane %v3477_v24, 5 }
 0x8a0   : > { %3128 = vst.msk [vmem:[#allocation2 + $0x8] sm:$0xff] %vm595_vm0, %v2956_v58  ;;  %2962 = vperm.xlu1 %5213, %v2956_v58   ;;  %v2957_v62 = vsub.f32 %v2952_v18, %v2956_v58  ;;  %v3898_v18 = vrot.slane %v3474_v20, 1  ;;  %v3897_v58 = vsel %vm2379_vm11, %v3896_v35, %v3895_v26  ;;  %v3489_v15 = vsel %vm2391_vm2, %v3488_v9, %v3487_v48 }
 0x8a2   : > { %v2958_v7 = vmul.f32 1.442695, %v2957_v62  ;;  %v3899_v3 = vsel %vm2382_vm12, %v3898_v18, %v3897_v58  ;;  %v3392_v58 = vld [vmem:[#allocation4 + $0x10] sm:$0xff] }
 0x8a5   : > { %v3370_v16 = vpop.xlane.xlu1 %3369 }
 0x8a6   : > { %v3371_v38 = vmax.f32 %v3367_v12, %v3370_v16 }
 0x8a8   : > { %v3372_v34 = vsub.f32 %v3367_v12, %v3371_v38  ;;  %3543 = vst.msk [vmem:[#allocation2 + $0x10] sm:$0xff] %vm595_vm0, %v3371_v38  ;;  %3377 = vperm.xlu1 %5213, %v3371_v38   ;;  %v3479_v12 = vunpack.c.l.b16 %v4916_v49  ;;  %v3491_v38 = vsel %vm2394_vm3, %v3490_v59, %v3489_v15  ;;  %v2977_v49 = vld [vmem:[#allocation4 + $0x8] sm:$0xff]  ;;  %v3807_v15 = vld [vmem:[#allocation4 + $0x18] sm:$0xff] }
 0x8aa   : > { %v3373_v2 = vmul.f32 1.442695, %v3372_v34  ;;  %v3492_v51 = vrot.slane %v3479_v12, 3  ;;  %v3905_v34 = vrot.slane %v3478_v53, 5  ;;  %v3907_v40 = vrot.slane %v3479_v12, 4 }
 0x8ac   : > { %5218 = vpow2.f32 %v3373_v2  ;;  %v3493_v54 = vsel %vm2397_vm4, %v3492_v51, %v3491_v38 }
 0x8ad   : > { %v3785_v61 = vpop.xlane.xlu1 %3784  ;;  %5220 = vpow2.f32 %v2958_v7  ;;  %v3494_v55 = vpack.c.b16 %v3493_v54, %v3493_v54 }
 0x8ae   : > { %v6340_v44 = vmax.f32 %v6336_v27, %v3785_v61 }
 0x8af   : > { %v3499_v10 = vsel %vm2667_vm6, %v3494_v55, 0 }
 0x8b0   : > { %v3787_v30 = vsub.f32 %v6336_v27, %v6340_v44  ;;  %3958 = vst.msk [vmem:[#allocation2 + $0x18] sm:$0xff] %vm595_vm0, %v6340_v44  ;;  %3792 = vperm.xlu1 %5213, %v6340_v44   ;;  %v2969_v27 = vld [vmem:[#allocation3 + $0x8] sm:$0xff] }
 0x8b2   : > { %v3788_v6 = vmul.f32 1.442695, %v3787_v30 }
 0x8b9   : > { %v6348_v11 = vpop.eup %5218 }
 0x8ba   : > { %3395 = vperm.xlu0 %5212, %v6348_v11   ;;  %v6353_v43 = vpop.eup %5220  ;;  %v3385_v24 = vmul.f32 %v6348_v11, %v3384_v36 }
 0x8bb   : > { %v2970_v44 = vmul.f32 %v6353_v43, %v2969_v27 }
 0x8d4   : > { %2556 = vadd.xlane.f32.xlu1 %v2555_v21 }
 0x8e5   : > { %2980 = vperm.xlu1 %5213, %v6353_v43  }
 0x91b   : > { %v2963_v60 = vpop.permute.xlu1 %2962 }
 0x91c   : > { %v2965_v31 = vsub.f32 %v6295_v42, %v2963_v60  ;;  %v3900_v42 = vsel %vm2385_vm13, %v3475_v50, %v3899_v3 }
 0x91d   : > { %v3902_v37 = vsel %vm2388_vm15, %v3901_v57, %v3900_v42 }
 0x91e   : > { %v2966_v22 = vmul.f32 1.442695, %v2965_v31  ;;  %v3904_v63 = vsel %vm2391_vm2, %v3903_v4, %v3902_v37 }
 0x91f   : > { %v3906_v61 = vsel %vm2394_vm3, %v3905_v34, %v3904_v63 }
 0x920   : > { %5222 = vpow2.f32 %v2966_v22  ;;  %v3908_v41 = vsel %vm2397_vm4, %v3907_v40, %v3906_v61 }
 0x923   : > { %v3378_v16 = vpop.permute.xlu1 %3377 }
 0x924   : > { %v3380_v25 = vsub.f32 %v6301_v8, %v3378_v16 }
 0x926   : > { %v3381_v5 = vmul.f32 1.442695, %v3380_v25 }
 0x928   : > { %5224 = vpow2.f32 %v3381_v5 }
 0x92b   : > { %v3793_v2 = vpop.permute.xlu1 %3792 }
 0x92c   : > { %v3795_v56 = vsub.f32 %v6307_v47, %v3793_v2  ;;  %v3909_v47 = vpack.c.b16 %v3908_v41, %v3908_v41 }
 0x92d   : > { %v5223_v8 = vpop.eup %5222 }
 0x92e   : > { %v3796_v62 = vmul.f32 1.442695, %v3795_v56  ;;  %v2971_v7 = vsel %vm604_vm1, %v5223_v8, 0.0  ;;  %v2984_v21 = vpack.c.bf16 %v5223_v8, %v5223_v8  ;;  %v3914_v23 = vsel %vm2667_vm6, %v3909_v47, 0 }
 0x92f   : > { %2972 = vadd.xlane.f32.xlu0 %v2971_v7 }
 0x930   : > { %5226 = vpow2.f32 %v3796_v62  ;;  %5082 = vmatmul.mubr.msk.bf16.vlgmr.msra.gmra.mxu0 %vm604_vm1, %v2984_v21 }
 0x931   : > { %5092 = vmatpush3.bf16.msra.mxu0 %v3499_v10  ;;  %5093 = vmatprep.mubr.msk.bf16.mxu0 %vm5333_vm14, %v5332_v14  ;;  %5228 = vpow2.f32 %v3788_v6 }
 0x932   : > { %5103 = vmatprep.subr.bf16.mxu0 %v5332_v14 }
 0x935   : > { %v5225_v46 = vpop.eup %5224 }
 0x936   : > { %v3386_v29 = vsel %vm604_vm1, %v5225_v46, 0.0  ;;  %v3399_v0 = vpack.c.bf16 %v5225_v46, %v5225_v46 }
 0x937   : > { %3387 = vadd.xlane.f32.xlu0 %v3386_v29 }
 0x938   : > { %5094 = vmatmul.mubr.msk.bf16.vlgmr.msra.gmra.mxu0 %vm604_vm1, %v3399_v0 }
 0x939   : > { %5104 = vmatpush3.bf16.msra.mxu0 %v3914_v23  ;;  %5105 = vmatprep.mubr.msk.bf16.mxu0 %vm5333_vm14, %v5332_v14  ;;  %v3396_v14 = vpop.permute.xlu0 %3395 }
 0x93a   : > { %v3398_v48 = vmul.f32 %v3396_v14, %v3392_v58 }
 0x93d   : > { %v5227_v33 = vpop.eup %5226 }
 0x93e   : > { %v3801_v17 = vsel %vm604_vm1, %v5227_v33, 0.0  ;;  %v3814_v50 = vpack.c.bf16 %v5227_v33, %v5227_v33  ;;  %v5229_v20 = vpop.eup %5228 }
 0x93f   : > { %3802 = vadd.xlane.f32.xlu1 %v3801_v17  ;;  %v3800_v60 = vmul.f32 %v5229_v20, %v3799_v52 }
 0x940   : > { %5106 = vmatmul.mubr.msk.bf16.vlgmr.msra.gmra.mxu0 %vm604_vm1, %v3814_v50 }
 0x94d   : > { %3810 = vperm.xlu0 %5212, %v5229_v20  }
 0x95d   : > { %v2557_v39 = vpop.xlane.xlu1 %2556 }
 0x95e   : > { %v2558_v1 = vadd.f32 %v2557_v39, %v2554_v19 }
 0x960   : > { %2560 = vst.msk [vmem:[#allocation3] sm:$0xff] %vm595_vm0, %v2558_v1 }
 0x961   : > { %v2981_v28 = vpop.permute.xlu1 %2980 }
 0x962   : > { %v2983_v43 = vmul.f32 %v2981_v28, %v2977_v49 }
 0x9b8   : > { %v2973_v30 = vpop.xlane.xlu0 %2972 }
 0x9b9   : > { %v2974_v45 = vadd.f32 %v2973_v30, %v2970_v44 }
 0x9bb   : > { %2975 = vst.msk [vmem:[#allocation3 + $0x8] sm:$0xff] %vm595_vm0, %v2974_v45 }
 0x9c0   : > { %v3388_v26 = vpop.xlane.xlu0 %3387 }
 0x9c1   : > { %v3389_v35 = vadd.f32 %v3388_v26, %v3385_v24 }
 0x9c3   : > { %3390 = vst.msk [vmem:[#allocation3 + $0x10] sm:$0xff] %vm595_vm0, %v3389_v35 }
 0x9c8   : > { %v3803_v32 = vpop.xlane.xlu1 %3802  ;;  %v3811_v57 = vpop.permute.xlu0 %3810 }
 0x9c9   : > { %v3804_v31 = vadd.f32 %v3803_v32, %v3800_v60  ;;  %v3813_v42 = vmul.f32 %v3811_v57, %v3807_v15 }
 0x9cb   : > { %3805 = vst.msk [vmem:[#allocation3 + $0x18] sm:$0xff] %vm595_vm0, %v3804_v31 }
 0x9f0   : > { %v3120_v53 = vpop.f32.mrf.mxu0 }
 0x9f1   : > { %v3126_v18 = vadd.f32 %v3120_v53, %v2983_v43 }
 0x9f2   : > { %v5083_v9 = vpop.f32.mrf.mxu0 }
 0x9f3   : > { %3127 = vst.msk [vmem:[#allocation4 + $0x8] sm:$0xff] %vm604_vm1, %v3126_v18 }
 0x9f4   : > { %v3123_v11 = vpop.f32.mrf.mxu0 }
 0x9f6   : > { %v5084_v22 = vpop.f32.mrf.mxu0 }
 0x9f8   : > { %v3535_v12 = vpop.f32.mrf.mxu0 }
 0x9f9   : > { %v3541_v59 = vadd.f32 %v3535_v12, %v3398_v48 }
 0x9fa   : > { %v5095_v3 = vpop.f32.mrf.mxu0 }
 0x9fb   : > { %3542 = vst.msk [vmem:[#allocation4 + $0x10] sm:$0xff] %vm604_vm1, %v3541_v59 }
 0x9fc   : > { %v3538_v16 = vpop.f32.mrf.mxu0 }
 0x9fe   : > { %v5096_v51 = vpop.f32.mrf.mxu0 }
 0xa00   : > { %v3950_v25 = vpop.f32.mrf.mxu0 }
 0xa01   : > { %v3956_v38 = vadd.f32 %v3950_v25, %v3813_v42 }
 0xa02   : > { %v5107_v4 = vpop.f32.mrf.mxu0 }
 0xa03   : > { %3957 = vst.msk [vmem:[#allocation4 + $0x18] sm:$0xff] %vm604_vm1, %v3956_v38 }
 0xa04   : > { %v3953_v5 = vpop.f32.mrf.mxu0 }
 0xa06   : > { %v5108_v37 = vpop.f32.mrf.mxu0 }
 0xa07 PF: > { %v3962_v54 = vld [vmem:[#allocation3] sm:$0xff]  ;;  %v4254_v34 = vld [vmem:[#allocation3 + $0x10] sm:$0xff]  ;;  %v4108_v63 = vld [vmem:[#allocation3 + $0x8] sm:$0xff]  ;;  %v5335_v55 = vmov 0   ;;  %v5336_v0 = vmov 1966171168   ;;  %v3979_v6 = vlaneseq }
 0xa08   : > { %5230 = vset.pattern.permute.xlu0 %v5335_v55  ;;  %v3964_v2 = vmax.f32 %v3962_v54, 1e-30  ;;  %5231 = vset.pattern.permute.xlu1 %v5335_v55  ;;  %v4256_v40 = vmax.f32 %v4254_v34, 1e-30  ;;  %v4110_v56 = vmax.f32 %v4108_v63, 1e-30  ;;  %v3977_v23 = vunpack.c.l.s4 %v5336_v0 }
 0xa09   : > { %v4401_v61 = vld [vmem:[#allocation3 + $0x18] sm:$0xff]  ;;  %vm3963_vm0 = vcmp.gt.f32.partialorder %v3962_v54, 0.0  ;;  %vm4255_vm1 = vcmp.gt.f32.partialorder %v4254_v34, 0.0  ;;  %vm4109_vm7 = vcmp.gt.f32.partialorder %v4108_v63, 0.0  ;;  %v3980_v17 = vshrl.u32 %v3979_v6, 7  ;;  %v3967_v50 = vld [vmem:[#allocation4] sm:$0xff] }
 0xa0a   : > { %5232 = vrcp.f32 %v3964_v2  ;;  %v4403_v8 = vmax.f32 %v4401_v61, 1e-30  ;;  %vm4402_vm8 = vcmp.gt.f32.partialorder %v4401_v61, 0.0  ;;  %v3978_v33 = vunpack.c.0.s8 %v3977_v23  ;;  %v4114_v39 = vld [vmem:[#allocation4 + $0x8] sm:$0xff]  ;;  %v4260_v27 = vld [vmem:[#allocation4 + $0x10] sm:$0xff]  ;;  %v4407_v52 = vld [vmem:[#allocation4 + $0x18] sm:$0xff] }
 0xa0b   : > { %5234 = vrcp.f32 %v4256_v40  ;;  %v5337_v20 = vmov 857870592   ;;  %vm4080_vm9 = vcmask 57344   ;;  %vm4081_vm10 = vsmask.f32 256 }
 0xa0c   : > { %5236 = vrcp.f32 %v4110_v56  ;;  %v4017_v13 = vunpack.c.l.s4 %v5337_v20  ;;  %v6407_v1 = vsub.s32 %v3978_v33, %v3980_v17  ;;  %vm4373_vm11 = vcmask 58369   ;;  %vm6429_vm13 = vmand %vm4080_vm9, %vm4081_vm10  ;;  %v4083_v57 = vld [vmem:[%s5519_s11] sm:$0x1]  ;;  %v4086_v54 = vld [vmem:[%s5519_s11 + $0x2] sm:$0x1] }
 0xa0d   : > { %5238 = vrcp.f32 %v4403_v8  ;;  %vm4374_vm12 = vsmask.f32 1280  ;;  %v4089_v34 = vld [vmem:[%s5519_s11 + $0x4] sm:$0x1]  ;;  %v4095_v63 = vld [vmem:[%s5519_s11 + $0x8] sm:$0x1] }
 0xa0e   : > { %v4018_v36 = vunpack.c.0.s8 %v4017_v13  ;;  %v4092_v61 = vld [vmem:[%s5519_s11 + $0x6] sm:$0x1]  ;;  %v4098_v8 = vld [vmem:[%s5519_s11 + $0xa] sm:$0x1]  ;;  %v4104_v23 = vld [vmem:[%s5519_s11 + $0xe] sm:$0x1] }
 0xa0f   : > { %vm4227_vm14 = vsmask.f32 7938  ;;  %vm6485_vm15 = vmand %vm4373_vm11, %vm4374_vm12  ;;  %vm4520_vm3 = vsmask.f32 7942 }
 0xa10   : > { %v6414_v53 = vsub.s32 %v4018_v36, %v3980_v17  ;;  %vm6539_vm2 = vmand %vm4080_vm9, %vm4227_vm14 }
 0xa11   : > { %vm6597_vm4 = vmand %vm4373_vm11, %vm4520_vm3 }
 0xa17   : > { %v5233_v62 = vpop.eup %5232 }
 0xa18   : > { %v5235_v7 = vpop.eup %5234  ;;  %v3966_v21 = vsel %vm3963_vm0, %v5233_v62, 0.0  ;;  %v4101_v62 = vld [vmem:[%s5519_s11 + $0xc] sm:$0x1] }
 0xa19   : > { %v5237_v10 = vpop.eup %5236  ;;  %3970 = vperm.xlu0 %5230, %v3966_v21   ;;  %v4258_v47 = vsel %vm4255_vm1, %v5235_v7, 0.0 }
 0xa1a   : > { %v5239_v41 = vpop.eup %5238  ;;  %v4112_v46 = vsel %vm4109_vm7, %v5237_v10, 0.0 }
 0xa1b   : > { %4117 = vperm.xlu1 %5231, %v4112_v46   ;;  %v4405_v29 = vsel %vm4402_vm8, %v5239_v41, 0.0 }
 0xa1d   : > { %4263 = vperm.xlu0 %5230, %v4258_v47  }
 0xa1f   : > { %4410 = vperm.xlu1 %5231, %v4405_v29  }
 0xa94   : > { %v3971_v19 = vpop.permute.xlu0 %3970 }
 0xa95   : > { %v3973_v14 = vmul.f32 %v3971_v19, %v3967_v50 }
 0xa96   : > { %v4118_v44 = vpop.permute.xlu1 %4117 }
 0xa97   : > { %v3974_v30 = vpack.c.bf16 %v3973_v14, %v3973_v14  ;;  %v4120_v45 = vmul.f32 %v4118_v44, %v4114_v39 }
 0xa98   : > { %v4264_v24 = vpop.permute.xlu0 %4263 }
 0xa99   : > { %v3982_v26 = vrot.slane %v3974_v30, %v6407_v1  ;;  %v4266_v35 = vmul.f32 %v4264_v24, %v4260_v27  ;;  %v4121_v28 = vpack.c.bf16 %v4120_v45, %v4120_v45 }
 0xa9a   : > { %v4411_v60 = vpop.permute.xlu1 %4410 }
 0xa9b   : > { %v3983_v32 = vcombine.high %v3982_v26, %v3982_v26  ;;  %v3990_v31 = vrot.slane %v3982_v26, %v6407_v1  ;;  %v4267_v49 = vpack.c.bf16 %v4266_v35, %v4266_v35  ;;  %v6412_v43 = vrot.slane %v4121_v28, %v6407_v1  ;;  %v4376_v28 = vld [vmem:[%s5519_s11] sm:$0x2] }
 0xa9c   : > { %v6416_v18 = vmul.f32 %v4411_v60, %v4407_v52 }
 0xa9d   : > { %v3997_v9 = vrot.slane %v3983_v32, %v6407_v1  ;;  %v3998_v58 = vcombine.high %v3990_v31, %v3990_v31  ;;  %v4001_v11 = vunpack.i.h.s16 %v3990_v31  ;;  %v4944_v22 = vpack.i.b16 %v3990_v31, %v3990_v31 }
 0xa9e   : > { %v4275_v48 = vrot.slane %v4267_v49, %v6407_v1  ;;  %v4130_v12 = vcombine.high %v6412_v43, %v6412_v43  ;;  %v6424_v59 = vrot.slane %v6412_v43, %v6407_v1  ;;  %v4414_v3 = vpack.c.bf16 %v6416_v18, %v6416_v18 }
 0xa9f   : > { %v3999_v16 = vcombine.high %v3997_v9, %v3997_v9  ;;  %v4003_v51 = vunpack.i.h.s16 %v3997_v9  ;;  %v4005_v42 = vunpack.i.h.s16 %v3998_v58  ;;  %v4009_v25 = vpack.i.b16 %v4001_v11, %v4001_v11  ;;  %v4379_v11 = vld [vmem:[%s5519_s11 + $0x2] sm:$0x2] }
 0xaa0   : > { %v4945_v38 = vpack.i.b16 %v3997_v9, %v3997_v9  ;;  %v4946_v4 = vpack.i.b16 %v3998_v58, %v3998_v58  ;;  %v4022_v5 = vrot.slane %v4944_v22, %v6414_v53  ;;  %v4276_v37 = vcombine.high %v4275_v48, %v4275_v48  ;;  %v4382_v22 = vld [vmem:[%s5519_s11 + $0x4] sm:$0x2] }
 0xaa1   : > { %v4007_v55 = vunpack.i.h.s16 %v3999_v16  ;;  %v4011_v2 = vpack.i.b16 %v4003_v51, %v4003_v51  ;;  %v4013_v40 = vpack.i.b16 %v4005_v42, %v4005_v42  ;;  %v4947_v56 = vpack.i.b16 %v3999_v16, %v3999_v16  ;;  %v4385_v51 = vld [vmem:[%s5519_s11 + $0x6] sm:$0x2]  ;;  %v4391_v42 = vld [vmem:[%s5519_s11 + $0xa] sm:$0x2] }
 0xaa2   : > { %v4029_v7 = vrot.slane %v4009_v25, %v6414_v53  ;;  %v4036_v21 = vrot.slane %v4945_v38, %v6414_v53  ;;  %v4050_v10 = vrot.slane %v4946_v4, %v6414_v53  ;;  %v4084_v41 = vsel %vm6429_vm13, %v4022_v5, %v4083_v57  ;;  %v4394_v25 = vld [vmem:[%s5519_s11 + $0xc] sm:$0x2] }
 0xaa3   : > { %v4015_v47 = vpack.i.b16 %v4007_v55, %v4007_v55  ;;  %v4043_v46 = vrot.slane %v4011_v2, %v6414_v53  ;;  %v4057_v29 = vrot.slane %v4013_v40, %v6414_v53  ;;  %v4064_v0 = vrot.slane %v4947_v56, %v6414_v53  ;;  %4085 = vst [vmem:[%s5519_s11] sm:$0x1] %v4084_v41  ;;  %v4397_v2 = vld [vmem:[%s5519_s11 + $0xe] sm:$0x2] }
 0xaa4   : > { %v4087_v6 = vsel %vm6429_vm13, %v4029_v7, %v4086_v54  ;;  %v4090_v33 = vsel %vm6429_vm13, %v4036_v21, %v4089_v34  ;;  %v4096_v17 = vsel %vm6429_vm13, %v4050_v10, %v4095_v63  ;;  %v4283_v50 = vrot.slane %v4275_v48, %v6407_v1  ;;  %v4388_v48 = vld [vmem:[%s5519_s11 + $0x8] sm:$0x2] }
 0xaa5   : > { %v4071_v20 = vrot.slane %v4015_v47, %v6414_v53  ;;  %4088 = vst [vmem:[%s5519_s11 + $0x2] sm:$0x1] %v4087_v6  ;;  %4091 = vst [vmem:[%s5519_s11 + $0x4] sm:$0x1] %v4090_v33  ;;  %v4093_v13 = vsel %vm6429_vm13, %v4043_v46, %v4092_v61  ;;  %v4099_v19 = vsel %vm6429_vm13, %v4057_v29, %v4098_v8  ;;  %v4148_v26 = vunpack.i.h.s16 %v6424_v59 }
 0xaa6   : > { %4097 = vst [vmem:[%s5519_s11 + $0x8] sm:$0x1] %v4096_v17  ;;  %v4102_v39 = vsel %vm6429_vm13, %v4064_v0, %v4101_v62  ;;  %4094 = vst [vmem:[%s5519_s11 + $0x6] sm:$0x1] %v4093_v13  ;;  %v4290_v14 = vrot.slane %v4276_v37, %v6407_v1  ;;  %v4291_v27 = vcombine.high %v4283_v50, %v4283_v50  ;;  %v4294_v44 = vunpack.i.h.s16 %v4283_v50 }
 0xaa7   : > { %4100 = vst [vmem:[%s5519_s11 + $0xa] sm:$0x1] %v4099_v19  ;;  %4103 = vst [vmem:[%s5519_s11 + $0xc] sm:$0x1] %v4102_v39  ;;  %v4952_v30 = vpack.i.b16 %v4283_v50, %v4283_v50  ;;  %v4105_v45 = vsel %vm6429_vm13, %v4071_v20, %v4104_v23  ;;  %v6475_v36 = vrot.slane %v4130_v12, %v6407_v1 }
 0xaa8   : > { %v6479_v24 = vcombine.high %v6424_v59, %v6424_v59  ;;  %4106 = vst [vmem:[%s5519_s11 + $0xe] sm:$0x1] %v4105_v45  ;;  %v4292_v52 = vcombine.high %v4290_v14, %v4290_v14  ;;  %v4296_v60 = vunpack.i.h.s16 %v4290_v14  ;;  %v4298_v32 = vunpack.i.h.s16 %v4291_v27 }
 0xaa9   : > { %v4302_v31 = vpack.i.b16 %v4294_v44, %v4294_v44  ;;  %v4953_v49 = vpack.i.b16 %v4290_v14, %v4290_v14  ;;  %v4954_v43 = vpack.i.b16 %v4291_v27, %v4291_v27  ;;  %v4315_v9 = vrot.slane %v4952_v30, %v6414_v53 }
 0xaaa   : > { %v6493_v58 = vcombine.high %v6475_v36, %v6475_v36  ;;  %v4300_v12 = vunpack.i.h.s16 %v4292_v52  ;;  %v4304_v15 = vpack.i.b16 %v4296_v60, %v4296_v60  ;;  %v4306_v57 = vpack.i.b16 %v4298_v32, %v4298_v32 }
 0xaab   : > { %v4955_v16 = vpack.i.b16 %v4292_v52, %v4292_v52  ;;  %v4322_v38 = vrot.slane %v4302_v31, %v6414_v53  ;;  %v4329_v4 = vrot.slane %v4953_v49, %v6414_v53  ;;  %v4343_v5 = vrot.slane %v4954_v43, %v6414_v53 }
 0xaac   : > { %v4377_v37 = vsel %vm6485_vm15, %v4315_v9, %v4376_v28  ;;  %v4308_v54 = vpack.i.b16 %v4300_v12, %v4300_v12  ;;  %v4336_v34 = vrot.slane %v4304_v15, %v6414_v53  ;;  %v4350_v63 = vrot.slane %v4306_v57, %v6414_v53  ;;  %v4232_v50 = vld [vmem:[%s5519_s11 + $0x2] sm:$0x1]  ;;  %v4235_v14 = vld [vmem:[%s5519_s11 + $0x4] sm:$0x1] }
 0xaad   : > { %v4357_v55 = vrot.slane %v4955_v16, %v6414_v53  ;;  %4378 = vst [vmem:[%s5519_s11] sm:$0x2] %v4377_v37  ;;  %v4380_v40 = vsel %vm6485_vm15, %v4322_v38, %v4379_v11  ;;  %v4383_v56 = vsel %vm6485_vm15, %v4329_v4, %v4382_v22  ;;  %v4389_v61 = vsel %vm6485_vm15, %v4343_v5, %v4388_v48  ;;  %v4238_v27 = vld [vmem:[%s5519_s11 + $0x6] sm:$0x1]  ;;  %v4241_v44 = vld [vmem:[%s5519_s11 + $0x8] sm:$0x1] }
 0xaae   : > { %v4150_v8 = vunpack.i.h.s16 %v6475_v36  ;;  %v4364_v62 = vrot.slane %v4308_v54, %v6414_v53  ;;  %4381 = vst [vmem:[%s5519_s11 + $0x2] sm:$0x2] %v4380_v40  ;;  %4384 = vst [vmem:[%s5519_s11 + $0x4] sm:$0x2] %v4383_v56  ;;  %v4386_v7 = vsel %vm6485_vm15, %v4336_v34, %v4385_v51  ;;  %v4392_v21 = vsel %vm6485_vm15, %v4350_v63, %v4391_v42  ;;  %v4247_v35 = vld [vmem:[%s5519_s11 + $0xc] sm:$0x1] }
 0xaaf   : > { %4390 = vst [vmem:[%s5519_s11 + $0x8] sm:$0x2] %v4389_v61  ;;  %v4395_v10 = vsel %vm6485_vm15, %v4357_v55, %v4394_v25  ;;  %4387 = vst [vmem:[%s5519_s11 + $0x6] sm:$0x2] %v4386_v7  ;;  %v4152_v41 = vunpack.i.h.s16 %v6479_v24  ;;  %v4154_v47 = vunpack.i.h.s16 %v6493_v58  ;;  %v4948_v46 = vpack.i.b16 %v6424_v59, %v6424_v59  ;;  %v4229_v59 = vld [vmem:[%s5519_s11] sm:$0x1] }
 0xab0   : > { %4393 = vst [vmem:[%s5519_s11 + $0xa] sm:$0x2] %v4392_v21  ;;  %4396 = vst [vmem:[%s5519_s11 + $0xc] sm:$0x2] %v4395_v10  ;;  %v4156_v29 = vpack.i.b16 %v4148_v26, %v4148_v26  ;;  %v4398_v0 = vsel %vm6485_vm15, %v4364_v62, %v4397_v2  ;;  %v4949_v6 = vpack.i.b16 %v6475_v36, %v6475_v36  ;;  %v4244_v26 = vld [vmem:[%s5519_s11 + $0xa] sm:$0x1] }
 0xab1   : > { %v4158_v33 = vpack.i.b16 %v4150_v8, %v4150_v8  ;;  %v4950_v17 = vpack.i.b16 %v6479_v24, %v6479_v24  ;;  %4399 = vst [vmem:[%s5519_s11 + $0xe] sm:$0x2] %v4398_v0  ;;  %v4160_v20 = vpack.i.b16 %v4152_v41, %v4152_v41  ;;  %v4951_v13 = vpack.i.b16 %v6493_v58, %v6493_v58  ;;  %v4250_v28 = vld [vmem:[%s5519_s11 + $0xe] sm:$0x1] }
 0xab2   : > { %v4162_v19 = vpack.i.b16 %v4154_v47, %v4154_v47  ;;  %v4169_v39 = vrot.slane %v4948_v46, %v6414_v53  ;;  %v4176_v30 = vrot.slane %v4156_v29, %v6414_v53  ;;  %v4183_v45 = vrot.slane %v4949_v6, %v6414_v53 }
 0xab3   : > { %v4190_v36 = vrot.slane %v4158_v33, %v6414_v53  ;;  %v4197_v24 = vrot.slane %v4950_v17, %v6414_v53  ;;  %v4204_v52 = vrot.slane %v4160_v20, %v6414_v53  ;;  %v4211_v60 = vrot.slane %v4951_v13, %v6414_v53 }
 0xab4   : > { %v4218_v32 = vrot.slane %v4162_v19, %v6414_v53  ;;  %v4230_v31 = vsel %vm6539_vm2, %v4169_v39, %v4229_v59  ;;  %v4233_v49 = vsel %vm6539_vm2, %v4176_v30, %v4232_v50  ;;  %v4236_v43 = vsel %vm6539_vm2, %v4183_v45, %v4235_v14  ;;  %v4522_v37 = vld [vmem:[%s5519_s11] sm:$0x2] }
 0xab5   : > { %4231 = vst [vmem:[%s5519_s11] sm:$0x1] %v4230_v31  ;;  %v4239_v9 = vsel %vm6539_vm2, %v4190_v36, %v4238_v27  ;;  %v4242_v58 = vsel %vm6539_vm2, %v4197_v24, %v4241_v44  ;;  %4234 = vst [vmem:[%s5519_s11 + $0x2] sm:$0x1] %v4233_v49  ;;  %v4245_v11 = vsel %vm6539_vm2, %v4204_v52, %v4244_v26  ;;  %v4525_v56 = vld [vmem:[%s5519_s11 + $0x2] sm:$0x2] }
 0xab6   : > { %4237 = vst [vmem:[%s5519_s11 + $0x4] sm:$0x1] %v4236_v43  ;;  %4240 = vst [vmem:[%s5519_s11 + $0x6] sm:$0x1] %v4239_v9  ;;  %v4248_v22 = vsel %vm6539_vm2, %v4211_v60, %v4247_v35  ;;  %v4251_v48 = vsel %vm6539_vm2, %v4218_v32, %v4250_v28  ;;  %v4422_v12 = vrot.slane %v4414_v3, %v6407_v1  ;;  %v4528_v61 = vld [vmem:[%s5519_s11 + $0x4] sm:$0x2] }
 0xab7   : > { %4243 = vst [vmem:[%s5519_s11 + $0x8] sm:$0x1] %v4242_v58  ;;  %4246 = vst [vmem:[%s5519_s11 + $0xa] sm:$0x1] %v4245_v11  ;;  %v4534_v8 = vld [vmem:[%s5519_s11 + $0x8] sm:$0x2] }
 0xab8   : > { %4249 = vst [vmem:[%s5519_s11 + $0xc] sm:$0x1] %v4248_v22  ;;  %4252 = vst [vmem:[%s5519_s11 + $0xe] sm:$0x1] %v4251_v48  ;;  %v4423_v15 = vcombine.high %v4422_v12, %v4422_v12  ;;  %v4430_v57 = vrot.slane %v4422_v12, %v6407_v1  ;;  %v4531_v41 = vld [vmem:[%s5519_s11 + $0x6] sm:$0x2] }
 0xab9   : > { %v4537_v47 = vld [vmem:[%s5519_s11 + $0xa] sm:$0x2]  ;;  %v4540_v46 = vld [vmem:[%s5519_s11 + $0xc] sm:$0x2]  ;;  %v4543_v50 = vld [vmem:[%s5519_s11 + $0xe] sm:$0x2] }
 0xaba   : > { %v4437_v16 = vrot.slane %v4423_v15, %v6407_v1  ;;  %v4438_v51 = vcombine.high %v4430_v57, %v4430_v57  ;;  %v4441_v42 = vunpack.i.h.s16 %v4430_v57  ;;  %v4956_v25 = vpack.i.b16 %v4430_v57, %v4430_v57 }
 0xabc   : > { %v4439_v3 = vcombine.high %v4437_v16, %v4437_v16  ;;  %v4443_v38 = vunpack.i.h.s16 %v4437_v16  ;;  %v4445_v4 = vunpack.i.h.s16 %v4438_v51  ;;  %v4449_v5 = vpack.i.b16 %v4441_v42, %v4441_v42 }
 0xabd   : > { %v4957_v54 = vpack.i.b16 %v4437_v16, %v4437_v16  ;;  %v4958_v1 = vpack.i.b16 %v4438_v51, %v4438_v51  ;;  %v4462_v34 = vrot.slane %v4956_v25, %v6414_v53 }
 0xabe   : > { %v4447_v63 = vunpack.i.h.s16 %v4439_v3  ;;  %v4451_v55 = vpack.i.b16 %v4443_v38, %v4443_v38  ;;  %v4453_v2 = vpack.i.b16 %v4445_v4, %v4445_v4  ;;  %v4959_v40 = vpack.i.b16 %v4439_v3, %v4439_v3 }
 0xabf   : > { %v4469_v62 = vrot.slane %v4449_v5, %v6414_v53  ;;  %v4476_v7 = vrot.slane %v4957_v54, %v6414_v53  ;;  %v4490_v21 = vrot.slane %v4958_v1, %v6414_v53  ;;  %v4523_v10 = vsel %vm6597_vm4, %v4462_v34, %v4522_v37 }
 0xac0   : > { %v4455_v29 = vpack.i.b16 %v4447_v63, %v4447_v63  ;;  %v4483_v0 = vrot.slane %v4451_v55, %v6414_v53  ;;  %v4497_v23 = vrot.slane %v4453_v2, %v6414_v53  ;;  %v4504_v6 = vrot.slane %v4959_v40, %v6414_v53  ;;  %4524 = vst [vmem:[%s5519_s11] sm:$0x2] %v4523_v10 }
 0xac1   : > { %v4526_v33 = vsel %vm6597_vm4, %v4469_v62, %v4525_v56  ;;  %v4529_v17 = vsel %vm6597_vm4, %v4476_v7, %v4528_v61  ;;  %v4535_v59 = vsel %vm6597_vm4, %v4490_v21, %v4534_v8 }
 0xac2   : > { %v4511_v20 = vrot.slane %v4455_v29, %v6414_v53  ;;  %4527 = vst [vmem:[%s5519_s11 + $0x2] sm:$0x2] %v4526_v33  ;;  %4530 = vst [vmem:[%s5519_s11 + $0x4] sm:$0x2] %v4529_v17  ;;  %v4532_v13 = vsel %vm6597_vm4, %v4483_v0, %v4531_v41  ;;  %v4538_v19 = vsel %vm6597_vm4, %v4497_v23, %v4537_v47 }
 0xac3   : > { %4536 = vst [vmem:[%s5519_s11 + $0x8] sm:$0x2] %v4535_v59  ;;  %v4541_v39 = vsel %vm6597_vm4, %v4504_v6, %v4540_v46  ;;  %4533 = vst [vmem:[%s5519_s11 + $0x6] sm:$0x2] %v4532_v13 }
 0xac4   : > { %4539 = vst [vmem:[%s5519_s11 + $0xa] sm:$0x2] %v4538_v19  ;;  %4542 = vst [vmem:[%s5519_s11 + $0xc] sm:$0x2] %v4541_v39  ;;  %v4544_v14 = vsel %vm6597_vm4, %v4511_v20, %v4543_v50 }
 0xac5   : > { %4545 = vst [vmem:[%s5519_s11 + $0xe] sm:$0x2] %v4544_v14 }
 0xac6 PF: > { %s20_s27 = sadd.s32 1, %s5324_s27   ;;  %s6692_s25 = sld [smem:[#allocation12_spill]] }
 0xac7   : > { %p17_p12 = scmp.ge.s32.totalorder %s20_s27, 4   ;;  %s6693_s18 = sld [smem:[#allocation11_spill]] }
 0xac8   : > { %s6694_s20 = smov %s5296_s21  ;;  %s6695_s21 = smov %s5468_s16 }
 0xac9   : > { %s6696_s22 = smov %s5304_s0  ;;  %s6697_s0 = smov %s5463_s7 }
 0xaca   : > { %s6698_s23 = smov %s5312_s24  ;;  %19 = sbr.rel (!%p17_p12) target bundleno = 20 (0x14), region = 246 }
 0xacc   : > { %s6699_s24 = smov %s6692_s25  ;;  %s6700_s25 = smov %s5320_s26 }
 0xacd   : > { %s6701_s26 = smov %s6693_s18 }

</bundles_post_ra>
